<compile_context>
chip_gen: v7x
topology: tpu7x:2x2x1
jax: 0.10.0
libtpu: 0.0.40
codegen_flags: <defaults>
</compile_context>

<pallas_src>
import math

import jax
import jax.numpy as jnp
from jax.experimental import pallas as pl
from jax.experimental.pallas import tpu as pltpu

# ----------------------------------------------------------------------------
# Synthetic mini-BERT config (stands in for BertModel.from_pretrained; weights
# are initialized deterministically in-script, NOT loaded from a checkpoint).
# ----------------------------------------------------------------------------
VOCAB = 100
HIDDEN = 32
NUM_HEADS = 4
HEAD_DIM = HIDDEN // NUM_HEADS
NUM_LAYERS = 2
INTERMEDIATE = 64
MAX_POS = 16
NUM_CLASS = 5
LN_EPS = 1e-12

# Lane-dense padded widths (multiples of the 128-lane vreg width).
QKV_PAD = 128          # fused Q|K|V (3*HIDDEN = 96) zero-padded to 128 lanes
CLS_PAD = 128          # classifier logits (NUM_CLASS = 5) padded to 128 lanes
POOL_PAD = 128         # pooler output (HIDDEN = 32) padded to 128 lanes
NEG_BIG = -30000.0     # bias pad value -> exp underflows to 0 in the LSE

B, S = 2, 8            # batch, sequence length
M = B * S


# ----------------------------------------------------------------------------
# Single fused Pallas kernel: the whole model forward pass.
# ----------------------------------------------------------------------------
def _bert_fused_kernel(
    emb_ref, bias_ref, onehot_ref, clssel_ref,
    emb_g_ref, emb_b_ref,
    wqkv_ref, bqkv_ref,
    wo_ref, bo_ref,
    wi_ref, bi_ref,
    wf_ref, bf_ref,
    ln1g_ref, ln1b_ref, ln2g_ref, ln2b_ref,
    wp_ref, bp_ref, wc_ref, bc_ref,
    loss_ref, pooled_ref,
):
    f32 = jnp.float32
    bf16 = jnp.bfloat16

    def mm(a_bf, w_bf):
        # Both operands already bf16 (weights pre-cast at pack time, activations
        # cast once at each producer); f32 accumulation on the MXU.
        return jnp.dot(a_bf, w_bf, preferred_element_type=f32)

    def ln(x, g, b):
        mu = jnp.mean(x, axis=-1, keepdims=True)
        var = jnp.mean(jnp.square(x - mu), axis=-1, keepdims=True)
        return (x - mu) * jax.lax.rsqrt(var + LN_EPS) * g + b

    # --- embedding LayerNorm ---------------------------------------------------
    x = ln(emb_ref[...], emb_g_ref[...], emb_b_ref[...])            # (M, H) f32
    n_tok = x.shape[0]
    # Hoist the head-broadcast of the additive bias out of the layer loop.
    bias3 = jnp.broadcast_to(bias_ref[...][None, :, :],
                             (NUM_HEADS, n_tok, n_tok))             # (NH, M, M)

    # TODO(synk): all dropout layers (BERT internals p=0.1, head self.l2 p=0.3)
    # are identity here (eval-mode semantics; no RNG dropout applied).

    # --- transformer encoder layers (statically unrolled, L=2) ------------------
    for l in range(NUM_LAYERS):
        x_bf = x.astype(bf16)
        # Fused, lane-padded QKV projection; softmax scale already folded into Q.
        qkv = mm(x_bf, wqkv_ref[l]) + bqkv_ref[l]                    # (M, 128) f32
        # Heads onto a batch axis once per layer: (M, 16, D) -> (16, M, D).
        qkv3 = jnp.transpose(
            qkv.astype(bf16).reshape(n_tok, QKV_PAD // HEAD_DIM, HEAD_DIM),
            (1, 0, 2))
        q3 = qkv3[:NUM_HEADS]                                        # (NH, M, D)
        k3 = qkv3[NUM_HEADS:2 * NUM_HEADS]                           # (NH, M, D)
        v3 = qkv3[2 * NUM_HEADS:3 * NUM_HEADS]                       # (NH, M, D)

        # Batched scores / softmax / context (one einsum each per layer).
        s = jnp.einsum('hqd,hkd->hqk', q3, k3,
                       preferred_element_type=f32)                   # (NH, M, M)
        s = s + bias3
        s = s - jnp.max(s, axis=-1, keepdims=True)
        p = jnp.exp(s)
        p = p * pl.reciprocal(jnp.sum(p, axis=-1, keepdims=True), approx=True)
        ctx = jnp.einsum('hqk,hkd->hqd', p.astype(bf16), v3,
                         preferred_element_type=f32)                 # (NH, M, D)

        # Re-assemble heads contiguously on lanes; single (H, H) output proj.
        ctx_all = jnp.transpose(ctx, (1, 0, 2)).reshape(n_tok, HIDDEN)
        attn = mm(ctx_all.astype(bf16), wo_ref[l]) + bo_ref[l]       # (M, H)
        x = ln(attn + x, ln1g_ref[l], ln1b_ref[l])

        # TODO(synk): HF BERT default is exact (erf) gelu; tanh approximation here.
        x_bf = x.astype(bf16)
        inter = jax.nn.gelu(mm(x_bf, wi_ref[l]) + bi_ref[l], approximate=True)
        ffn = mm(inter.astype(bf16), wf_ref[l]) + bf_ref[l]
        x = ln(ffn + x, ln2g_ref[l], ln2b_ref[l])

    x_bf = x.astype(bf16)

    # --- pooler: tanh(W_p @ [CLS] + b_p) == output_1 ----------------------------
    # [CLS] rows picked with a tiny bf16 0/1 selection matmul (exact selection).
    cls = mm(clssel_ref[...], x_bf)                                  # (B, H) f32
    pooled_ref[...] = jnp.tanh(mm(cls.astype(bf16), wp_ref[...]) + bp_ref[...])

    # --- classifier head (self.l3) + CrossEntropyLoss over all B*S tokens -------
    # Padded logit columns carry bias -3e4 -> exp underflows to 0 in the LSE.
    logits = mm(x_bf, wc_ref[...]) + bc_ref[...]                     # (M, 128)
    mx = jnp.max(logits, axis=-1, keepdims=True)
    z = logits - mx
    lse = jnp.log(jnp.sum(jnp.exp(z), axis=-1, keepdims=True)) + mx
    picked = jnp.sum(logits * onehot_ref[...], axis=-1, keepdims=True)
    # TODO(synk): PyTorch CrossEntropyLoss ignore_index=-100 is not handled
    # (all labels here are valid class ids, so the mean matches the reference).
    loss_ref[...] = jnp.mean(lse - picked, keepdims=True)            # (1, 1)


# ----------------------------------------------------------------------------
# Parameters (deterministic init) + one-time packing (QKV fusion, lane padding,
# scale folding, bf16 cast).
# ----------------------------------------------------------------------------
def init_params(key):
    keys = iter(jax.random.split(key, 8 + 6 * NUM_LAYERS))

    def nrm(shape):
        return 0.02 * jax.random.normal(next(keys), shape, jnp.float32)

    zeros = lambda n: jnp.zeros((n,), jnp.float32)
    ones = lambda n: jnp.ones((n,), jnp.float32)

    params = {
        "word_emb": nrm((VOCAB, HIDDEN)),
        "pos_emb": nrm((MAX_POS, HIDDEN)),
        "type_emb": nrm((2, HIDDEN)),
        "emb_ln_g": ones(HIDDEN), "emb_ln_b": zeros(HIDDEN),
        "wp": nrm((HIDDEN, HIDDEN)), "bp": zeros(HIDDEN),          # pooler
        "wc": nrm((HIDDEN, NUM_CLASS)), "bc": zeros(NUM_CLASS),    # classifier (self.l3)
        "layers": [],
    }
    for _ in range(NUM_LAYERS):
        params["layers"].append({
            "wq": nrm((HIDDEN, HIDDEN)), "bq": zeros(HIDDEN),
            "wk": nrm((HIDDEN, HIDDEN)), "bk": zeros(HIDDEN),
            "wv": nrm((HIDDEN, HIDDEN)), "bv": zeros(HIDDEN),
            "wo": nrm((HIDDEN, HIDDEN)), "bo": zeros(HIDDEN),
            "wi": nrm((HIDDEN, INTERMEDIATE)), "bi": zeros(INTERMEDIATE),
            "wf": nrm((INTERMEDIATE, HIDDEN)), "bf": zeros(HIDDEN),
            "ln1_g": ones(HIDDEN), "ln1_b": zeros(HIDDEN),
            "ln2_g": ones(HIDDEN), "ln2_b": zeros(HIDDEN),
        })
    return params


def pack_params(params):
    """Stack layers, fuse QKV (+fold softmax scale into Q), lane-pad, cast bf16."""
    bf16 = jnp.bfloat16
    f32 = jnp.float32
    layers = params["layers"]
    scale = 1.0 / math.sqrt(HEAD_DIM)
    stack = lambda name: jnp.stack([lp[name] for lp in layers])

    wqkv, bqkv = [], []
    for lp in layers:
        w = jnp.concatenate(
            [lp["wq"] * scale, lp["wk"], lp["wv"],
             jnp.zeros((HIDDEN, QKV_PAD - 3 * HIDDEN), f32)], axis=1)
        b = jnp.concatenate(
            [lp["bq"] * scale, lp["bk"], lp["bv"],
             jnp.zeros((QKV_PAD - 3 * HIDDEN,), f32)])
        wqkv.append(w)
        bqkv.append(b[None, :])

    wc_pad = jnp.concatenate(
        [params["wc"], jnp.zeros((HIDDEN, CLS_PAD - NUM_CLASS), f32)], axis=1)
    bc_pad = jnp.concatenate(
        [params["bc"], jnp.full((CLS_PAD - NUM_CLASS,), NEG_BIG, f32)])
    wp_pad = jnp.concatenate(
        [params["wp"], jnp.zeros((HIDDEN, POOL_PAD - HIDDEN), f32)], axis=1)
    bp_pad = jnp.concatenate(
        [params["bp"], jnp.zeros((POOL_PAD - HIDDEN,), f32)])

    return {
        "word_emb": params["word_emb"],
        "pos_emb": params["pos_emb"],
        "type_emb": params["type_emb"],
        "emb_ln_g": params["emb_ln_g"].reshape(1, HIDDEN),
        "emb_ln_b": params["emb_ln_b"].reshape(1, HIDDEN),
        # fused, lane-padded QKV: (L, H, 128) bf16, bias (L, 1, 128) f32
        "wqkv": jnp.stack(wqkv).astype(bf16),
        "bqkv": jnp.stack(bqkv),
        # attention output projection: one (H, H) matmul per layer
        "wo": stack("wo").astype(bf16),
        "bo": stack("bo")[:, None, :],
        "wi": stack("wi").astype(bf16), "bi": stack("bi")[:, None, :],
        "wf": stack("wf").astype(bf16), "bf": stack("bf")[:, None, :],
        "ln1_g": stack("ln1_g")[:, None, :], "ln1_b": stack("ln1_b")[:, None, :],
        "ln2_g": stack("ln2_g")[:, None, :], "ln2_b": stack("ln2_b")[:, None, :],
        "wp": wp_pad.astype(bf16), "bp": bp_pad.reshape(1, POOL_PAD),
        "wc": wc_pad.astype(bf16), "bc": bc_pad.reshape(1, CLS_PAD),
    }


# ----------------------------------------------------------------------------
# Forward pass: plain-JAX glue (gathers, masks, one-hot) + one fused pallas_call
# ----------------------------------------------------------------------------
def bert_ml_forward(pp, input_ids, attention_mask, labels):
    bt, st = input_ids.shape
    m = bt * st

    # --- embeddings (gather is glue) -------------------------------------------
    word = pp["word_emb"][input_ids]                        # (B,S,H)
    pos = pp["pos_emb"][:st][None, :, :]                    # (1,S,H)
    tok = pp["type_emb"][0][None, None, :]                  # token_type_ids default 0
    emb = (word + pos + tok).reshape(m, HIDDEN).astype(jnp.float32)

    # --- additive attention bias: block-diagonal over batches + key padding ----
    batch_ids = jnp.repeat(jnp.arange(bt), st)              # (M,)
    same_batch = batch_ids[:, None] == batch_ids[None, :]
    key_valid = attention_mask.reshape(-1) > 0.5
    attn_bias = jnp.where(same_batch & key_valid[None, :], 0.0, -10000.0
                          ).astype(jnp.float32)             # (M, M)
    # TODO(synk): at scaled-up B*S this O((B*S)^2) bias / score layout should be
    # tiled flash-style with an in-kernel iota mask and a grid axis (v7x megacore).

    # --- one-hot labels, already lane-padded to CLS_PAD -------------------------
    onehot = jax.nn.one_hot(labels.reshape(-1), CLS_PAD, dtype=jnp.float32)

    # --- [CLS]-row selection matrix for the pooler (0/1 exact in bf16) ----------
    cls_sel = jnp.zeros((bt, m), jnp.float32).at[
        jnp.arange(bt), jnp.arange(bt) * st].set(1.0).astype(jnp.bfloat16)

    inputs = (emb, attn_bias, onehot, cls_sel,
              pp["emb_ln_g"], pp["emb_ln_b"],
              pp["wqkv"], pp["bqkv"], pp["wo"], pp["bo"],
              pp["wi"], pp["bi"], pp["wf"], pp["bf"],
              pp["ln1_g"], pp["ln1_b"], pp["ln2_g"], pp["ln2_b"],
              pp["wp"], pp["bp"], pp["wc"], pp["bc"])

    # --- advisory cost estimate so XLA schedules the fused call sensibly --------
    flops_layer = (2 * m * HIDDEN * QKV_PAD
                   + 2 * NUM_HEADS * m * m * HEAD_DIM * 2
                   + 2 * m * HIDDEN * HIDDEN
                   + 2 * m * HIDDEN * INTERMEDIATE
                   + 2 * m * INTERMEDIATE * HIDDEN)
    flops = (NUM_LAYERS * flops_layer
             + 2 * bt * m * HIDDEN + 2 * bt * HIDDEN * POOL_PAD
             + 2 * m * HIDDEN * CLS_PAD)
    transcendentals = (NUM_LAYERS * (NUM_HEADS * m * m + m * INTERMEDIATE)
                       + bt * POOL_PAD + m * CLS_PAD)
    bytes_accessed = (sum(a.size * a.dtype.itemsize for a in inputs)
                      + 4 + bt * POOL_PAD * 4)

    loss2d, pooled_pad = pl.pallas_call(
        _bert_fused_kernel,
        out_shape=(jax.ShapeDtypeStruct((1, 1), jnp.float32),
                   jax.ShapeDtypeStruct((bt, POOL_PAD), jnp.float32)),
        in_specs=[pl.BlockSpec(memory_space=pltpu.MemorySpace.VMEM)] * len(inputs),
        out_specs=(pl.BlockSpec(memory_space=pltpu.MemorySpace.VMEM),
                   pl.BlockSpec(memory_space=pltpu.MemorySpace.VMEM)),
        cost_estimate=pl.CostEstimate(flops=flops,
                                      transcendentals=transcendentals,
                                      bytes_accessed=bytes_accessed),
    )(*inputs)

    # matches `return (masked_lm_loss,) + (output_1,)` when labels are given
    return loss2d[0, 0], pooled_pad[:, :HIDDEN]


# ----------------------------------------------------------------------------
if __name__ == "__main__":
    key = jax.random.PRNGKey(0)
    pkey, ikey, lkey = jax.random.split(key, 3)

    params = init_params(pkey)
    packed = pack_params(params)     # QKV fusion / padding / bf16 cast done ONCE

    input_ids = jax.random.randint(ikey, (B, S), 0, VOCAB, dtype=jnp.int32)
    attention_mask = jnp.ones((B, S), jnp.float32).at[1, -2:].set(0.0)  # some padding
    labels = jax.random.randint(lkey, (B, S), 0, NUM_CLASS, dtype=jnp.int32)

    fwd = jax.jit(bert_ml_forward)
    loss, pooled = fwd(packed, input_ids, attention_mask, labels)
    jax.block_until_ready((loss, pooled))

    assert loss.shape == () and pooled.shape == (B, HIDDEN)
    assert bool(jnp.isfinite(loss)) and bool(jnp.all(jnp.isfinite(pooled)))
    print("KERNEL_OK")
</pallas_src>

<mosaic_0001>
module attributes {stable_mosaic.version = 11 : i64} {
  func.func @_bert_fused_kernel(%arg0: memref<16x32xf32, #tpu.memory_space<vmem>>, %arg1: memref<16x16xf32, #tpu.memory_space<vmem>>, %arg2: memref<16x128xf32, #tpu.memory_space<vmem>>, %arg3: memref<2x16xbf16, #tpu.memory_space<vmem>>, %arg4: memref<1x32xf32, #tpu.memory_space<vmem>>, %arg5: memref<1x32xf32, #tpu.memory_space<vmem>>, %arg6: memref<2x32x128xbf16, #tpu.memory_space<vmem>>, %arg7: memref<2x1x128xf32, #tpu.memory_space<vmem>>, %arg8: memref<2x32x32xbf16, #tpu.memory_space<vmem>>, %arg9: memref<2x1x32xf32, #tpu.memory_space<vmem>>, %arg10: memref<2x32x64xbf16, #tpu.memory_space<vmem>>, %arg11: memref<2x1x64xf32, #tpu.memory_space<vmem>>, %arg12: memref<2x64x32xbf16, #tpu.memory_space<vmem>>, %arg13: memref<2x1x32xf32, #tpu.memory_space<vmem>>, %arg14: memref<2x1x32xf32, #tpu.memory_space<vmem>>, %arg15: memref<2x1x32xf32, #tpu.memory_space<vmem>>, %arg16: memref<2x1x32xf32, #tpu.memory_space<vmem>>, %arg17: memref<2x1x32xf32, #tpu.memory_space<vmem>>, %arg18: memref<32x128xbf16, #tpu.memory_space<vmem>>, %arg19: memref<1x128xf32, #tpu.memory_space<vmem>>, %arg20: memref<32x128xbf16, #tpu.memory_space<vmem>>, %arg21: memref<1x128xf32, #tpu.memory_space<vmem>>, %arg22: memref<1x1xf32, #tpu.memory_space<vmem>>, %arg23: memref<2x128xf32, #tpu.memory_space<vmem>>) attributes {dimension_semantics = [], scalar_prefetch = 0 : i64, scratch_operands = 0 : i64, tpu.core_type = #tpu.core_type<tc>} {
    %c0 = arith.constant 0 : index
    %c0_0 = arith.constant 0 : index
    %0 = vector.load %arg0[%c0, %c0_0] : memref<16x32xf32, #tpu.memory_space<vmem>>, vector<16x32xf32>
    %c0_1 = arith.constant 0 : index
    %c0_2 = arith.constant 0 : index
    %1 = vector.load %arg4[%c0_1, %c0_2] : memref<1x32xf32, #tpu.memory_space<vmem>>, vector<1x32xf32>
    %c0_3 = arith.constant 0 : index
    %c0_4 = arith.constant 0 : index
    %2 = vector.load %arg5[%c0_3, %c0_4] : memref<1x32xf32, #tpu.memory_space<vmem>>, vector<1x32xf32>
    %cst = arith.constant dense<0.000000e+00> : vector<16xf32>
    %3 = vector.multi_reduction <add>, %0, %cst [1] : vector<16x32xf32> to vector<16xf32>
    %4 = vector.shape_cast %3 : vector<16xf32> to vector<16x1xf32>
    %cst_5 = arith.constant 3.200000e+01 : f32
    %5 = vector.broadcast %cst_5 : f32 to vector<16x1xf32>
    %6 = arith.divf %4, %5 : vector<16x1xf32>
    %7 = vector.broadcast %6 : vector<16x1xf32> to vector<16x32xf32>
    %8 = arith.subf %0, %7 : vector<16x32xf32>
    %9 = arith.mulf %8, %8 : vector<16x32xf32>
    %cst_6 = arith.constant dense<0.000000e+00> : vector<16xf32>
    %10 = vector.multi_reduction <add>, %9, %cst_6 [1] : vector<16x32xf32> to vector<16xf32>
    %11 = vector.shape_cast %10 : vector<16xf32> to vector<16x1xf32>
    %cst_7 = arith.constant 3.200000e+01 : f32
    %12 = vector.broadcast %cst_7 : f32 to vector<16x1xf32>
    %13 = arith.divf %11, %12 : vector<16x1xf32>
    %14 = vector.broadcast %6 : vector<16x1xf32> to vector<16x32xf32>
    %15 = arith.subf %0, %14 : vector<16x32xf32>
    %cst_8 = arith.constant 9.99999996E-13 : f32
    %16 = vector.broadcast %cst_8 : f32 to vector<16x1xf32>
    %17 = arith.addf %13, %16 : vector<16x1xf32>
    %18 = math.rsqrt %17 : vector<16x1xf32>
    %19 = vector.broadcast %18 : vector<16x1xf32> to vector<16x32xf32>
    %20 = arith.mulf %15, %19 : vector<16x32xf32>
    %21 = vector.broadcast %1 : vector<1x32xf32> to vector<16x32xf32>
    %22 = arith.mulf %20, %21 : vector<16x32xf32>
    %23 = vector.broadcast %2 : vector<1x32xf32> to vector<16x32xf32>
    %24 = arith.addf %22, %23 : vector<16x32xf32>
    %c0_9 = arith.constant 0 : index
    %c0_10 = arith.constant 0 : index
    %25 = vector.load %arg1[%c0_9, %c0_10] : memref<16x16xf32, #tpu.memory_space<vmem>>, vector<16x16xf32>
    %26 = vector.shape_cast %25 : vector<16x16xf32> to vector<1x16x16xf32>
    %27 = vector.shape_cast %26 : vector<1x16x16xf32> to vector<1x16x16xf32>
    %28 = vector.broadcast %27 : vector<1x16x16xf32> to vector<4x16x16xf32>
    %29 = arith.truncf %24 : vector<16x32xf32> to vector<16x32xbf16>
    %c0_11 = arith.constant 0 : index
    %c0_12 = arith.constant 0 : index
    %c0_13 = arith.constant 0 : index
    %30 = vector.load %arg6[%c0_11, %c0_12, %c0_13] : memref<2x32x128xbf16, #tpu.memory_space<vmem>>, vector<1x32x128xbf16>
    %31 = vector.shape_cast %30 : vector<1x32x128xbf16> to vector<32x128xbf16>
    %cst_14 = arith.constant dense<0.000000e+00> : vector<16x128xf32>
    %32 = tpu.matmul %29, %31, %cst_14 {dimension_numbers = #tpu.dot_dimension_numbers<[1], [0], [0], [1], [0, 0, 1, 1], [], []>} : vector<16x32xbf16>, vector<32x128xbf16>, vector<16x128xf32> -> vector<16x128xf32>
    %c0_15 = arith.constant 0 : index
    %c0_16 = arith.constant 0 : index
    %c0_17 = arith.constant 0 : index
    %33 = vector.load %arg7[%c0_15, %c0_16, %c0_17] : memref<2x1x128xf32, #tpu.memory_space<vmem>>, vector<1x1x128xf32>
    %34 = vector.shape_cast %33 : vector<1x1x128xf32> to vector<1x128xf32>
    %35 = vector.broadcast %34 : vector<1x128xf32> to vector<16x128xf32>
    %36 = arith.addf %32, %35 : vector<16x128xf32>
    %37 = arith.truncf %36 : vector<16x128xf32> to vector<16x128xbf16>
    %38 = vector.shape_cast %37 : vector<16x128xbf16> to vector<16x16x8xbf16>
    %39 = tpu.transpose %38, [1, 0, 2] : vector<16x16x8xbf16> -> vector<16x16x8xbf16>
    %40 = vector.extract_strided_slice %39 {offsets = [0, 0, 0], sizes = [4, 16, 8], strides = [1, 1, 1]} : vector<16x16x8xbf16> to vector<4x16x8xbf16>
    %41 = vector.extract_strided_slice %39 {offsets = [4, 0, 0], sizes = [4, 16, 8], strides = [1, 1, 1]} : vector<16x16x8xbf16> to vector<4x16x8xbf16>
    %42 = vector.extract_strided_slice %39 {offsets = [8, 0, 0], sizes = [4, 16, 8], strides = [1, 1, 1]} : vector<16x16x8xbf16> to vector<4x16x8xbf16>
    "tpu.trace_start"() <{level = 10 : i32, message = "hqd,hkd->hqk"}> : () -> ()
    %cst_18 = arith.constant dense<0.000000e+00> : vector<4x16x16xf32>
    %43 = tpu.matmul %40, %41, %cst_18 {dimension_numbers = #tpu.dot_dimension_numbers<[2], [2], [1], [1], [0, 0, 0, 1, 1, 1], [0], [0]>} : vector<4x16x8xbf16>, vector<4x16x8xbf16>, vector<4x16x16xf32> -> vector<4x16x16xf32>
    "tpu.trace_stop"() : () -> ()
    %44 = arith.addf %43, %28 : vector<4x16x16xf32>
    %cst_19 = arith.constant dense<0xFF800000> : vector<4x16xf32>
    %45 = vector.multi_reduction <maximumf>, %44, %cst_19 [2] : vector<4x16x16xf32> to vector<4x16xf32>
    %46 = vector.shape_cast %45 : vector<4x16xf32> to vector<4x16x1xf32>
    %47 = vector.broadcast %46 : vector<4x16x1xf32> to vector<4x16x16xf32>
    %48 = arith.subf %44, %47 : vector<4x16x16xf32>
    %49 = math.exp %48 : vector<4x16x16xf32>
    %cst_20 = arith.constant dense<0.000000e+00> : vector<4x16xf32>
    %50 = vector.multi_reduction <add>, %49, %cst_20 [2] : vector<4x16x16xf32> to vector<4x16xf32>
    %51 = vector.shape_cast %50 : vector<4x16xf32> to vector<4x16x1xf32>
    %52 = tpu.reciprocal %51 {approx = true} : vector<4x16x1xf32> -> vector<4x16x1xf32>
    %53 = vector.broadcast %52 : vector<4x16x1xf32> to vector<4x16x16xf32>
    %54 = arith.mulf %49, %53 : vector<4x16x16xf32>
    %55 = arith.truncf %54 : vector<4x16x16xf32> to vector<4x16x16xbf16>
    "tpu.trace_start"() <{level = 10 : i32, message = "hqk,hkd->hqd"}> : () -> ()
    %cst_21 = arith.constant dense<0.000000e+00> : vector<4x16x8xf32>
    %56 = tpu.matmul %55, %42, %cst_21 {dimension_numbers = #tpu.dot_dimension_numbers<[2], [1], [1], [2], [0, 0, 0, 1, 1, 2], [0], [0]>} : vector<4x16x16xbf16>, vector<4x16x8xbf16>, vector<4x16x8xf32> -> vector<4x16x8xf32>
    "tpu.trace_stop"() : () -> ()
    %57 = tpu.transpose %56, [1, 0, 2] : vector<4x16x8xf32> -> vector<16x4x8xf32>
    %58 = vector.shape_cast %57 : vector<16x4x8xf32> to vector<16x32xf32>
    %59 = arith.truncf %58 : vector<16x32xf32> to vector<16x32xbf16>
    %c0_22 = arith.constant 0 : index
    %c0_23 = arith.constant 0 : index
    %c0_24 = arith.constant 0 : index
    %60 = vector.load %arg8[%c0_22, %c0_23, %c0_24] : memref<2x32x32xbf16, #tpu.memory_space<vmem>>, vector<1x32x32xbf16>
    %61 = vector.shape_cast %60 : vector<1x32x32xbf16> to vector<32x32xbf16>
    %cst_25 = arith.constant dense<0.000000e+00> : vector<16x32xf32>
    %62 = tpu.matmul %59, %61, %cst_25 {dimension_numbers = #tpu.dot_dimension_numbers<[1], [0], [0], [1], [0, 0, 1, 1], [], []>} : vector<16x32xbf16>, vector<32x32xbf16>, vector<16x32xf32> -> vector<16x32xf32>
    %c0_26 = arith.constant 0 : index
    %c0_27 = arith.constant 0 : index
    %c0_28 = arith.constant 0 : index
    %63 = vector.load %arg9[%c0_26, %c0_27, %c0_28] : memref<2x1x32xf32, #tpu.memory_space<vmem>>, vector<1x1x32xf32>
    %64 = vector.shape_cast %63 : vector<1x1x32xf32> to vector<1x32xf32>
    %65 = vector.broadcast %64 : vector<1x32xf32> to vector<16x32xf32>
    %66 = arith.addf %62, %65 : vector<16x32xf32>
    %67 = arith.addf %66, %24 : vector<16x32xf32>
    %c0_29 = arith.constant 0 : index
    %c0_30 = arith.constant 0 : index
    %c0_31 = arith.constant 0 : index
    %68 = vector.load %arg14[%c0_29, %c0_30, %c0_31] : memref<2x1x32xf32, #tpu.memory_space<vmem>>, vector<1x1x32xf32>
    %69 = vector.shape_cast %68 : vector<1x1x32xf32> to vector<1x32xf32>
    %c0_32 = arith.constant 0 : index
    %c0_33 = arith.constant 0 : index
    %c0_34 = arith.constant 0 : index
    %70 = vector.load %arg15[%c0_32, %c0_33, %c0_34] : memref<2x1x32xf32, #tpu.memory_space<vmem>>, vector<1x1x32xf32>
    %71 = vector.shape_cast %70 : vector<1x1x32xf32> to vector<1x32xf32>
    %cst_35 = arith.constant dense<0.000000e+00> : vector<16xf32>
    %72 = vector.multi_reduction <add>, %67, %cst_35 [1] : vector<16x32xf32> to vector<16xf32>
    %73 = vector.shape_cast %72 : vector<16xf32> to vector<16x1xf32>
    %cst_36 = arith.constant 3.200000e+01 : f32
    %74 = vector.broadcast %cst_36 : f32 to vector<16x1xf32>
    %75 = arith.divf %73, %74 : vector<16x1xf32>
    %76 = vector.broadcast %75 : vector<16x1xf32> to vector<16x32xf32>
    %77 = arith.subf %67, %76 : vector<16x32xf32>
    %78 = arith.mulf %77, %77 : vector<16x32xf32>
    %cst_37 = arith.constant dense<0.000000e+00> : vector<16xf32>
    %79 = vector.multi_reduction <add>, %78, %cst_37 [1] : vector<16x32xf32> to vector<16xf32>
    %80 = vector.shape_cast %79 : vector<16xf32> to vector<16x1xf32>
    %cst_38 = arith.constant 3.200000e+01 : f32
    %81 = vector.broadcast %cst_38 : f32 to vector<16x1xf32>
    %82 = arith.divf %80, %81 : vector<16x1xf32>
    %83 = vector.broadcast %75 : vector<16x1xf32> to vector<16x32xf32>
    %84 = arith.subf %67, %83 : vector<16x32xf32>
    %cst_39 = arith.constant 9.99999996E-13 : f32
    %85 = vector.broadcast %cst_39 : f32 to vector<16x1xf32>
    %86 = arith.addf %82, %85 : vector<16x1xf32>
    %87 = math.rsqrt %86 : vector<16x1xf32>
    %88 = vector.broadcast %87 : vector<16x1xf32> to vector<16x32xf32>
    %89 = arith.mulf %84, %88 : vector<16x32xf32>
    %90 = vector.broadcast %69 : vector<1x32xf32> to vector<16x32xf32>
    %91 = arith.mulf %89, %90 : vector<16x32xf32>
    %92 = vector.broadcast %71 : vector<1x32xf32> to vector<16x32xf32>
    %93 = arith.addf %91, %92 : vector<16x32xf32>
    %94 = arith.truncf %93 : vector<16x32xf32> to vector<16x32xbf16>
    %c0_40 = arith.constant 0 : index
    %c0_41 = arith.constant 0 : index
    %c0_42 = arith.constant 0 : index
    %95 = vector.load %arg10[%c0_40, %c0_41, %c0_42] : memref<2x32x64xbf16, #tpu.memory_space<vmem>>, vector<1x32x64xbf16>
    %96 = vector.shape_cast %95 : vector<1x32x64xbf16> to vector<32x64xbf16>
    %cst_43 = arith.constant dense<0.000000e+00> : vector<16x64xf32>
    %97 = tpu.matmul %94, %96, %cst_43 {dimension_numbers = #tpu.dot_dimension_numbers<[1], [0], [0], [1], [0, 0, 1, 1], [], []>} : vector<16x32xbf16>, vector<32x64xbf16>, vector<16x64xf32> -> vector<16x64xf32>
    %c0_44 = arith.constant 0 : index
    %c0_45 = arith.constant 0 : index
    %c0_46 = arith.constant 0 : index
    %98 = vector.load %arg11[%c0_44, %c0_45, %c0_46] : memref<2x1x64xf32, #tpu.memory_space<vmem>>, vector<1x1x64xf32>
    %99 = vector.shape_cast %98 : vector<1x1x64xf32> to vector<1x64xf32>
    %100 = vector.broadcast %99 : vector<1x64xf32> to vector<16x64xf32>
    %101 = arith.addf %97, %100 : vector<16x64xf32>
    %102 = arith.mulf %101, %101 : vector<16x64xf32>
    %103 = arith.mulf %101, %102 : vector<16x64xf32>
    %cst_47 = arith.constant 4.471500e-02 : f32
    %104 = vector.broadcast %cst_47 : f32 to vector<16x64xf32>
    %105 = arith.mulf %104, %103 : vector<16x64xf32>
    %106 = arith.addf %101, %105 : vector<16x64xf32>
    %cst_48 = arith.constant 0.797884583 : f32
    %107 = vector.broadcast %cst_48 : f32 to vector<16x64xf32>
    %108 = arith.mulf %107, %106 : vector<16x64xf32>
    %109 = math.tanh %108 : vector<16x64xf32>
    %cst_49 = arith.constant 1.000000e+00 : f32
    %110 = vector.broadcast %cst_49 : f32 to vector<16x64xf32>
    %111 = arith.addf %110, %109 : vector<16x64xf32>
    %cst_50 = arith.constant 5.000000e-01 : f32
    %112 = vector.broadcast %cst_50 : f32 to vector<16x64xf32>
    %113 = arith.mulf %112, %111 : vector<16x64xf32>
    %114 = arith.mulf %101, %113 : vector<16x64xf32>
    %115 = arith.truncf %114 : vector<16x64xf32> to vector<16x64xbf16>
    %c0_51 = arith.constant 0 : index
    %c0_52 = arith.constant 0 : index
    %c0_53 = arith.constant 0 : index
    %116 = vector.load %arg12[%c0_51, %c0_52, %c0_53] : memref<2x64x32xbf16, #tpu.memory_space<vmem>>, vector<1x64x32xbf16>
    %117 = vector.shape_cast %116 : vector<1x64x32xbf16> to vector<64x32xbf16>
    %cst_54 = arith.constant dense<0.000000e+00> : vector<16x32xf32>
    %118 = tpu.matmul %115, %117, %cst_54 {dimension_numbers = #tpu.dot_dimension_numbers<[1], [0], [0], [1], [0, 0, 1, 1], [], []>} : vector<16x64xbf16>, vector<64x32xbf16>, vector<16x32xf32> -> vector<16x32xf32>
    %c0_55 = arith.constant 0 : index
    %c0_56 = arith.constant 0 : index
    %c0_57 = arith.constant 0 : index
    %119 = vector.load %arg13[%c0_55, %c0_56, %c0_57] : memref<2x1x32xf32, #tpu.memory_space<vmem>>, vector<1x1x32xf32>
    %120 = vector.shape_cast %119 : vector<1x1x32xf32> to vector<1x32xf32>
    %121 = vector.broadcast %120 : vector<1x32xf32> to vector<16x32xf32>
    %122 = arith.addf %118, %121 : vector<16x32xf32>
    %123 = arith.addf %122, %93 : vector<16x32xf32>
    %c0_58 = arith.constant 0 : index
    %c0_59 = arith.constant 0 : index
    %c0_60 = arith.constant 0 : index
    %124 = vector.load %arg16[%c0_58, %c0_59, %c0_60] : memref<2x1x32xf32, #tpu.memory_space<vmem>>, vector<1x1x32xf32>
    %125 = vector.shape_cast %124 : vector<1x1x32xf32> to vector<1x32xf32>
    %c0_61 = arith.constant 0 : index
    %c0_62 = arith.constant 0 : index
    %c0_63 = arith.constant 0 : index
    %126 = vector.load %arg17[%c0_61, %c0_62, %c0_63] : memref<2x1x32xf32, #tpu.memory_space<vmem>>, vector<1x1x32xf32>
    %127 = vector.shape_cast %126 : vector<1x1x32xf32> to vector<1x32xf32>
    %cst_64 = arith.constant dense<0.000000e+00> : vector<16xf32>
    %128 = vector.multi_reduction <add>, %123, %cst_64 [1] : vector<16x32xf32> to vector<16xf32>
    %129 = vector.shape_cast %128 : vector<16xf32> to vector<16x1xf32>
    %cst_65 = arith.constant 3.200000e+01 : f32
    %130 = vector.broadcast %cst_65 : f32 to vector<16x1xf32>
    %131 = arith.divf %129, %130 : vector<16x1xf32>
    %132 = vector.broadcast %131 : vector<16x1xf32> to vector<16x32xf32>
    %133 = arith.subf %123, %132 : vector<16x32xf32>
    %134 = arith.mulf %133, %133 : vector<16x32xf32>
    %cst_66 = arith.constant dense<0.000000e+00> : vector<16xf32>
    %135 = vector.multi_reduction <add>, %134, %cst_66 [1] : vector<16x32xf32> to vector<16xf32>
    %136 = vector.shape_cast %135 : vector<16xf32> to vector<16x1xf32>
    %cst_67 = arith.constant 3.200000e+01 : f32
    %137 = vector.broadcast %cst_67 : f32 to vector<16x1xf32>
    %138 = arith.divf %136, %137 : vector<16x1xf32>
    %139 = vector.broadcast %131 : vector<16x1xf32> to vector<16x32xf32>
    %140 = arith.subf %123, %139 : vector<16x32xf32>
    %cst_68 = arith.constant 9.99999996E-13 : f32
    %141 = vector.broadcast %cst_68 : f32 to vector<16x1xf32>
    %142 = arith.addf %138, %141 : vector<16x1xf32>
    %143 = math.rsqrt %142 : vector<16x1xf32>
    %144 = vector.broadcast %143 : vector<16x1xf32> to vector<16x32xf32>
    %145 = arith.mulf %140, %144 : vector<16x32xf32>
    %146 = vector.broadcast %125 : vector<1x32xf32> to vector<16x32xf32>
    %147 = arith.mulf %145, %146 : vector<16x32xf32>
    %148 = vector.broadcast %127 : vector<1x32xf32> to vector<16x32xf32>
    %149 = arith.addf %147, %148 : vector<16x32xf32>
    %150 = arith.truncf %149 : vector<16x32xf32> to vector<16x32xbf16>
    %c1 = arith.constant 1 : index
    %c0_69 = arith.constant 0 : index
    %c0_70 = arith.constant 0 : index
    %151 = vector.load %arg6[%c1, %c0_69, %c0_70] : memref<2x32x128xbf16, #tpu.memory_space<vmem>>, vector<1x32x128xbf16>
    %152 = vector.shape_cast %151 : vector<1x32x128xbf16> to vector<32x128xbf16>
    %cst_71 = arith.constant dense<0.000000e+00> : vector<16x128xf32>
    %153 = tpu.matmul %150, %152, %cst_71 {dimension_numbers = #tpu.dot_dimension_numbers<[1], [0], [0], [1], [0, 0, 1, 1], [], []>} : vector<16x32xbf16>, vector<32x128xbf16>, vector<16x128xf32> -> vector<16x128xf32>
    %c1_72 = arith.constant 1 : index
    %c0_73 = arith.constant 0 : index
    %c0_74 = arith.constant 0 : index
    %154 = vector.load %arg7[%c1_72, %c0_73, %c0_74] : memref<2x1x128xf32, #tpu.memory_space<vmem>>, vector<1x1x128xf32>
    %155 = vector.shape_cast %154 : vector<1x1x128xf32> to vector<1x128xf32>
    %156 = vector.broadcast %155 : vector<1x128xf32> to vector<16x128xf32>
    %157 = arith.addf %153, %156 : vector<16x128xf32>
    %158 = arith.truncf %157 : vector<16x128xf32> to vector<16x128xbf16>
    %159 = vector.shape_cast %158 : vector<16x128xbf16> to vector<16x16x8xbf16>
    %160 = tpu.transpose %159, [1, 0, 2] : vector<16x16x8xbf16> -> vector<16x16x8xbf16>
    %161 = vector.extract_strided_slice %160 {offsets = [0, 0, 0], sizes = [4, 16, 8], strides = [1, 1, 1]} : vector<16x16x8xbf16> to vector<4x16x8xbf16>
    %162 = vector.extract_strided_slice %160 {offsets = [4, 0, 0], sizes = [4, 16, 8], strides = [1, 1, 1]} : vector<16x16x8xbf16> to vector<4x16x8xbf16>
    %163 = vector.extract_strided_slice %160 {offsets = [8, 0, 0], sizes = [4, 16, 8], strides = [1, 1, 1]} : vector<16x16x8xbf16> to vector<4x16x8xbf16>
    "tpu.trace_start"() <{level = 10 : i32, message = "hqd,hkd->hqk"}> : () -> ()
    %cst_75 = arith.constant dense<0.000000e+00> : vector<4x16x16xf32>
    %164 = tpu.matmul %161, %162, %cst_75 {dimension_numbers = #tpu.dot_dimension_numbers<[2], [2], [1], [1], [0, 0, 0, 1, 1, 1], [0], [0]>} : vector<4x16x8xbf16>, vector<4x16x8xbf16>, vector<4x16x16xf32> -> vector<4x16x16xf32>
    "tpu.trace_stop"() : () -> ()
    %165 = arith.addf %164, %28 : vector<4x16x16xf32>
    %cst_76 = arith.constant dense<0xFF800000> : vector<4x16xf32>
    %166 = vector.multi_reduction <maximumf>, %165, %cst_76 [2] : vector<4x16x16xf32> to vector<4x16xf32>
    %167 = vector.shape_cast %166 : vector<4x16xf32> to vector<4x16x1xf32>
    %168 = vector.broadcast %167 : vector<4x16x1xf32> to vector<4x16x16xf32>
    %169 = arith.subf %165, %168 : vector<4x16x16xf32>
    %170 = math.exp %169 : vector<4x16x16xf32>
    %cst_77 = arith.constant dense<0.000000e+00> : vector<4x16xf32>
    %171 = vector.multi_reduction <add>, %170, %cst_77 [2] : vector<4x16x16xf32> to vector<4x16xf32>
    %172 = vector.shape_cast %171 : vector<4x16xf32> to vector<4x16x1xf32>
    %173 = tpu.reciprocal %172 {approx = true} : vector<4x16x1xf32> -> vector<4x16x1xf32>
    %174 = vector.broadcast %173 : vector<4x16x1xf32> to vector<4x16x16xf32>
    %175 = arith.mulf %170, %174 : vector<4x16x16xf32>
    %176 = arith.truncf %175 : vector<4x16x16xf32> to vector<4x16x16xbf16>
    "tpu.trace_start"() <{level = 10 : i32, message = "hqk,hkd->hqd"}> : () -> ()
    %cst_78 = arith.constant dense<0.000000e+00> : vector<4x16x8xf32>
    %177 = tpu.matmul %176, %163, %cst_78 {dimension_numbers = #tpu.dot_dimension_numbers<[2], [1], [1], [2], [0, 0, 0, 1, 1, 2], [0], [0]>} : vector<4x16x16xbf16>, vector<4x16x8xbf16>, vector<4x16x8xf32> -> vector<4x16x8xf32>
    "tpu.trace_stop"() : () -> ()
    %178 = tpu.transpose %177, [1, 0, 2] : vector<4x16x8xf32> -> vector<16x4x8xf32>
    %179 = vector.shape_cast %178 : vector<16x4x8xf32> to vector<16x32xf32>
    %180 = arith.truncf %179 : vector<16x32xf32> to vector<16x32xbf16>
    %c1_79 = arith.constant 1 : index
    %c0_80 = arith.constant 0 : index
    %c0_81 = arith.constant 0 : index
    %181 = vector.load %arg8[%c1_79, %c0_80, %c0_81] : memref<2x32x32xbf16, #tpu.memory_space<vmem>>, vector<1x32x32xbf16>
    %182 = vector.shape_cast %181 : vector<1x32x32xbf16> to vector<32x32xbf16>
    %cst_82 = arith.constant dense<0.000000e+00> : vector<16x32xf32>
    %183 = tpu.matmul %180, %182, %cst_82 {dimension_numbers = #tpu.dot_dimension_numbers<[1], [0], [0], [1], [0, 0, 1, 1], [], []>} : vector<16x32xbf16>, vector<32x32xbf16>, vector<16x32xf32> -> vector<16x32xf32>
    %c1_83 = arith.constant 1 : index
    %c0_84 = arith.constant 0 : index
    %c0_85 = arith.constant 0 : index
    %184 = vector.load %arg9[%c1_83, %c0_84, %c0_85] : memref<2x1x32xf32, #tpu.memory_space<vmem>>, vector<1x1x32xf32>
    %185 = vector.shape_cast %184 : vector<1x1x32xf32> to vector<1x32xf32>
    %186 = vector.broadcast %185 : vector<1x32xf32> to vector<16x32xf32>
    %187 = arith.addf %183, %186 : vector<16x32xf32>
    %188 = arith.addf %187, %149 : vector<16x32xf32>
    %c1_86 = arith.constant 1 : index
    %c0_87 = arith.constant 0 : index
    %c0_88 = arith.constant 0 : index
    %189 = vector.load %arg14[%c1_86, %c0_87, %c0_88] : memref<2x1x32xf32, #tpu.memory_space<vmem>>, vector<1x1x32xf32>
    %190 = vector.shape_cast %189 : vector<1x1x32xf32> to vector<1x32xf32>
    %c1_89 = arith.constant 1 : index
    %c0_90 = arith.constant 0 : index
    %c0_91 = arith.constant 0 : index
    %191 = vector.load %arg15[%c1_89, %c0_90, %c0_91] : memref<2x1x32xf32, #tpu.memory_space<vmem>>, vector<1x1x32xf32>
    %192 = vector.shape_cast %191 : vector<1x1x32xf32> to vector<1x32xf32>
    %cst_92 = arith.constant dense<0.000000e+00> : vector<16xf32>
    %193 = vector.multi_reduction <add>, %188, %cst_92 [1] : vector<16x32xf32> to vector<16xf32>
    %194 = vector.shape_cast %193 : vector<16xf32> to vector<16x1xf32>
    %cst_93 = arith.constant 3.200000e+01 : f32
    %195 = vector.broadcast %cst_93 : f32 to vector<16x1xf32>
    %196 = arith.divf %194, %195 : vector<16x1xf32>
    %197 = vector.broadcast %196 : vector<16x1xf32> to vector<16x32xf32>
    %198 = arith.subf %188, %197 : vector<16x32xf32>
    %199 = arith.mulf %198, %198 : vector<16x32xf32>
    %cst_94 = arith.constant dense<0.000000e+00> : vector<16xf32>
    %200 = vector.multi_reduction <add>, %199, %cst_94 [1] : vector<16x32xf32> to vector<16xf32>
    %201 = vector.shape_cast %200 : vector<16xf32> to vector<16x1xf32>
    %cst_95 = arith.constant 3.200000e+01 : f32
    %202 = vector.broadcast %cst_95 : f32 to vector<16x1xf32>
    %203 = arith.divf %201, %202 : vector<16x1xf32>
    %204 = vector.broadcast %196 : vector<16x1xf32> to vector<16x32xf32>
    %205 = arith.subf %188, %204 : vector<16x32xf32>
    %cst_96 = arith.constant 9.99999996E-13 : f32
    %206 = vector.broadcast %cst_96 : f32 to vector<16x1xf32>
    %207 = arith.addf %203, %206 : vector<16x1xf32>
    %208 = math.rsqrt %207 : vector<16x1xf32>
    %209 = vector.broadcast %208 : vector<16x1xf32> to vector<16x32xf32>
    %210 = arith.mulf %205, %209 : vector<16x32xf32>
    %211 = vector.broadcast %190 : vector<1x32xf32> to vector<16x32xf32>
    %212 = arith.mulf %210, %211 : vector<16x32xf32>
    %213 = vector.broadcast %192 : vector<1x32xf32> to vector<16x32xf32>
    %214 = arith.addf %212, %213 : vector<16x32xf32>
    %215 = arith.truncf %214 : vector<16x32xf32> to vector<16x32xbf16>
    %c1_97 = arith.constant 1 : index
    %c0_98 = arith.constant 0 : index
    %c0_99 = arith.constant 0 : index
    %216 = vector.load %arg10[%c1_97, %c0_98, %c0_99] : memref<2x32x64xbf16, #tpu.memory_space<vmem>>, vector<1x32x64xbf16>
    %217 = vector.shape_cast %216 : vector<1x32x64xbf16> to vector<32x64xbf16>
    %cst_100 = arith.constant dense<0.000000e+00> : vector<16x64xf32>
    %218 = tpu.matmul %215, %217, %cst_100 {dimension_numbers = #tpu.dot_dimension_numbers<[1], [0], [0], [1], [0, 0, 1, 1], [], []>} : vector<16x32xbf16>, vector<32x64xbf16>, vector<16x64xf32> -> vector<16x64xf32>
    %c1_101 = arith.constant 1 : index
    %c0_102 = arith.constant 0 : index
    %c0_103 = arith.constant 0 : index
    %219 = vector.load %arg11[%c1_101, %c0_102, %c0_103] : memref<2x1x64xf32, #tpu.memory_space<vmem>>, vector<1x1x64xf32>
    %220 = vector.shape_cast %219 : vector<1x1x64xf32> to vector<1x64xf32>
    %221 = vector.broadcast %220 : vector<1x64xf32> to vector<16x64xf32>
    %222 = arith.addf %218, %221 : vector<16x64xf32>
    %223 = arith.mulf %222, %222 : vector<16x64xf32>
    %224 = arith.mulf %222, %223 : vector<16x64xf32>
    %cst_104 = arith.constant 4.471500e-02 : f32
    %225 = vector.broadcast %cst_104 : f32 to vector<16x64xf32>
    %226 = arith.mulf %225, %224 : vector<16x64xf32>
    %227 = arith.addf %222, %226 : vector<16x64xf32>
    %cst_105 = arith.constant 0.797884583 : f32
    %228 = vector.broadcast %cst_105 : f32 to vector<16x64xf32>
    %229 = arith.mulf %228, %227 : vector<16x64xf32>
    %230 = math.tanh %229 : vector<16x64xf32>
    %cst_106 = arith.constant 1.000000e+00 : f32
    %231 = vector.broadcast %cst_106 : f32 to vector<16x64xf32>
    %232 = arith.addf %231, %230 : vector<16x64xf32>
    %cst_107 = arith.constant 5.000000e-01 : f32
    %233 = vector.broadcast %cst_107 : f32 to vector<16x64xf32>
    %234 = arith.mulf %233, %232 : vector<16x64xf32>
    %235 = arith.mulf %222, %234 : vector<16x64xf32>
    %236 = arith.truncf %235 : vector<16x64xf32> to vector<16x64xbf16>
    %c1_108 = arith.constant 1 : index
    %c0_109 = arith.constant 0 : index
    %c0_110 = arith.constant 0 : index
    %237 = vector.load %arg12[%c1_108, %c0_109, %c0_110] : memref<2x64x32xbf16, #tpu.memory_space<vmem>>, vector<1x64x32xbf16>
    %238 = vector.shape_cast %237 : vector<1x64x32xbf16> to vector<64x32xbf16>
    %cst_111 = arith.constant dense<0.000000e+00> : vector<16x32xf32>
    %239 = tpu.matmul %236, %238, %cst_111 {dimension_numbers = #tpu.dot_dimension_numbers<[1], [0], [0], [1], [0, 0, 1, 1], [], []>} : vector<16x64xbf16>, vector<64x32xbf16>, vector<16x32xf32> -> vector<16x32xf32>
    %c1_112 = arith.constant 1 : index
    %c0_113 = arith.constant 0 : index
    %c0_114 = arith.constant 0 : index
    %240 = vector.load %arg13[%c1_112, %c0_113, %c0_114] : memref<2x1x32xf32, #tpu.memory_space<vmem>>, vector<1x1x32xf32>
    %241 = vector.shape_cast %240 : vector<1x1x32xf32> to vector<1x32xf32>
    %242 = vector.broadcast %241 : vector<1x32xf32> to vector<16x32xf32>
    %243 = arith.addf %239, %242 : vector<16x32xf32>
    %244 = arith.addf %243, %214 : vector<16x32xf32>
    %c1_115 = arith.constant 1 : index
    %c0_116 = arith.constant 0 : index
    %c0_117 = arith.constant 0 : index
    %245 = vector.load %arg16[%c1_115, %c0_116, %c0_117] : memref<2x1x32xf32, #tpu.memory_space<vmem>>, vector<1x1x32xf32>
    %246 = vector.shape_cast %245 : vector<1x1x32xf32> to vector<1x32xf32>
    %c1_118 = arith.constant 1 : index
    %c0_119 = arith.constant 0 : index
    %c0_120 = arith.constant 0 : index
    %247 = vector.load %arg17[%c1_118, %c0_119, %c0_120] : memref<2x1x32xf32, #tpu.memory_space<vmem>>, vector<1x1x32xf32>
    %248 = vector.shape_cast %247 : vector<1x1x32xf32> to vector<1x32xf32>
    %cst_121 = arith.constant dense<0.000000e+00> : vector<16xf32>
    %249 = vector.multi_reduction <add>, %244, %cst_121 [1] : vector<16x32xf32> to vector<16xf32>
    %250 = vector.shape_cast %249 : vector<16xf32> to vector<16x1xf32>
    %cst_122 = arith.constant 3.200000e+01 : f32
    %251 = vector.broadcast %cst_122 : f32 to vector<16x1xf32>
    %252 = arith.divf %250, %251 : vector<16x1xf32>
    %253 = vector.broadcast %252 : vector<16x1xf32> to vector<16x32xf32>
    %254 = arith.subf %244, %253 : vector<16x32xf32>
    %255 = arith.mulf %254, %254 : vector<16x32xf32>
    %cst_123 = arith.constant dense<0.000000e+00> : vector<16xf32>
    %256 = vector.multi_reduction <add>, %255, %cst_123 [1] : vector<16x32xf32> to vector<16xf32>
    %257 = vector.shape_cast %256 : vector<16xf32> to vector<16x1xf32>
    %cst_124 = arith.constant 3.200000e+01 : f32
    %258 = vector.broadcast %cst_124 : f32 to vector<16x1xf32>
    %259 = arith.divf %257, %258 : vector<16x1xf32>
    %260 = vector.broadcast %252 : vector<16x1xf32> to vector<16x32xf32>
    %261 = arith.subf %244, %260 : vector<16x32xf32>
    %cst_125 = arith.constant 9.99999996E-13 : f32
    %262 = vector.broadcast %cst_125 : f32 to vector<16x1xf32>
    %263 = arith.addf %259, %262 : vector<16x1xf32>
    %264 = math.rsqrt %263 : vector<16x1xf32>
    %265 = vector.broadcast %264 : vector<16x1xf32> to vector<16x32xf32>
    %266 = arith.mulf %261, %265 : vector<16x32xf32>
    %267 = vector.broadcast %246 : vector<1x32xf32> to vector<16x32xf32>
    %268 = arith.mulf %266, %267 : vector<16x32xf32>
    %269 = vector.broadcast %248 : vector<1x32xf32> to vector<16x32xf32>
    %270 = arith.addf %268, %269 : vector<16x32xf32>
    %271 = arith.truncf %270 : vector<16x32xf32> to vector<16x32xbf16>
    %c0_126 = arith.constant 0 : index
    %c0_127 = arith.constant 0 : index
    %272 = vector.load %arg3[%c0_126, %c0_127] : memref<2x16xbf16, #tpu.memory_space<vmem>>, vector<2x16xbf16>
    %cst_128 = arith.constant dense<0.000000e+00> : vector<2x32xf32>
    %273 = tpu.matmul %272, %271, %cst_128 {dimension_numbers = #tpu.dot_dimension_numbers<[1], [0], [0], [1], [0, 0, 1, 1], [], []>} : vector<2x16xbf16>, vector<16x32xbf16>, vector<2x32xf32> -> vector<2x32xf32>
    %274 = arith.truncf %273 : vector<2x32xf32> to vector<2x32xbf16>
    %c0_129 = arith.constant 0 : index
    %c0_130 = arith.constant 0 : index
    %275 = vector.load %arg18[%c0_129, %c0_130] : memref<32x128xbf16, #tpu.memory_space<vmem>>, vector<32x128xbf16>
    %cst_131 = arith.constant dense<0.000000e+00> : vector<2x128xf32>
    %276 = tpu.matmul %274, %275, %cst_131 {dimension_numbers = #tpu.dot_dimension_numbers<[1], [0], [0], [1], [0, 0, 1, 1], [], []>} : vector<2x32xbf16>, vector<32x128xbf16>, vector<2x128xf32> -> vector<2x128xf32>
    %c0_132 = arith.constant 0 : index
    %c0_133 = arith.constant 0 : index
    %277 = vector.load %arg19[%c0_132, %c0_133] : memref<1x128xf32, #tpu.memory_space<vmem>>, vector<1x128xf32>
    %278 = vector.broadcast %277 : vector<1x128xf32> to vector<2x128xf32>
    %279 = arith.addf %276, %278 : vector<2x128xf32>
    %280 = math.tanh %279 : vector<2x128xf32>
    %c0_134 = arith.constant 0 : index
    %c0_135 = arith.constant 0 : index
    %281 = vector.load %arg23[%c0_134, %c0_135] : memref<2x128xf32, #tpu.memory_space<vmem>>, vector<2x128xf32>
    tpu.vector_store %arg23[%c0_134, %c0_135], %280 {strides = array<i32>} : memref<2x128xf32, #tpu.memory_space<vmem>>, vector<2x128xf32>,
    %c0_136 = arith.constant 0 : index
    %c0_137 = arith.constant 0 : index
    %282 = vector.load %arg20[%c0_136, %c0_137] : memref<32x128xbf16, #tpu.memory_space<vmem>>, vector<32x128xbf16>
    %cst_138 = arith.constant dense<0.000000e+00> : vector<16x128xf32>
    %283 = tpu.matmul %271, %282, %cst_138 {dimension_numbers = #tpu.dot_dimension_numbers<[1], [0], [0], [1], [0, 0, 1, 1], [], []>} : vector<16x32xbf16>, vector<32x128xbf16>, vector<16x128xf32> -> vector<16x128xf32>
    %c0_139 = arith.constant 0 : index
    %c0_140 = arith.constant 0 : index
    %284 = vector.load %arg21[%c0_139, %c0_140] : memref<1x128xf32, #tpu.memory_space<vmem>>, vector<1x128xf32>
    %285 = vector.broadcast %284 : vector<1x128xf32> to vector<16x128xf32>
    %286 = arith.addf %283, %285 : vector<16x128xf32>
    %cst_141 = arith.constant dense<0xFF800000> : vector<16xf32>
    %287 = vector.multi_reduction <maximumf>, %286, %cst_141 [1] : vector<16x128xf32> to vector<16xf32>
    %288 = vector.shape_cast %287 : vector<16xf32> to vector<16x1xf32>
    %289 = vector.broadcast %288 : vector<16x1xf32> to vector<16x128xf32>
    %290 = arith.subf %286, %289 : vector<16x128xf32>
    %291 = math.exp %290 : vector<16x128xf32>
    %cst_142 = arith.constant dense<0.000000e+00> : vector<16xf32>
    %292 = vector.multi_reduction <add>, %291, %cst_142 [1] : vector<16x128xf32> to vector<16xf32>
    %293 = vector.shape_cast %292 : vector<16xf32> to vector<16x1xf32>
    %294 = math.log %293 : vector<16x1xf32>
    %295 = arith.addf %294, %288 : vector<16x1xf32>
    %c0_143 = arith.constant 0 : index
    %c0_144 = arith.constant 0 : index
    %296 = vector.load %arg2[%c0_143, %c0_144] : memref<16x128xf32, #tpu.memory_space<vmem>>, vector<16x128xf32>
    %297 = arith.mulf %286, %296 : vector<16x128xf32>
    %cst_145 = arith.constant dense<0.000000e+00> : vector<16xf32>
    %298 = vector.multi_reduction <add>, %297, %cst_145 [1] : vector<16x128xf32> to vector<16xf32>
    %299 = vector.shape_cast %298 : vector<16xf32> to vector<16x1xf32>
    %300 = arith.subf %295, %299 : vector<16x1xf32>
    %301 = vector.shape_cast %300 : vector<16x1xf32> to vector<1x16x1xf32>
    %cst_146 = arith.constant dense<0.000000e+00> : vector<1xf32>
    %302 = vector.multi_reduction <add>, %301, %cst_146 [1, 2] : vector<1x16x1xf32> to vector<1xf32>
    %303 = vector.shape_cast %302 : vector<1xf32> to vector<1x1x1xf32>
    %304 = vector.extract %303[0, 0, 0] : f32 from vector<1x1x1xf32>
    %305 = vector.broadcast %304 : f32 to vector<1x1xf32>
    %cst_147 = arith.constant 1.600000e+01 : f32
    %306 = vector.broadcast %cst_147 : f32 to vector<1x1xf32>
    %307 = arith.divf %305, %306 : vector<1x1xf32>
    %c0_148 = arith.constant 0 : index
    %c0_149 = arith.constant 0 : index
    %308 = vector.load %arg22[%c0_148, %c0_149] : memref<1x1xf32, #tpu.memory_space<vmem>>, vector<1x1xf32>
    tpu.vector_store %arg22[%c0_148, %c0_149], %307 {strides = array<i32>} : memref<1x1xf32, #tpu.memory_space<vmem>>, vector<1x1xf32>,
    return
  }
}

</mosaic_0001>

<bundles_post_ra>
// kernel: bert_ml_forward.1
= control target key start
LH: loop header
LB: loop body
LE: loop exit
PB: predicated region body
PF: predicated region fallthrough
CT: control target
= control target key end

     0   :  { %s5492_s0 = inlined_call_operand.vmem [shape: f32[16,32], index: 0, kind: input, shape index: {}]   ;;  %s5493_s1 = inlined_call_operand.vmem [shape: f32[16,16], index: 1, kind: input, shape index: {}]   ;;  %s5494_s2 = inlined_call_operand.vmem [shape: f32[16,128], index: 2, kind: input, shape index: {}]   ;;  %s5495_s3 = inlined_call_operand.vmem [shape: bf16[2,16], index: 3, kind: input, shape index: {}]   ;;  %s5496_s4 = inlined_call_operand.vmem [shape: f32[1,32], index: 4, kind: input, shape index: {}]   ;;  %s5497_s5 = inlined_call_operand.vmem [shape: f32[1,32], index: 5, kind: input, shape index: {}]   ;;  %s5498_s6 = inlined_call_operand.vmem [shape: bf16[2,32,128], index: 6, kind: input, shape index: {}]   ;;  %s5499_s7 = inlined_call_operand.vmem [shape: f32[2,1,128], index: 7, kind: input, shape index: {}]   ;;  %s5500_s8 = inlined_call_operand.vmem [shape: bf16[2,32,32], index: 8, kind: input, shape index: {}]   ;;  %s5501_s9 = inlined_call_operand.vmem [shape: f32[2,1,32], index: 9, kind: input, shape index: {}]   ;;  %s5502_s10 = inlined_call_operand.vmem [shape: bf16[2,32,64], index: 10, kind: input, shape index: {}]   ;;  %s5503_s11 = inlined_call_operand.vmem [shape: f32[2,1,64], index: 11, kind: input, shape index: {}]   ;;  %s5504_s12 = inlined_call_operand.vmem [shape: bf16[2,64,32], index: 12, kind: input, shape index: {}]   ;;  %s5505_s13 = inlined_call_operand.vmem [shape: f32[2,1,32], index: 13, kind: input, shape index: {}]   ;;  %s5506_s14 = inlined_call_operand.vmem [shape: f32[2,1,32], index: 14, kind: input, shape index: {}]   ;;  %s5507_s15 = inlined_call_operand.vmem [shape: f32[2,1,32], index: 15, kind: input, shape index: {}]   ;;  %s5508_s16 = inlined_call_operand.vmem [shape: f32[2,1,32], index: 16, kind: input, shape index: {}]   ;;  %s5509_s17 = inlined_call_operand.vmem [shape: f32[2,1,32], index: 17, kind: input, shape index: {}]   ;;  %s5510_s18 = inlined_call_operand.vmem [shape: bf16[32,128], index: 18, kind: input, shape index: {}]   ;;  %s5511_s19 = inlined_call_operand.vmem [shape: f32[1,128], index: 19, kind: input, shape index: {}]   ;;  %s5512_s20 = inlined_call_operand.vmem [shape: bf16[32,128], index: 20, kind: input, shape index: {}]   ;;  %s5513_s21 = inlined_call_operand.vmem [shape: f32[1,128], index: 21, kind: input, shape index: {}]   ;;  %s5514_s22 = inlined_call_operand.hbm [shape: f32[1,1], index: 22, kind: output, shape index: {0}]   ;;  %s5515_s23 = inlined_call_operand.hbm [shape: f32[2,128], index: 23, kind: output, shape index: {1}]  }
   0x1   :  { %5535 = sst [smem:[#allocation8_spill]] %s5492_s0 }
   0x2   :  { %5536 = sst [smem:[#allocation9_spill]] %s5493_s1 }
   0x3   :  { %5537 = sst [smem:[#allocation10_spill]] %s5494_s2 }
   0x4   :  { %5538 = sst [smem:[#allocation11_spill]] %s5495_s3 }
   0x5   :  { %5539 = sst [smem:[#allocation12_spill]] %s5496_s4 }
   0x6   :  { %5540 = sst [smem:[#allocation13_spill]] %s5497_s5 }
   0x7   :  { %5541 = sst [smem:[#allocation14_spill]] %s5498_s6 }
   0x8   :  { %5542 = sst [smem:[#allocation15_spill]] %s5499_s7 }
   0x9   :  { %29 = vsyncpa [#allocation3], 0  ;;  %s5543_s24 = sld [smem:[#allocation8_spill]]  ;;  %vm80_vm0 = vcmask 261120  }
   0xf   :  { %v76_v0 = vld [vmem:[%s5543_s24] sm:$0xff]  ;;  %v77_v1 = vld [vmem:[%s5543_s24 + $0x8] sm:$0xff] }
  0x10   :  { %v81_v2 = vsel %vm80_vm0, %v76_v0, 0.0  ;;  %v84_v3 = vsel %vm80_vm0, %v77_v1, 0.0 }
  0x11   :  { %82 = vadd.xlane.f32.xlu0 %v81_v2 }
  0x15   :  { %85 = vadd.xlane.f32.xlu0 %v84_v3 }
  0x16   :  { %30 = vsyncpa [#allocation5], 0  ;;  %s5544_s2 = sld [smem:[#allocation14_spill]]  ;;  %v4623_v15 = vmov 0.0   ;;  %vm4624_vm1 = vmmov 0   ;;  %s5545_s29 = sld [smem:[#allocation12_spill]]  ;;  %v246_v50 = vlaneseq }
  0x17   :  { %4204 = vmatprep.subr.bf16.mxu0 %v4623_v15  ;;  %4212 = vmatprep.subr.bf16.mxu1 %v4623_v15  ;;  %s5546_s4 = sld [smem:[#allocation13_spill]]  ;;  %s5547_s25 = sld [smem:[#allocation15_spill]]  ;;  %v4640_v48 = vmov 1983009808   ;;  %v4641_v57 = vmov 1934713408  }
  0x18   :  { %4208 = vmatprep.mubr.msk.bf16.mxu0 %vm4624_vm1, %v4623_v15  ;;  %4214 = vmatprep.mubr.msk.bf16.mxu1 %vm4624_vm1, %v4623_v15  ;;  %s4625_s5 = smov 112   ;;  %s4626_s1 = smov 120   ;;  %v244_v49 = vunpack.c.l.s4 %v4640_v48  ;;  %v247_v54 = vshrl.u32 %v246_v50, 7  ;;  %v308_v58 = vunpack.c.l.s4 %v4641_v57  ;;  %vm853_vm2 = vcmask 64512  }
  0x19   :  { %s4627_s26 = smov 104   ;;  %s4628_s6 = smov 88   ;;  %vm1042_vm3 = vcmask 130048   ;;  %vm1611_vm4 = vcmask 195584   ;;  %vm1854_vm5 = vcmask 523264   ;;  %vm3983_vm6 = vcmask 7168  }
  0x1a   :  { %s5534_s27 = smov 96   ;;  %s5527_s7 = smov 72   ;;  %v245_v53 = vunpack.c.0.s8 %v244_v49 }
  0x1b   :  { %s5526_s28 = smov 80   ;;  %s5522_s3 = smov 64  }
  0x1c   :  { %v4447_v14 = vld [vmem:[%s5544_s2] sm:$0xff]   ;;  %v4448_v16 = vld [vmem:[%s5544_s2 + $0x8] sm:$0xff]   ;;  %s5525_s0 = smov 40   ;;  %s5532_s30 = smov 24   ;;  %v4840_v60 = vsub.s32 %v245_v53, %v247_v54 }
  0x1d   :  { %4205 = vmatpush3.bf16.msra.mxu0 %v4447_v14  ;;  %v4029_v25 = vld [vmem:[%s5545_s29] ss:$0 sm:$0xff]  ;;  %s5521_s29 = smov 56   ;;  %s5523_s24 = smov 32  }
  0x1e   :  { %4206 = vmatprep.subr.bf16.mxu0 %v4623_v15  ;;  %v4030_v29 = vld [vmem:[%s5546_s4] ss:$0 sm:$0xff]  ;;  %s5524_s4 = smov 48  }
  0x1f   :  { %v4031_v34 = vld [vmem:[%s5547_s25] ss:$0 sm:$0xff] }
  0x21   :  { %4207 = vmatpush3.bf16.msra.mxu0 %v4448_v16 }
  0x22   :  { %4218 = vmatprep.subr.bf16.mxu0 %v4623_v15 }
  0x9e   :  { %v83_v4 = vpop.xlane.xlu0 %82 }
  0x9f   :  { %v88_v5 = vmul.f32 0.03125, %v83_v4 }
  0xa1   :  { %v90_v6 = vsub.f32 %v76_v0, %v88_v5 }
  0xa2   :  { %v86_v7 = vpop.xlane.xlu0 %85 }
  0xa3   :  { %v89_v8 = vmul.f32 0.03125, %v86_v7  ;;  %v92_v9 = vmul.f32 %v90_v6, %v90_v6 }
  0xa5   :  { %v91_v10 = vsub.f32 %v77_v1, %v89_v8  ;;  %v94_v11 = vsel %vm80_vm0, %v92_v9, 0.0  ;;  %v309_v1 = vunpack.c.0.s8 %v308_v58 }
  0xa6   :  { %95 = vadd.xlane.f32.xlu1 %v94_v11 }
  0xa7   :  { %v93_v12 = vmul.f32 %v91_v10, %v91_v10  ;;  %v4847_v14 = vsub.s32 %v309_v1, %v247_v54 }
  0xa9   :  { %v97_v13 = vsel %vm80_vm0, %v93_v12, 0.0 }
  0xaa   :  { %98 = vadd.xlane.f32.xlu1 %v97_v13 }
 0x133   :  { %v96_v17 = vpop.xlane.xlu1 %95 }
 0x134   :  { %v100_v18 = vmul.f32 0.03125, %v96_v17 }
 0x136   :  { %v102_v19 = vadd.f32 1e-12, %v100_v18 }
 0x137   :  { %v99_v20 = vpop.xlane.xlu1 %98 }
 0x138   :  { %4471 = vrsqrt.f32 %v102_v19  ;;  %v101_v21 = vmul.f32 0.03125, %v99_v20 }
 0x13a   :  { %v103_v22 = vadd.f32 1e-12, %v101_v21 }
 0x13c   :  { %4473 = vrsqrt.f32 %v103_v22 }
 0x142   :  { %v4472_v23 = vpop.eup %4471 }
 0x143   :  { %v106_v24 = vmul.f32 %v4472_v23, %v90_v6 }
 0x145   :  { %v114_v28 = vmul.f32 %v4029_v25, %v106_v24 }
 0x146   :  { %v4474_v26 = vpop.eup %4473 }
 0x147   :  { %v107_v27 = vmul.f32 %v4474_v26, %v91_v10  ;;  %v4794_v31 = vadd.f32 %v4030_v29, %v114_v28 }
 0x149   :  { %v115_v30 = vmul.f32 %v4029_v25, %v107_v27 }
 0x14b   :  { %v4796_v32 = vadd.f32 %v4030_v29, %v115_v30 }
 0x14d   :  { %v126_v33 = vpack.c.bf16 %v4796_v32, %v4794_v31 }
 0x14f   :  { %4209 = vmatmul.mubr.msk.bf16.vlgmr.msra.gmra.mrb[0].mxu0 %vm80_vm0, %v126_v33 }
 0x150   :  { %4220 = vmatprep.mubr.msk.bf16.mxu0 %vm4624_vm1, %v4623_v15 }
 0x222   :  { %v187_v35 = vpop.f32.mrb[0].mxu0 }
 0x223   :  { %v4210_v36 = vpop.f32.mrb[1].mxu0  ;;  %v188_v38 = vadd.f32 %v4031_v34, %v187_v35 }
 0x224   :  { %v190_v37 = vpop.f32.mrb[2].mxu0 }
 0x225   :  { %v191_v39 = vadd.f32 %v4031_v34, %v190_v37  ;;  %v4211_v40 = vpop.f32.mrb[3].mxu0 }
 0x227   :  { %v4806_v41 = vpack.c.bf16 %v191_v39, %v188_v38 }
 0x229   :  { %199 = vrot.lane.b32.xlu1 %v4806_v41, %s4625_s5  ;;  %196 = vrot.lane.b32.xlu0 %v4806_v41, %s4626_s1 }
 0x22d   :  { %202 = vrot.lane.b32.xlu1 %v4806_v41, %s4627_s26  ;;  %208 = vrot.lane.b32.xlu0 %v4806_v41, %s4628_s6 }
 0x231   :  { %205 = vrot.lane.b32.xlu1 %v4806_v41, %s5534_s27  ;;  %214 = vrot.lane.b32.xlu0 %v4806_v41, %s5527_s7  ;;  %s5550_s7 = smov 72  }
 0x235   :  { %211 = vrot.lane.b32.xlu1 %v4806_v41, %s5526_s28  ;;  %220 = vrot.lane.b32.xlu0 %v4806_v41, %s5521_s29  ;;  %s5530_s29 = smov 8   ;;  %s5552_s28 = smov 56  }
 0x239   :  { %217 = vrot.lane.b32.xlu1 %v4806_v41, %s5522_s3  ;;  %226 = vrot.lane.b32.xlu0 %v4806_v41, %s5525_s0  ;;  %s5528_s3 = smov 16   ;;  %s5548_s0 = sld [smem:[#allocation9_spill]] }
 0x23d   :  { %223 = vrot.lane.b32.xlu1 %v4806_v41, %s5524_s4  ;;  %232 = vrot.lane.b32.xlu0 %v4806_v41, %s5532_s30  ;;  %s5561_s4 = sld [smem:[#allocation10_spill]] }
 0x241   :  { %229 = vrot.lane.b32.xlu1 %v4806_v41, %s5523_s24  ;;  %238 = vrot.lane.b32.xlu0 %v4806_v41, %s5530_s29  ;;  %s5549_s24 = smov 96  }
 0x245   :  { %235 = vrot.lane.b32.xlu1 %v4806_v41, %s5528_s3 }
 0x29b   :  { %v200_v42 = vpop.permute.xlu1 %199  ;;  %v197_v43 = vpop.permute.xlu0 %196 }
 0x29f   :  { %v203_v44 = vpop.permute.xlu1 %202  ;;  %v209_v45 = vpop.permute.xlu0 %208 }
 0x2a0   :  { %v377_v61 = vcombine.low %v197_v43, %v209_v45  ;;  %v378_v3 = vcombine.high %v197_v43, %v209_v45 }
 0x2a2   :  { %v385_v9 = vrot.slane %v377_v61, %v4840_v60  ;;  %v392_v19 = vrot.slane %v378_v3, %v4840_v60 }
 0x2a3   :  { %v206_v46 = vpop.permute.xlu1 %205  ;;  %v215_v47 = vpop.permute.xlu0 %214 }
 0x2a4   :  { %v393_v59 = vcombine.low %v203_v44, %v215_v47  ;;  %v394_v62 = vcombine.high %v203_v44, %v215_v47  ;;  %v241_v4 = vcombine.low %v4806_v41, %v206_v46  ;;  %v242_v5 = vcombine.high %v4806_v41, %v206_v46 }
 0x2a6   :  { %v401_v6 = vrot.slane %v393_v59, %v4840_v60  ;;  %v408_v10 = vrot.slane %v394_v62, %v4840_v60  ;;  %v249_v20 = vrot.slane %v241_v4, %v4840_v60  ;;  %v256_v21 = vrot.slane %v242_v5, %v4840_v60 }
 0x2a7   :  { %v212_v51 = vpop.permute.xlu1 %211  ;;  %v221_v52 = vpop.permute.xlu0 %220 }
 0x2a8   :  { %v257_v2 = vcombine.low %v200_v42, %v212_v51  ;;  %v258_v7 = vcombine.high %v200_v42, %v212_v51  ;;  %v441_v22 = vcombine.low %v385_v9, %v401_v6  ;;  %v442_v27 = vcombine.high %v385_v9, %v401_v6 }
 0x2a9   :  { %v457_v28 = vcombine.low %v392_v19, %v408_v10  ;;  %v458_v29 = vcombine.high %v392_v19, %v408_v10 }
 0x2aa   :  { %v265_v16 = vrot.slane %v257_v2, %v4840_v60  ;;  %v272_v23 = vrot.slane %v258_v7, %v4840_v60  ;;  %v449_v46 = vrot.slane %v441_v22, %v4847_v14  ;;  %v456_v47 = vrot.slane %v442_v27, %v4847_v14 }
 0x2ab   :  { %v4838_v55 = vpop.permute.xlu1 %217  ;;  %v227_v56 = vpop.permute.xlu0 %226  ;;  %v465_v50 = vrot.slane %v457_v28, %v4847_v14  ;;  %v472_v51 = vrot.slane %v458_v29, %v4847_v14 }
 0x2ac   :  { %v305_v34 = vcombine.low %v249_v20, %v265_v16  ;;  %v306_v35 = vcombine.high %v249_v20, %v265_v16  ;;  %v321_v42 = vcombine.low %v256_v21, %v272_v23  ;;  %v322_v43 = vcombine.high %v256_v21, %v272_v23 }
 0x2ae   :  { %v313_v54 = vrot.slane %v305_v34, %v4847_v14  ;;  %v329_v58 = vrot.slane %v321_v42, %v4847_v14  ;;  %v336_v59 = vrot.slane %v322_v43, %v4847_v14 }
 0x2af   :  { %v224_v63 = vpop.permute.xlu1 %223  ;;  %v233_v0 = vpop.permute.xlu0 %232 }
 0x2b0   :  { %v409_v8 = vcombine.low %v221_v52, %v233_v0  ;;  %v410_v11 = vcombine.high %v221_v52, %v233_v0 }
 0x2b2   :  { %v417_v24 = vrot.slane %v409_v8, %v4840_v60  ;;  %v424_v30 = vrot.slane %v410_v11, %v4840_v60 }
 0x2b3   :  { %v230_v12 = vpop.permute.xlu1 %229  ;;  %v239_v13 = vpop.permute.xlu0 %238 }
 0x2b4   :  { %v425_v17 = vcombine.low %v227_v56, %v239_v13  ;;  %v426_v18 = vcombine.high %v227_v56, %v239_v13  ;;  %v273_v44 = vcombine.low %v4838_v55, %v230_v12  ;;  %v274_v45 = vcombine.high %v4838_v55, %v230_v12 }
 0x2b5   :  { %v320_v55 = vrot.slane %v306_v35, %v4847_v14 }
 0x2b6   :  { %v433_v25 = vrot.slane %v425_v17, %v4840_v60  ;;  %v440_v26 = vrot.slane %v426_v18, %v4840_v60  ;;  %v281_v61 = vrot.slane %v273_v44, %v4840_v60  ;;  %v288_v62 = vrot.slane %v274_v45, %v4840_v60 }
 0x2b7   :  { %v236_v33 = vpop.permute.xlu1 %235 }
 0x2b8   :  { %v473_v36 = vcombine.low %v417_v24, %v433_v25  ;;  %v474_v37 = vcombine.high %v417_v24, %v433_v25  ;;  %v489_v38 = vcombine.low %v424_v30, %v440_v26  ;;  %v490_v39 = vcombine.high %v424_v30, %v440_v26 }
 0x2b9   :  { %v289_v40 = vcombine.low %v224_v63, %v236_v33  ;;  %v290_v41 = vcombine.high %v224_v63, %v236_v33 }
 0x2ba   :  { %v481_v48 = vrot.slane %v473_v36, %v4847_v14  ;;  %v488_v49 = vrot.slane %v474_v37, %v4847_v14  ;;  %v497_v56 = vrot.slane %v489_v38, %v4847_v14  ;;  %v504_v57 = vrot.slane %v490_v39, %v4847_v14 }
 0x2bb   :  { %v297_v52 = vrot.slane %v289_v40, %v4840_v60  ;;  %v304_v53 = vrot.slane %v290_v41, %v4840_v60 }
 0x2bc   :  { %v505_v63 = vcombine.low %v449_v46, %v481_v48  ;;  %v506_v0 = vcombine.high %v449_v46, %v481_v48  ;;  %v507_v1 = vcombine.low %v456_v47, %v488_v49  ;;  %v508_v2 = vcombine.high %v456_v47, %v488_v49 }
 0x2bd   :  { %v337_v3 = vcombine.low %v281_v61, %v297_v52  ;;  %v338_v4 = vcombine.high %v281_v61, %v297_v52  ;;  %v353_v5 = vcombine.low %v288_v62, %v304_v53  ;;  %v354_v6 = vcombine.high %v288_v62, %v304_v53 }
 0x2be   :  { %v509_v7 = vcombine.low %v465_v50, %v497_v56  ;;  %v510_v8 = vcombine.high %v465_v50, %v497_v56  ;;  %v511_v9 = vcombine.low %v472_v51, %v504_v57  ;;  %v512_v10 = vcombine.high %v472_v51, %v504_v57 }
 0x2bf   :  { %v345_v11 = vrot.slane %v337_v3, %v4847_v14  ;;  %v352_v12 = vrot.slane %v338_v4, %v4847_v14  ;;  %v361_v13 = vrot.slane %v353_v5, %v4847_v14  ;;  %v368_v16 = vrot.slane %v354_v6, %v4847_v14 }
 0x2c0   :  { %v518_v17 = vshrl.u32 %v505_v63, 16  ;;  %v526_v18 = vshrl.u32 %v506_v0, 16  ;;  %v534_v19 = vshrl.u32 %v507_v1, 16  ;;  %v542_v20 = vshrl.u32 %v508_v2, 16 }
 0x2c1   :  { %v369_v21 = vcombine.low %v313_v54, %v345_v11  ;;  %v370_v22 = vcombine.high %v313_v54, %v345_v11  ;;  %v371_v23 = vcombine.low %v320_v55, %v352_v12  ;;  %v372_v24 = vcombine.high %v320_v55, %v352_v12 }
 0x2c2   :  { %v550_v25 = vshrl.u32 %v509_v7, 16  ;;  %v558_v26 = vshrl.u32 %v510_v8, 16  ;;  %v373_v27 = vcombine.low %v329_v58, %v361_v13  ;;  %v374_v28 = vcombine.high %v329_v58, %v361_v13 }
 0x2c3   :  { %v566_v29 = vshrl.u32 %v511_v9, 16  ;;  %v375_v30 = vcombine.low %v336_v59, %v368_v16  ;;  %v376_v33 = vcombine.high %v336_v59, %v368_v16  ;;  %v517_v34 = vshrl.u32 %v369_v21, 16 }
 0x2c4   :  { %v515_v35 = vpack.i.b16 %v505_v63, %v369_v21  ;;  %v525_v36 = vshrl.u32 %v370_v22, 16  ;;  %v533_v37 = vshrl.u32 %v371_v23, 16  ;;  %v541_v38 = vshrl.u32 %v372_v24, 16 }
 0x2c5   :  { %v523_v39 = vpack.i.b16 %v506_v0, %v370_v22  ;;  %v531_v40 = vpack.i.b16 %v507_v1, %v371_v23  ;;  %v539_v41 = vpack.i.b16 %v508_v2, %v372_v24  ;;  %v549_v42 = vshrl.u32 %v373_v27, 16 }
 0x2c6   :  { %v4880_v43 = vpack.i.b16 %v518_v17, %v517_v34  ;;  %v4882_v44 = vpack.i.b16 %v534_v19, %v533_v37  ;;  %v547_v45 = vpack.i.b16 %v509_v7, %v373_v27  ;;  %v557_v46 = vshrl.u32 %v374_v28, 16 }
 0x2c7   :  { %v555_v47 = vpack.i.b16 %v510_v8, %v374_v28  ;;  %v563_v48 = vpack.i.b16 %v511_v9, %v375_v30  ;;  %v565_v49 = vshrl.u32 %v375_v30, 16  ;;  %v571_v50 = vpack.i.b16 %v512_v10, %v376_v33 }
 0x2c8   :  { %v574_v51 = vshrl.u32 %v512_v10, 16  ;;  %v527_v52 = vpack.i.b16 %v526_v18, %v525_v36  ;;  %v543_v53 = vpack.i.b16 %v542_v20, %v541_v38  ;;  %v573_v54 = vshrl.u32 %v376_v33, 16 }
 0x2c9   :  { %v4884_v55 = vpack.i.b16 %v550_v25, %v549_v42  ;;  %v4886_v56 = vpack.i.b16 %v566_v29, %v565_v49  ;;  %v4888_v57 = vpack.i.b16 %v558_v26, %v557_v46  ;;  %v577_v59 = vcombine.low %v515_v35, %v531_v40 }
 0x2ca   :  { %v4890_v58 = vpack.i.b16 %v574_v51, %v573_v54  ;;  %v593_v61 = vcombine.low %v523_v39, %v539_v41  ;;  %v578_v62 = vcombine.high %v515_v35, %v531_v40  ;;  %v609_v63 = vcombine.low %v547_v45, %v563_v48 }
 0x2cb   :  { %v625_v0 = vcombine.low %v555_v47, %v571_v50  ;;  %v695_v1 = vcombine.low %v4880_v43, %v4882_v44  ;;  %v594_v2 = vcombine.high %v523_v39, %v539_v41  ;;  %v585_v3 = vrot.slane %v577_v59, %v4840_v60 }
 0x2cc   :  { %v601_v4 = vrot.slane %v593_v61, %v4840_v60  ;;  %v711_v5 = vcombine.low %v527_v52, %v543_v53  ;;  %v617_v6 = vrot.slane %v609_v63, %v4840_v60  ;;  %v727_v9 = vcombine.low %v4884_v55, %v4886_v56 }
 0x2cd   :  { %v633_v7 = vrot.slane %v625_v0, %v4840_v60  ;;  %v703_v8 = vrot.slane %v695_v1, %v4840_v60  ;;  %v743_v12 = vcombine.low %v4888_v57, %v4890_v58  ;;  %v610_v13 = vcombine.high %v547_v45, %v563_v48 }
 0x2ce   :  { %v642_v10 = vcombine.high %v585_v3, %v601_v4  ;;  %v719_v11 = vrot.slane %v711_v5, %v4840_v60  ;;  %v735_v17 = vrot.slane %v727_v9, %v4840_v60  ;;  %v626_v18 = vcombine.high %v555_v47, %v571_v50 }
 0x2cf   :  { %v666_v16 = vcombine.high %v617_v6, %v633_v7  ;;  %v751_v20 = vrot.slane %v743_v12, %v4840_v60  ;;  %v641_v22 = vcombine.low %v585_v3, %v601_v4  ;;  %v592_v24 = vrot.slane %v578_v62, %v4840_v60 }
 0x2d0   :  { %v656_v19 = vrot.slane %v642_v10, %v4847_v14  ;;  %v760_v21 = vcombine.high %v703_v8, %v719_v11  ;;  %v608_v25 = vrot.slane %v594_v2, %v4840_v60  ;;  %v759_v26 = vcombine.low %v703_v8, %v719_v11 }
 0x2d1   :  { %v680_v23 = vrot.slane %v666_v16, %v4847_v14  ;;  %v783_v28 = vcombine.low %v735_v17, %v751_v20  ;;  %v784_v29 = vcombine.high %v735_v17, %v751_v20  ;;  %v696_v30 = vcombine.high %v4880_v43, %v4882_v44 }
 0x2d2   :  { %v774_v27 = vrot.slane %v760_v21, %v4847_v14  ;;  %v665_v33 = vcombine.low %v617_v6, %v633_v7  ;;  %v712_v35 = vcombine.high %v527_v52, %v543_v53  ;;  %v624_v37 = vrot.slane %v610_v13, %v4840_v60 }
 0x2d3   :  { %v691_v34 = vcombine.low %v656_v19, %v680_v23  ;;  %v798_v36 = vrot.slane %v784_v29, %v4847_v14  ;;  %v640_v38 = vrot.slane %v626_v18, %v4840_v60  ;;  %v728_v39 = vcombine.high %v4884_v55, %v4886_v56 }
 0x2d4   :  { %v744_v40 = vcombine.high %v4888_v57, %v4890_v58  ;;  %v657_v41 = vcombine.low %v592_v24, %v608_v25  ;;  %v649_v43 = vrot.slane %v641_v22, %v4847_v14  ;;  %v767_v44 = vrot.slane %v759_v26, %v4847_v14 }
 0x2d5   :  { %v809_v42 = vcombine.low %v774_v27, %v798_v36  ;;  %v791_v45 = vrot.slane %v783_v28, %v4847_v14  ;;  %v828_v46 = vshrl.u32 %v691_v34, 16  ;;  %v673_v47 = vrot.slane %v665_v33, %v4847_v14 }
 0x2d6   :  { %v810_v48 = vcombine.high %v774_v27, %v798_v36  ;;  %v681_v49 = vcombine.low %v624_v37, %v640_v38  ;;  %v710_v52 = vrot.slane %v696_v30, %v4840_v60  ;;  %v726_v53 = vrot.slane %v712_v35, %v4840_v60  ;;  %v124_v37 = vld [vmem:[%s5548_s0] sm:$0xff] }
 0x2d7   :  { %v827_v50 = vpack.i.b16 %v809_v42, %v691_v34  ;;  %v829_v51 = vshrl.u32 %v809_v42, 16  ;;  %v692_v54 = vcombine.high %v656_v19, %v680_v23  ;;  %v664_v55 = vrot.slane %v657_v41, %v4847_v14 }
 0x2d8   :  { %v688_v56 = vrot.slane %v681_v49, %v4847_v14  ;;  %v807_v59 = vcombine.low %v767_v44, %v791_v45  ;;  %v742_v61 = vrot.slane %v728_v39, %v4840_v60  ;;  %v758_v62 = vrot.slane %v744_v40, %v4840_v60  ;;  %v125_v39 = vld [vmem:[%s5548_s0 + $0x8] sm:$0xff] }
 0x2d9   :  { %v858_v57 = vsel %vm853_vm2, %v827_v50, 0  ;;  %v830_v58 = vpack.i.b16 %v829_v51, %v828_v46  ;;  %v689_v0 = vcombine.low %v649_v43, %v673_v47  ;;  %v835_v1 = vshrl.u32 %v810_v48, 16 }
 0x2da   :  { %4213 = vmatpush3.bf16.xpose.msra.mxu1 %v858_v57  ;;  %v775_v2 = vcombine.low %v710_v52, %v726_v53  ;;  %v799_v3 = vcombine.low %v742_v61, %v758_v62  ;;  %v4933_v4 = vcombine.high %v664_v55, %v688_v56  ;;  %v817_v5 = vshrl.u32 %v807_v59, 16 }
 0x2db   :  { %v905_v63 = vsel %vm853_vm2, %v830_v58, 0  ;;  %4224 = vmatprep.subr.bf16.mxu1 %v4623_v15  ;;  %v833_v6 = vpack.i.b16 %v810_v48, %v692_v54  ;;  %v834_v7 = vshrl.u32 %v692_v54, 16  ;;  %v815_v10 = vpack.i.b16 %v807_v59, %v689_v0 }
 0x2dc   :  { %4219 = vmatpush3.bf16.xpose.msra.mxu0 %v905_v63  ;;  %v782_v8 = vrot.slane %v775_v2, %v4847_v14  ;;  %v806_v9 = vrot.slane %v799_v3, %v4847_v14  ;;  %v816_v11 = vshrl.u32 %v689_v0, 16  ;;  %v808_v16 = vcombine.high %v767_v44, %v791_v45 }
 0x2dd   :  { %4230 = vmatprep.subr.bf16.mxu0 %v4623_v15  ;;  %v836_v12 = vpack.i.b16 %v835_v1, %v834_v7  ;;  %v952_v17 = vsel %vm853_vm2, %v833_v6, 0  ;;  %v849_v21 = vshrl.u32 %v4933_v4, 16  ;;  %v690_v23 = vcombine.high %v649_v43, %v673_v47 }
 0x2de   :  { %v4938_v13 = vcombine.high %v782_v8, %v806_v9  ;;  %v818_v18 = vpack.i.b16 %v817_v5, %v816_v11  ;;  %v811_v19 = vcombine.low %v782_v8, %v806_v9  ;;  %v693_v25 = vcombine.low %v664_v55, %v688_v56 }
 0x2df   :  { %v999_v24 = vsel %vm853_vm2, %v836_v12, 0  ;;  %v823_v27 = vshrl.u32 %v808_v16, 16  ;;  %v821_v29 = vpack.i.b16 %v808_v16, %v690_v23  ;;  %v822_v30 = vshrl.u32 %v690_v23, 16 }
 0x2e0   :  { %v847_v20 = vpack.i.b16 %v4938_v13, %v4933_v4  ;;  %v850_v22 = vshrl.u32 %v4938_v13, 16  ;;  %v842_v28 = vshrl.u32 %v811_v19, 16  ;;  %v839_v33 = vpack.i.b16 %v811_v19, %v693_v25 }
 0x2e1   :  { %4215 = vmatmul.mubr.msk.bf16.vlgmr.msra.gmra.mrb[0].mxu1 %vm853_vm2, %v815_v10  ;;  %v841_v34 = vshrl.u32 %v693_v25, 16  ;;  %v824_v35 = vpack.i.b16 %v823_v27, %v822_v30 }
 0x2e2   :  { %4225 = vmatpush3.bf16.xpose.msra.mxu1 %v952_v17  ;;  %4226 = vmatprep.mubr.msk.bf16.mxu1 %vm4624_vm1, %v4623_v15  ;;  %v4953_v26 = vpack.i.b16 %v850_v22, %v849_v21 }
 0x2e3   :  { %4221 = vmatmul.mubr.msk.bf16.vlgmr.msra.gmra.mrb[4].mxu0 %vm853_vm2, %v818_v18  ;;  %4236 = vmatprep.subr.bf16.mxu1 %v4623_v15  ;;  %v843_v36 = vpack.i.b16 %v842_v28, %v841_v34 }
 0x2e4   :  { %4231 = vmatpush3.bf16.xpose.msra.mxu0 %v999_v24  ;;  %4232 = vmatprep.mubr.msk.bf16.mxu0 %vm4624_vm1, %v4623_v15 }
 0x2e5   :  { %4242 = vmatprep.subr.bf16.mxu0 %v4623_v15 }
 0x2e9   :  { %4227 = vmatmul.mubr.msk.bf16.vlgmr.msra.gmra.mrb[4].mxu1 %vm853_vm2, %v821_v29 }
 0x2ea   :  { %4237 = vmatpush3.bf16.msra.mxu1 %v839_v33  ;;  %4238 = vmatprep.mubr.msk.bf16.mxu1 %vm4624_vm1, %v4623_v15 }
 0x2eb   :  { %4233 = vmatmul.mubr.msk.bf16.vlgmr.msra.gmra.mrb[8].mxu0 %vm853_vm2, %v824_v35  ;;  %4248 = vmatprep.subr.bf16.mxu1 %v4623_v15 }
 0x2ec   :  { %4243 = vmatpush3.bf16.msra.mxu0 %v843_v36  ;;  %4244 = vmatprep.mubr.msk.bf16.mxu0 %vm4624_vm1, %v4623_v15 }
 0x2ed   :  { %4254 = vmatprep.subr.bf16.mxu0 %v4623_v15 }
 0x3b4   :  { %v894_v38 = vpop.f32.mrb[0].mxu1 }
 0x3b5   :  { %v895_v40 = vadd.f32 %v894_v38, %v124_v37  ;;  %v4216_v41 = vpop.f32.mrb[1].mxu1 }
 0x3b6   :  { %v897_v42 = vpop.f32.mrb[2].mxu1  ;;  %v941_v43 = vpop.f32.mrb[4].mxu0 }
 0x3b7   :  { %v898_v44 = vadd.f32 %v897_v42, %v125_v39  ;;  %v4217_v45 = vpop.f32.mrb[3].mxu1  ;;  %v4222_v46 = vpop.f32.mrb[5].mxu0  ;;  %v1043_v47 = vsel %vm1042_vm3, %v895_v40, -inf  ;;  %v942_v49 = vadd.f32 %v941_v43, %v124_v37 }
 0x3b8   :  { %1044 = vmax.xlane.f32.xlu1 %v1043_v47  ;;  %v944_v48 = vpop.f32.mrb[6].mxu0 }
 0x3b9   :  { %v4223_v50 = vpop.f32.mrb[7].mxu0  ;;  %v1046_v51 = vsel %vm1042_vm3, %v898_v44, -inf  ;;  %v945_v53 = vadd.f32 %v944_v48, %v125_v39  ;;  %v1049_v56 = vsel %vm1042_vm3, %v942_v49, -inf }
 0x3ba   :  { %1047 = vmax.xlane.f32.xlu0 %v1046_v51 }
 0x3bb   :  { %v1052_v3 = vsel %vm1042_vm3, %v945_v53, -inf }
 0x3bc   :  { %v988_v52 = vpop.f32.mrb[4].mxu1 }
 0x3bd   :  { %v989_v54 = vadd.f32 %v988_v52, %v124_v37  ;;  %v4228_v55 = vpop.f32.mrb[5].mxu1 }
 0x3be   :  { %v991_v57 = vpop.f32.mrb[6].mxu1  ;;  %1050 = vmax.xlane.f32.xlu0 %v1049_v56  ;;  %v1035_v58 = vpop.f32.mrb[8].mxu0 }
 0x3bf   :  { %v1036_v59 = vadd.f32 %v1035_v58, %v124_v37  ;;  %v4229_v61 = vpop.f32.mrb[7].mxu1  ;;  %v4234_v62 = vpop.f32.mrb[9].mxu0  ;;  %v1055_v63 = vsel %vm1042_vm3, %v989_v54, -inf  ;;  %v992_v1 = vadd.f32 %v991_v57, %v125_v39 }
 0x3c0   :  { %1056 = vmax.xlane.f32.xlu1 %v1055_v63  ;;  %v1038_v0 = vpop.f32.mrb[10].mxu0 }
 0x3c1   :  { %v4235_v2 = vpop.f32.mrb[11].mxu0  ;;  %v1061_v5 = vsel %vm1042_vm3, %v1036_v59, -inf  ;;  %v1039_v6 = vadd.f32 %v1038_v0, %v125_v39  ;;  %v1058_v7 = vsel %vm1042_vm3, %v992_v1, -inf }
 0x3c2   :  { %1053 = vmax.xlane.f32.xlu0 %v1052_v3 }
 0x3c3   :  { %v1064_v8 = vsel %vm1042_vm3, %v1039_v6, -inf }
 0x3c4   :  { %1062 = vmax.xlane.f32.xlu1 %v1061_v5 }
 0x3c6   :  { %1059 = vmax.xlane.f32.xlu0 %v1058_v7 }
 0x3ca   :  { %1065 = vmax.xlane.f32.xlu0 %v1064_v8 }
 0x445   :  { %v1045_v9 = vpop.xlane.xlu1 %1044 }
 0x446   :  { %v1067_v10 = vsub.f32 %v895_v40, %v1045_v9 }
 0x447   :  { %v1048_v11 = vpop.xlane.xlu0 %1047 }
 0x448   :  { %v1075_v12 = vmul.f32 1.442695, %v1067_v10  ;;  %v1068_v16 = vsub.f32 %v898_v44, %v1048_v11 }
 0x44a   :  { %4475 = vpow2.f32 %v1075_v12  ;;  %v1077_v17 = vmul.f32 1.442695, %v1068_v16 }
 0x44b   :  { %v1051_v18 = vpop.xlane.xlu0 %1050 }
 0x44c   :  { %4477 = vpow2.f32 %v1077_v17  ;;  %v1069_v19 = vsub.f32 %v942_v49, %v1051_v18 }
 0x44d   :  { %v1057_v21 = vpop.xlane.xlu1 %1056 }
 0x44e   :  { %v1079_v22 = vmul.f32 1.442695, %v1069_v19  ;;  %v1071_v23 = vsub.f32 %v989_v54, %v1057_v21 }
 0x44f   :  { %v1054_v24 = vpop.xlane.xlu0 %1053 }
 0x450   :  { %4479 = vpow2.f32 %v1079_v22  ;;  %v1083_v25 = vmul.f32 1.442695, %v1071_v23  ;;  %v1070_v27 = vsub.f32 %v945_v53, %v1054_v24 }
 0x451   :  { %v1063_v28 = vpop.xlane.xlu1 %1062 }
 0x452   :  { %4481 = vpow2.f32 %v1083_v25  ;;  %v1081_v29 = vmul.f32 1.442695, %v1070_v27  ;;  %v1073_v30 = vsub.f32 %v1036_v59, %v1063_v28 }
 0x453   :  { %v1060_v33 = vpop.xlane.xlu0 %1059 }
 0x454   :  { %v4476_v34 = vpop.eup %4475  ;;  %4483 = vpow2.f32 %v1081_v29  ;;  %v1087_v35 = vmul.f32 1.442695, %v1073_v30  ;;  %v1072_v36 = vsub.f32 %v992_v1, %v1060_v33 }
 0x455   :  { %v1091_v37 = vsel %vm1042_vm3, %v4476_v34, 0.0 }
 0x456   :  { %v4478_v38 = vpop.eup %4477  ;;  %4485 = vpow2.f32 %v1087_v35  ;;  %v1085_v39 = vmul.f32 1.442695, %v1072_v36  ;;  %1092 = vadd.xlane.f32.xlu1 %v1091_v37 }
 0x457   :  { %v1066_v40 = vpop.xlane.xlu0 %1065  ;;  %v1094_v41 = vsel %vm1042_vm3, %v4478_v38, 0.0 }
 0x458   :  { %4487 = vpow2.f32 %v1085_v39  ;;  %v1074_v42 = vsub.f32 %v1039_v6, %v1066_v40  ;;  %1095 = vadd.xlane.f32.xlu0 %v1094_v41 }
 0x45a   :  { %v4480_v43 = vpop.eup %4479  ;;  %v1089_v44 = vmul.f32 1.442695, %v1074_v42 }
 0x45b   :  { %v1097_v45 = vsel %vm1042_vm3, %v4480_v43, 0.0 }
 0x45c   :  { %v4482_v46 = vpop.eup %4481  ;;  %4489 = vpow2.f32 %v1089_v44  ;;  %1098 = vadd.xlane.f32.xlu1 %v1097_v45 }
 0x45d   :  { %v1103_v48 = vsel %vm1042_vm3, %v4482_v46, 0.0 }
 0x45e   :  { %v4484_v47 = vpop.eup %4483 }
 0x45f   :  { %v1100_v49 = vsel %vm1042_vm3, %v4484_v47, 0.0 }
 0x460   :  { %v4486_v50 = vpop.eup %4485  ;;  %1104 = vadd.xlane.f32.xlu1 %v1103_v48  ;;  %1101 = vadd.xlane.f32.xlu0 %v1100_v49 }
 0x461   :  { %v1109_v52 = vsel %vm1042_vm3, %v4486_v50, 0.0 }
 0x462   :  { %v4488_v51 = vpop.eup %4487 }
 0x463   :  { %v1106_v53 = vsel %vm1042_vm3, %v4488_v51, 0.0 }
 0x464   :  { %1110 = vadd.xlane.f32.xlu1 %v1109_v52  ;;  %1107 = vadd.xlane.f32.xlu0 %v1106_v53 }
 0x466   :  { %v4490_v54 = vpop.eup %4489 }
 0x467   :  { %v1112_v55 = vsel %vm1042_vm3, %v4490_v54, 0.0 }
 0x468   :  { %1113 = vadd.xlane.f32.xlu0 %v1112_v55 }
 0x4e3   :  { %v1093_v56 = vpop.xlane.xlu1 %1092 }
 0x4e4   :  { %4491 = vrcp.f32 %v1093_v56 }
 0x4e5   :  { %v1096_v57 = vpop.xlane.xlu0 %1095 }
 0x4e6   :  { %4493 = vrcp.f32 %v1096_v57 }
 0x4e9   :  { %v1099_v58 = vpop.xlane.xlu1 %1098 }
 0x4ea   :  { %4495 = vrcp.f32 %v1099_v58 }
 0x4ed   :  { %v1105_v59 = vpop.xlane.xlu1 %1104  ;;  %v1102_v61 = vpop.xlane.xlu0 %1101 }
 0x4ee   :  { %v4492_v62 = vpop.eup %4491  ;;  %4497 = vrcp.f32 %v1102_v61 }
 0x4ef   :  { %v1123_v0 = vmul.f32 %v4492_v62, %v4476_v34  ;;  %4499 = vrcp.f32 %v1105_v59 }
 0x4f0   :  { %v4494_v63 = vpop.eup %4493 }
 0x4f1   :  { %v1124_v1 = vmul.f32 %v4494_v63, %v4478_v38  ;;  %v1111_v2 = vpop.xlane.xlu1 %1110  ;;  %v1108_v3 = vpop.xlane.xlu0 %1107 }
 0x4f2   :  { %4501 = vrcp.f32 %v1108_v3 }
 0x4f3   :  { %v1131_v5 = vpack.c.bf16 %v1124_v1, %v1123_v0  ;;  %4503 = vrcp.f32 %v1111_v2 }
 0x4f4   :  { %v4496_v7 = vpop.eup %4495 }
 0x4f5   :  { %4239 = vmatmul.mubr.msk.bf16.vlgmr.msra.gmra.mrb[8].mxu1 %vm1042_vm3, %v1131_v5  ;;  %v1114_v6 = vpop.xlane.xlu0 %1113  ;;  %v1125_v9 = vmul.f32 %v4496_v7, %v4480_v43 }
 0x4f6   :  { %4249 = vmatpush3.bf16.msra.mxu1 %v847_v20  ;;  %4505 = vrcp.f32 %v1114_v6  ;;  %4250 = vmatprep.mubr.msk.bf16.mxu1 %vm4624_vm1, %v4623_v15 }
 0x4f7   :  { %4260 = vmatprep.subr.bf16.mxu1 %v4623_v15 }
 0x4f8   :  { %v4498_v8 = vpop.eup %4497 }
 0x4f9   :  { %v1126_v10 = vmul.f32 %v4498_v8, %v4484_v47  ;;  %v4500_v11 = vpop.eup %4499 }
 0x4fa   :  { %v1127_v18 = vmul.f32 %v4500_v11, %v4482_v46 }
 0x4fb   :  { %v1132_v12 = vpack.c.bf16 %v1126_v10, %v1125_v9 }
 0x4fc   :  { %v4502_v16 = vpop.eup %4501 }
 0x4fd   :  { %v4504_v17 = vpop.eup %4503  ;;  %v1128_v19 = vmul.f32 %v4502_v16, %v4488_v51  ;;  %4245 = vmatmul.mubr.msk.bf16.vlgmr.msra.gmra.mrb[12].mxu0 %vm1042_vm3, %v1132_v12 }
 0x4fe   :  { %4255 = vmatpush3.bf16.msra.mxu0 %v4953_v26  ;;  %4256 = vmatprep.mubr.msk.bf16.mxu0 %vm4624_vm1, %v4623_v15  ;;  %v1129_v20 = vmul.f32 %v4504_v17, %v4486_v50 }
 0x4ff   :  { %v1133_v13 = vpack.c.bf16 %v1128_v19, %v1127_v18  ;;  %4268 = vmatprep.subr.bf16.mxu0 %v4623_v15 }
 0x500   :  { %v4506_v4 = vpop.eup %4505 }
 0x501   :  { %v1130_v21 = vmul.f32 %v4506_v4, %v4490_v54  ;;  %4251 = vmatmul.mubr.msk.bf16.vlgmr.msra.gmra.mrb[12].mxu1 %vm1042_vm3, %v1133_v13 }
 0x502   :  { %4264 = vmatprep.mubr.msk.bf16.mxu1 %vm4624_vm1, %v4623_v15 }
 0x503   :  { %v1134_v22 = vpack.c.bf16 %v1130_v21, %v1129_v20 }
 0x505   :  { %4257 = vmatmul.mubr.msk.bf16.vlgmr.msra.gmra.mrb[16].mxu0 %vm1042_vm3, %v1134_v22 }
 0x506   :  { %4272 = vmatprep.mubr.msk.bf16.mxu0 %vm4624_vm1, %v4623_v15 }
 0x5c8   :  { %v1172_v26 = vpop.f32.mrb[8].mxu1 }
 0x5c9   :  { %v4240_v23 = vpop.f32.mrb[9].mxu1 }
 0x5ca   :  { %v1175_v24 = vpop.f32.mrb[10].mxu1 }
 0x5cb   :  { %v4241_v25 = vpop.f32.mrb[11].mxu1 }
 0x5d0   :  { %v1216_v27 = vpop.f32.mrb[12].mxu0 }
 0x5d1   :  { %v4246_v28 = vpop.f32.mrb[13].mxu0 }
 0x5d2   :  { %v1219_v29 = vpop.f32.mrb[14].mxu0  ;;  %v4449_v28 = vld [vmem:[%s5500_s8] sm:$0xff]  }
 0x5d3   :  { %v4247_v30 = vpop.f32.mrb[15].mxu0  ;;  %4261 = vmatpush3.bf16.msra.mxu1 %v4449_v28 }
 0x5d4   :  { %v1260_v33 = vpop.f32.mrb[12].mxu1  ;;  %4262 = vmatprep.subr.bf16.mxu1 %v4623_v15 }
 0x5d5   :  { %v1311_v34 = vcombine.low %v1172_v26, %v1260_v33  ;;  %v1312_v35 = vcombine.high %v1172_v26, %v1260_v33  ;;  %v4252_v36 = vpop.f32.mrb[13].mxu1 }
 0x5d6   :  { %v1263_v37 = vpop.f32.mrb[14].mxu1 }
 0x5d7   :  { %v1379_v38 = vcombine.low %v1175_v24, %v1263_v37  ;;  %v1380_v39 = vcombine.high %v1175_v24, %v1263_v37  ;;  %v4253_v40 = vpop.f32.mrb[15].mxu1  ;;  %v1319_v45 = vrot.slane %v1311_v34, %v4840_v60  ;;  %v1326_v46 = vrot.slane %v1312_v35, %v4840_v60 }
 0x5d8   :  { %v1304_v41 = vpop.f32.mrb[16].mxu0 }
 0x5d9   :  { %v1327_v42 = vcombine.low %v1216_v27, %v1304_v41  ;;  %v1328_v43 = vcombine.high %v1216_v27, %v1304_v41  ;;  %v4258_v44 = vpop.f32.mrb[17].mxu0  ;;  %v1387_v57 = vrot.slane %v1379_v38, %v4840_v60  ;;  %v1394_v58 = vrot.slane %v1380_v39, %v4840_v60 }
 0x5da   :  { %v1307_v47 = vpop.f32.mrb[18].mxu0 }
 0x5db   :  { %v1335_v48 = vrot.slane %v1327_v42, %v4840_v60  ;;  %v1342_v49 = vrot.slane %v1328_v43, %v4840_v60  ;;  %v1395_v50 = vcombine.low %v1219_v29, %v1307_v47  ;;  %v1396_v51 = vcombine.high %v1219_v29, %v1307_v47  ;;  %v4259_v52 = vpop.f32.mrb[19].mxu0 }
 0x5dd   :  { %v1343_v53 = vcombine.low %v1319_v45, %v1335_v48  ;;  %v1344_v54 = vcombine.high %v1319_v45, %v1335_v48  ;;  %v1359_v55 = vcombine.low %v1326_v46, %v1342_v49  ;;  %v1360_v56 = vcombine.high %v1326_v46, %v1342_v49 }
 0x5de   :  { %v1403_v59 = vrot.slane %v1395_v50, %v4840_v60  ;;  %v1410_v61 = vrot.slane %v1396_v51, %v4840_v60  ;;  %v4450_v51 = vld [vmem:[%s5500_s8 + $0x8] sm:$0xff]  }
 0x5df   :  { %v1351_v62 = vrot.slane %v1343_v53, %v4847_v14  ;;  %v1358_v63 = vrot.slane %v1344_v54, %v4847_v14  ;;  %v1367_v0 = vrot.slane %v1359_v55, %v4847_v14  ;;  %v1374_v1 = vrot.slane %v1360_v56, %v4847_v14  ;;  %4263 = vmatpush3.bf16.msra.mxu1 %v4450_v51 }
 0x5e0   :  { %v1411_v2 = vcombine.low %v1387_v57, %v1403_v59  ;;  %v1412_v3 = vcombine.high %v1387_v57, %v1403_v59  ;;  %v1427_v5 = vcombine.low %v1394_v58, %v1410_v61  ;;  %v1428_v6 = vcombine.high %v1394_v58, %v1410_v61  ;;  %4276 = vmatprep.subr.bf16.mxu1 %v4623_v15 }
 0x5e1   :  { %v1447_v7 = vcombine.low %v1351_v62, %v1358_v63  ;;  %v4043_v8 = vcombine.high %v1351_v62, %v1358_v63  ;;  %v1463_v9 = vcombine.low %v1367_v0, %v1374_v1  ;;  %v4044_v10 = vcombine.high %v1367_v0, %v1374_v1 }
 0x5e2   :  { %v1419_v11 = vrot.slane %v1411_v2, %v4847_v14  ;;  %v1426_v12 = vrot.slane %v1412_v3, %v4847_v14  ;;  %v1435_v16 = vrot.slane %v1427_v5, %v4847_v14  ;;  %v1442_v17 = vrot.slane %v1428_v6, %v4847_v14 }
 0x5e3   :  { %v1454_v18 = vrot.slane %v1447_v7, %v4840_v60  ;;  %v1462_v19 = vrot.slane %v4043_v8, %v4840_v60  ;;  %v1470_v4 = vrot.slane %v1463_v9, %v4840_v60  ;;  %v1478_v13 = vrot.slane %v4044_v10, %v4840_v60 }
 0x5e4   :  { %v1515_v20 = vcombine.low %v1419_v11, %v1426_v12  ;;  %v4045_v21 = vcombine.high %v1419_v11, %v1426_v12  ;;  %v1531_v22 = vcombine.low %v1435_v16, %v1442_v17  ;;  %v4046_v26 = vcombine.high %v1435_v16, %v1442_v17  ;;  %v4047_v16 = vld [vmem:[%s5501_s9] ss:$0 sm:$0xff] }
 0x5e5   :  { %v1480_v23 = vcombine.high %v1454_v18, %v1462_v19  ;;  %v1496_v24 = vcombine.high %v1470_v4, %v1478_v13  ;;  %v1479_v25 = vcombine.low %v1454_v18, %v1462_v19  ;;  %v1495_v27 = vcombine.low %v1470_v4, %v1478_v13 }
 0x5e6   :  { %v1522_v29 = vrot.slane %v1515_v20, %v4840_v60  ;;  %v1530_v30 = vrot.slane %v4045_v21, %v4840_v60  ;;  %v1538_v33 = vrot.slane %v1531_v22, %v4840_v60  ;;  %v1546_v34 = vrot.slane %v4046_v26, %v4840_v60 }
 0x5e7   :  { %v1494_v35 = vrot.slane %v1480_v23, %v4847_v14  ;;  %v1510_v36 = vrot.slane %v1496_v24, %v4847_v14  ;;  %v1487_v37 = vrot.slane %v1479_v25, %v4847_v14  ;;  %v1503_v38 = vrot.slane %v1495_v27, %v4847_v14 }
 0x5e8   :  { %v1548_v39 = vcombine.high %v1522_v29, %v1530_v30  ;;  %v1564_v40 = vcombine.high %v1538_v33, %v1546_v34  ;;  %v1547_v41 = vcombine.low %v1522_v29, %v1530_v30  ;;  %v1563_v42 = vcombine.low %v1538_v33, %v1546_v34 }
 0x5e9   :  { %v1513_v43 = vcombine.low %v1494_v35, %v1510_v36  ;;  %v1511_v44 = vcombine.low %v1487_v37, %v1503_v38  ;;  %v1512_v45 = vcombine.high %v1487_v37, %v1503_v38  ;;  %v1514_v46 = vcombine.high %v1494_v35, %v1510_v36  ;;  %v4452_v36 = vld [vmem:[%s5502_s10 + $0x8] sm:$0xff]  }
 0x5ea   :  { %v1562_v47 = vrot.slane %v1548_v39, %v4847_v14  ;;  %v1578_v48 = vrot.slane %v1564_v40, %v4847_v14  ;;  %v1555_v49 = vrot.slane %v1547_v41, %v4847_v14  ;;  %v1571_v50 = vrot.slane %v1563_v42, %v4847_v14 }
 0x5ec   :  { %v1581_v52 = vcombine.low %v1562_v47, %v1578_v48  ;;  %v1580_v53 = vcombine.high %v1555_v49, %v1571_v50  ;;  %v1579_v54 = vcombine.low %v1555_v49, %v1571_v50  ;;  %v1582_v55 = vcombine.high %v1562_v47, %v1578_v48  ;;  %v4052_v49 = vld [vmem:[%s5507_s15] ss:$0 sm:$0xff] }
 0x5ee   :  { %v4422_v56 = vpack.i.bf16 %v1581_v52, %v1513_v43  ;;  %v4417_v57 = vpack.i.bf16 %v1580_v53, %v1512_v45  ;;  %v4427_v58 = vpack.i.bf16 %v1582_v55, %v1514_v46  ;;  %v4454_v55 = vld [vmem:[%s5504_s12 + $0x8] sm:$0xff]  }
 0x5f0   :  { %4423 = vrot.lane.b32.xlu0 %v4422_v56, %s5528_s3  ;;  %4418 = vrot.lane.b32.xlu1 %v4417_v57, %s5530_s29  ;;  %v4455_v56 = vld [vmem:[%s5504_s12 + $0x10] sm:$0xff]   ;;  %v4456_v57 = vld [vmem:[%s5504_s12 + $0x18] sm:$0xff]   ;;  %s5553_s3 = smov 64   ;;  %s5554_s29 = smov 40  }
 0x5f4   :  { %4428 = vrot.lane.b32.xlu1 %v4427_v58, %s5532_s30  ;;  %v4053_v58 = vld [vmem:[%s5503_s11] ss:$0 sm:$0xff] }
 0x662   :  { %v4424_v59 = vpop.permute.xlu0 %4423  ;;  %v4419_v61 = vpop.permute.xlu1 %4418 }
 0x663   :  { %v4421_v62 = vunpack.i.h.bf16 %v4419_v61  ;;  %v4420_v63 = vunpack.i.l.bf16 %v4419_v61  ;;  %v4426_v0 = vunpack.i.h.bf16 %v4424_v59  ;;  %v4425_v1 = vunpack.i.l.bf16 %v4424_v59 }
 0x665   :  { %v1607_v2 = vsel %vm853_vm2, %v1511_v44, %v4420_v63  ;;  %v1608_v3 = vsel %vm853_vm2, %v1579_v54, %v4421_v62  ;;  %v4051_v44 = vld [vmem:[%s5506_s14] ss:$0 sm:$0xff] }
 0x666   :  { %v4429_v5 = vpop.permute.xlu1 %4428  ;;  %v1609_v8 = vsel %vm1042_vm3, %v1607_v2, %v4425_v1  ;;  %v1610_v9 = vsel %vm1042_vm3, %v1608_v3, %v4426_v0  ;;  %v4453_v54 = vld [vmem:[%s5504_s12] sm:$0xff]  }
 0x667   :  { %v4431_v6 = vunpack.i.h.bf16 %v4429_v5  ;;  %v4430_v7 = vunpack.i.l.bf16 %v4429_v5 }
 0x669   :  { %v1612_v10 = vsel %vm1611_vm4, %v1609_v8, %v4430_v7  ;;  %v1613_v11 = vsel %vm1611_vm4, %v1610_v9, %v4431_v6 }
 0x66a   :  { %v1614_v12 = vpack.c.bf16 %v1613_v11, %v1612_v10 }
 0x66c   :  { %4265 = vmatmul.mubr.msk.bf16.vlgmr.msra.gmra.mrb[16].mxu1 %vm80_vm0, %v1614_v12 }
 0x66d   :  { %4284 = vmatprep.mubr.msk.bf16.mxu1 %vm4624_vm1, %v4623_v15  ;;  %4277 = vmatpush3.bf16.msra.mxu1 %v4453_v54 }
 0x66e   :  { %4278 = vmatprep.subr.bf16.mxu1 %v4623_v15 }
 0x671   :  { %4279 = vmatpush3.bf16.msra.mxu1 %v4454_v55 }
 0x672   :  { %4280 = vmatprep.subr.bf16.mxu1 %v4623_v15 }
 0x675   :  { %4281 = vmatpush3.bf16.msra.mxu1 %v4455_v56 }
 0x676   :  { %4282 = vmatprep.subr.bf16.mxu1 %v4623_v15 }
 0x679   :  { %4283 = vmatpush3.bf16.msra.mxu1 %v4456_v57 }
 0x67a   :  { %4302 = vmatprep.subr.bf16.mxu1 %v4623_v15 }
 0x73f   :  { %v1675_v17 = vpop.f32.mrb[16].mxu1 }
 0x740   :  { %v1676_v18 = vadd.f32 %v4047_v16, %v1675_v17  ;;  %v4266_v19 = vpop.f32.mrb[17].mxu1 }
 0x741   :  { %v1678_v4 = vpop.f32.mrb[18].mxu1 }
 0x742   :  { %v1679_v13 = vadd.f32 %v4047_v16, %v1678_v4  ;;  %v4267_v20 = vpop.f32.mrb[19].mxu1  ;;  %v1682_v21 = vadd.f32 %v1676_v18, %v4794_v31 }
 0x744   :  { %v1686_v22 = vsel %vm80_vm0, %v1682_v21, 0.0  ;;  %v1683_v26 = vadd.f32 %v1679_v13, %v4796_v32  ;;  %v4451_v32 = vld [vmem:[%s5502_s10] sm:$0xff]  }
 0x745   :  { %1687 = vadd.xlane.f32.xlu1 %v1686_v22  ;;  %4269 = vmatpush3.bf16.msra.mxu0 %v4451_v32 }
 0x746   :  { %v1689_v23 = vsel %vm80_vm0, %v1683_v26, 0.0  ;;  %4270 = vmatprep.subr.bf16.mxu0 %v4623_v15 }
 0x747   :  { %1690 = vadd.xlane.f32.xlu0 %v1689_v23 }
 0x749   :  { %4271 = vmatpush3.bf16.msra.mxu0 %v4452_v36 }
 0x74a   :  { %4288 = vmatprep.subr.bf16.mxu0 %v4623_v15 }
 0x7d2   :  { %v1688_v24 = vpop.xlane.xlu1 %1687 }
 0x7d3   :  { %v1692_v25 = vmul.f32 0.03125, %v1688_v24 }
 0x7d4   :  { %v1691_v27 = vpop.xlane.xlu0 %1690 }
 0x7d5   :  { %v1694_v28 = vsub.f32 %v1682_v21, %v1692_v25  ;;  %v1693_v29 = vmul.f32 0.03125, %v1691_v27 }
 0x7d7   :  { %v1695_v30 = vsub.f32 %v1683_v26, %v1693_v29  ;;  %v1696_v33 = vmul.f32 %v1694_v28, %v1694_v28  ;;  %v4057_v26 = vld [vmem:[%s5505_s13] ss:$0 sm:$0xff] }
 0x7d9   :  { %v1698_v34 = vsel %vm80_vm0, %v1696_v33, 0.0  ;;  %v1697_v35 = vmul.f32 %v1695_v30, %v1695_v30 }
 0x7da   :  { %1699 = vadd.xlane.f32.xlu0 %v1698_v34 }
 0x7db   :  { %v1701_v31 = vsel %vm80_vm0, %v1697_v35, 0.0 }
 0x7dc   :  { %1702 = vadd.xlane.f32.xlu1 %v1701_v31 }
 0x867   :  { %v1700_v37 = vpop.xlane.xlu0 %1699 }
 0x868   :  { %v1704_v38 = vmul.f32 0.03125, %v1700_v37 }
 0x869   :  { %v1703_v39 = vpop.xlane.xlu1 %1702 }
 0x86a   :  { %v1706_v40 = vadd.f32 1e-12, %v1704_v38  ;;  %v1705_v41 = vmul.f32 0.03125, %v1703_v39 }
 0x86c   :  { %4507 = vrsqrt.f32 %v1706_v40  ;;  %v1707_v42 = vadd.f32 1e-12, %v1705_v41 }
 0x86e   :  { %4509 = vrsqrt.f32 %v1707_v42 }
 0x876   :  { %v4508_v43 = vpop.eup %4507 }
 0x877   :  { %v1710_v45 = vmul.f32 %v4508_v43, %v1694_v28 }
 0x878   :  { %v4510_v46 = vpop.eup %4509 }
 0x879   :  { %v1718_v47 = vmul.f32 %v4051_v44, %v1710_v45  ;;  %v1711_v48 = vmul.f32 %v4510_v46, %v1695_v30  ;;  %v4458_v45 = vld [vmem:[%s5544_s2 + $0x18] sm:$0xff]  }
 0x87b   :  { %v1719_v50 = vmul.f32 %v4051_v44, %v1711_v48  ;;  %v1726_v51 = vadd.f32 %v4052_v49, %v1718_v47  ;;  %v4457_v44 = vld [vmem:[%s5544_s2 + $0x10] sm:$0xff]   ;;  %s5555_s2 = smov 48  }
 0x87d   :  { %v1727_v52 = vadd.f32 %v4052_v49, %v1719_v50 }
 0x87f   :  { %v1728_v53 = vpack.c.bf16 %v1727_v52, %v1726_v51 }
 0x881   :  { %4273 = vmatmul.mubr.msk.bf16.vlgmr.msra.gmra.mrb[20].mxu0 %vm80_vm0, %v1728_v53  ;;  %v4063_v53 = vld [vmem:[%s5508_s16] ss:$0 sm:$0xff] }
 0x882   :  { %4292 = vmatprep.mubr.msk.bf16.mxu0 %vm4624_vm1, %v4623_v15  ;;  %4289 = vmatpush3.bf16.msra.mxu0 %v4457_v44 }
 0x883   :  { %4290 = vmatprep.subr.bf16.mxu0 %v4623_v15 }
 0x886   :  { %4291 = vmatpush3.bf16.msra.mxu0 %v4458_v45 }
 0x887   :  { %4296 = vmatprep.subr.bf16.mxu0 %v4623_v15 }
 0x954   :  { %v1789_v59 = vpop.f32.mrb[20].mxu0 }
 0x955   :  { %v1790_v61 = vadd.f32 %v4053_v58, %v1789_v59  ;;  %v4274_v62 = vpop.f32.mrb[21].mxu0 }
 0x956   :  { %v1792_v63 = vpop.f32.mrb[22].mxu0 }
 0x957   :  { %v1796_v0 = vmul.f32 %v1790_v61, %v1790_v61  ;;  %v1793_v1 = vadd.f32 %v4053_v58, %v1792_v63  ;;  %v4275_v2 = vpop.f32.mrb[23].mxu0  ;;  %v4064_v58 = vld [vmem:[%s5509_s17] ss:$0 sm:$0xff] }
 0x959   :  { %v1798_v3 = vmul.f32 %v1796_v0, %v1790_v61  ;;  %v1797_v5 = vmul.f32 %v1793_v1, %v1793_v1  ;;  %v4070_v0 = vld [vmem:[%s5547_s25 + $0x1] ss:$0 sm:$0xff]  ;;  %s5551_s25 = smov 80  }
 0x95b   :  { %v1800_v6 = vmul.f32 0.044715, %v1798_v3  ;;  %v1799_v7 = vmul.f32 %v1797_v5, %v1793_v1 }
 0x95d   :  { %v1802_v8 = vadd.f32 %v1800_v6, %v1790_v61  ;;  %v1801_v9 = vmul.f32 0.044715, %v1799_v7 }
 0x95f   :  { %v1804_v10 = vmul.f32 0.7978846, %v1802_v8  ;;  %v1803_v11 = vadd.f32 %v1801_v9, %v1793_v1 }
 0x961   :  { %4511 = vtanh.f32 %v1804_v10  ;;  %v1805_v12 = vmul.f32 0.7978846, %v1803_v11 }
 0x963   :  { %4513 = vtanh.f32 %v1805_v12 }
 0x96b   :  { %v4512_v16 = vpop.eup %4511 }
 0x96c   :  { %v1808_v17 = vadd.f32 1.0, %v4512_v16 }
 0x96d   :  { %v4514_v18 = vpop.eup %4513 }
 0x96e   :  { %v1810_v19 = vmul.f32 0.5, %v1808_v17  ;;  %v1809_v4 = vadd.f32 1.0, %v4514_v18 }
 0x970   :  { %v1811_v13 = vmul.f32 0.5, %v1809_v4  ;;  %v1812_v20 = vmul.f32 %v1810_v19, %v1790_v61 }
 0x972   :  { %v1813_v21 = vmul.f32 %v1811_v13, %v1793_v1 }
 0x974   :  { %v1814_v22 = vpack.c.bf16 %v1813_v21, %v1812_v20 }
 0x976   :  { %4285 = vmatmul.mubr.msk.bf16.vlgmr.msra.gmra.mrb[20].mxu1 %vm1854_vm5, %v1814_v22 }
 0x977   :  { %4304 = vmatprep.mubr.msk.bf16.mxu1 %vm4624_vm1, %v4623_v15 }
 0xa49   :  { %v1892_v23 = vpop.f32.mrb[20].mxu1 }
 0xa4a   :  { %v1893_v24 = vadd.f32 %v4057_v26, %v1892_v23  ;;  %v4286_v25 = vpop.f32.mrb[21].mxu1 }
 0xa4b   :  { %v1895_v27 = vpop.f32.mrb[22].mxu1 }
 0xa4c   :  { %v1896_v28 = vadd.f32 %v4057_v26, %v1895_v27  ;;  %v4287_v29 = vpop.f32.mrb[23].mxu1  ;;  %v1899_v30 = vadd.f32 %v1893_v24, %v1726_v51 }
 0xa4e   :  { %v1903_v33 = vsel %vm80_vm0, %v1899_v30, 0.0  ;;  %v1900_v34 = vadd.f32 %v1896_v28, %v1727_v52 }
 0xa4f   :  { %1904 = vadd.xlane.f32.xlu0 %v1903_v33 }
 0xa50   :  { %v1906_v35 = vsel %vm80_vm0, %v1900_v34, 0.0 }
 0xa51   :  { %1907 = vadd.xlane.f32.xlu1 %v1906_v35 }
 0xadc   :  { %v1905_v31 = vpop.xlane.xlu0 %1904 }
 0xadd   :  { %v1909_v32 = vmul.f32 0.03125, %v1905_v31 }
 0xade   :  { %v1908_v36 = vpop.xlane.xlu1 %1907 }
 0xadf   :  { %v1911_v37 = vsub.f32 %v1899_v30, %v1909_v32  ;;  %v1910_v38 = vmul.f32 0.03125, %v1908_v36 }
 0xae1   :  { %v1912_v39 = vsub.f32 %v1900_v34, %v1910_v38  ;;  %v1913_v40 = vmul.f32 %v1911_v37, %v1911_v37 }
 0xae3   :  { %v1915_v41 = vsel %vm80_vm0, %v1913_v40, 0.0  ;;  %v1914_v42 = vmul.f32 %v1912_v39, %v1912_v39 }
 0xae4   :  { %1916 = vadd.xlane.f32.xlu0 %v1915_v41 }
 0xae5   :  { %v1918_v43 = vsel %vm80_vm0, %v1914_v42, 0.0 }
 0xae6   :  { %1919 = vadd.xlane.f32.xlu1 %v1918_v43 }
 0xb71   :  { %v1917_v46 = vpop.xlane.xlu0 %1916 }
 0xb72   :  { %v1921_v47 = vmul.f32 0.03125, %v1917_v46 }
 0xb73   :  { %v1920_v48 = vpop.xlane.xlu1 %1919 }
 0xb74   :  { %v1923_v49 = vadd.f32 1e-12, %v1921_v47  ;;  %v1922_v50 = vmul.f32 0.03125, %v1920_v48 }
 0xb76   :  { %4515 = vrsqrt.f32 %v1923_v49  ;;  %v1924_v51 = vadd.f32 1e-12, %v1922_v50 }
 0xb78   :  { %4517 = vrsqrt.f32 %v1924_v51 }
 0xb80   :  { %v4516_v52 = vpop.eup %4515 }
 0xb81   :  { %v1927_v54 = vmul.f32 %v4516_v52, %v1911_v37 }
 0xb82   :  { %v4518_v55 = vpop.eup %4517 }
 0xb83   :  { %v1935_v56 = vmul.f32 %v4063_v53, %v1927_v54  ;;  %v1928_v57 = vmul.f32 %v4518_v55, %v1912_v39 }
 0xb85   :  { %v1936_v59 = vmul.f32 %v4063_v53, %v1928_v57  ;;  %v5125_v61 = vadd.f32 %v4064_v58, %v1935_v56 }
 0xb87   :  { %v5127_v62 = vadd.f32 %v4064_v58, %v1936_v59 }
 0xb89   :  { %v1945_v63 = vpack.c.bf16 %v5127_v62, %v5125_v61 }
 0xb8b   :  { %4293 = vmatmul.mubr.msk.bf16.vlgmr.msra.gmra.mrb[24].mxu0 %vm80_vm0, %v1945_v63 }
 0xb8c   :  { %4298 = vmatprep.mubr.msk.bf16.mxu0 %vm4624_vm1, %v4623_v15 }
 0xc5e   :  { %v2008_v1 = vpop.f32.mrb[24].mxu0 }
 0xc5f   :  { %v4294_v2 = vpop.f32.mrb[25].mxu0  ;;  %v2009_v5 = vadd.f32 %v4070_v0, %v2008_v1 }
 0xc60   :  { %v2011_v3 = vpop.f32.mrb[26].mxu0 }
 0xc61   :  { %v2012_v6 = vadd.f32 %v4070_v0, %v2011_v3  ;;  %v4295_v7 = vpop.f32.mrb[27].mxu0 }
 0xc63   :  { %v2015_v8 = vpack.c.bf16 %v2012_v6, %v2009_v5 }
 0xc65   :  { %2020 = vrot.lane.b32.xlu1 %v2015_v8, %s4625_s5  ;;  %2017 = vrot.lane.b32.xlu0 %v2015_v8, %s4626_s1  ;;  %s5556_s5 = smov 24   ;;  %s5557_s1 = smov 32  }
 0xc69   :  { %2023 = vrot.lane.b32.xlu1 %v2015_v8, %s4627_s26  ;;  %2029 = vrot.lane.b32.xlu0 %v2015_v8, %s4628_s6  ;;  %s5558_s26 = smov 8   ;;  %s5559_s6 = smov 16  }
 0xc6d   :  { %2026 = vrot.lane.b32.xlu1 %v2015_v8, %s5549_s24  ;;  %2035 = vrot.lane.b32.xlu0 %v2015_v8, %s5550_s7 }
 0xc71   :  { %2032 = vrot.lane.b32.xlu1 %v2015_v8, %s5551_s25  ;;  %2041 = vrot.lane.b32.xlu0 %v2015_v8, %s5552_s28  ;;  %s4642_s25 = smov [#allocation4]  }
 0xc72   :  { %s4017_s28 = sshll.u32 %s4642_s25, 4  ;;  %s4018_s28 = int_to_ptr.vmem [resolvable:$true] %s4017_s28 }
 0xc73   :  { %p4580_p1 = scmp.lt.s32.totalorder %s4018_s28, %s4018_s28 }
 0xc75   :  { %2038 = vrot.lane.b32.xlu1 %v2015_v8, %s5553_s3  ;;  %2047 = vrot.lane.b32.xlu0 %v2015_v8, %s5554_s29 }
 0xc79   :  { %2044 = vrot.lane.b32.xlu1 %v2015_v8, %s5555_s2  ;;  %2053 = vrot.lane.b32.xlu0 %v2015_v8, %s5556_s5 }
 0xc7d   :  { %2050 = vrot.lane.b32.xlu1 %v2015_v8, %s5557_s1  ;;  %2059 = vrot.lane.b32.xlu0 %v2015_v8, %s5558_s26 }
 0xc81   :  { %2056 = vrot.lane.b32.xlu1 %v2015_v8, %s5559_s6 }
 0xcd7   :  { %v2021_v9 = vpop.permute.xlu1 %2020  ;;  %v2018_v10 = vpop.permute.xlu0 %2017 }
 0xcdb   :  { %v2024_v11 = vpop.permute.xlu1 %2023  ;;  %v2030_v12 = vpop.permute.xlu0 %2029 }
 0xcdc   :  { %v2198_v21 = vcombine.low %v2018_v10, %v2030_v12  ;;  %v2199_v27 = vcombine.high %v2018_v10, %v2030_v12 }
 0xcde   :  { %v2206_v28 = vrot.slane %v2198_v21, %v4840_v60  ;;  %v2213_v39 = vrot.slane %v2199_v27, %v4840_v60 }
 0xcdf   :  { %v2027_v16 = vpop.permute.xlu1 %2026  ;;  %v2036_v17 = vpop.permute.xlu0 %2035 }
 0xce0   :  { %v2214_v4 = vcombine.low %v2024_v11, %v2036_v17  ;;  %v2215_v22 = vcombine.high %v2024_v11, %v2036_v17  ;;  %v2062_v29 = vcombine.low %v2015_v8, %v2027_v16  ;;  %v2063_v30 = vcombine.high %v2015_v8, %v2027_v16 }
 0xce2   :  { %v2222_v26 = vrot.slane %v2214_v4, %v4840_v60  ;;  %v2229_v31 = vrot.slane %v2215_v22, %v4840_v60  ;;  %v2070_v42 = vrot.slane %v2062_v29, %v4840_v60  ;;  %v2077_v43 = vrot.slane %v2063_v30, %v4840_v60 }
 0xce3   :  { %v2033_v18 = vpop.permute.xlu1 %2032  ;;  %v2042_v19 = vpop.permute.xlu0 %2041 }
 0xce4   :  { %v2078_v23 = vcombine.low %v2021_v9, %v2033_v18  ;;  %v2079_v33 = vcombine.high %v2021_v9, %v2033_v18  ;;  %v2262_v32 = vcombine.low %v2206_v28, %v2222_v26  ;;  %v2263_v44 = vcombine.high %v2206_v28, %v2222_v26 }
 0xce5   :  { %v2278_v51 = vcombine.low %v2213_v39, %v2229_v31  ;;  %v2279_v52 = vcombine.high %v2213_v39, %v2229_v31 }
 0xce6   :  { %v2086_v36 = vrot.slane %v2078_v23, %v4840_v60  ;;  %v2093_v45 = vrot.slane %v2079_v33, %v4840_v60  ;;  %v2270_v50 = vrot.slane %v2262_v32, %v4847_v14  ;;  %v2277_v7 = vrot.slane %v2263_v44, %v4847_v14 }
 0xce7   :  { %v5152_v13 = vpop.permute.xlu1 %2038  ;;  %v2048_v20 = vpop.permute.xlu0 %2047  ;;  %v2286_v8 = vrot.slane %v2278_v51, %v4847_v14  ;;  %v2293_v11 = vrot.slane %v2279_v52, %v4847_v14 }
 0xce8   :  { %v2126_v53 = vcombine.low %v2070_v42, %v2086_v36  ;;  %v2127_v55 = vcombine.high %v2070_v42, %v2086_v36  ;;  %v2142_v59 = vcombine.low %v2077_v43, %v2093_v45  ;;  %v2143_v2 = vcombine.high %v2077_v43, %v2093_v45 }
 0xcea   :  { %v2134_v12 = vrot.slane %v2126_v53, %v4847_v14  ;;  %v2141_v18 = vrot.slane %v2127_v55, %v4847_v14  ;;  %v2157_v21 = vrot.slane %v2143_v2, %v4847_v14 }
 0xceb   :  { %v2045_v24 = vpop.permute.xlu1 %2044  ;;  %v2054_v25 = vpop.permute.xlu0 %2053 }
 0xcec   :  { %v2230_v34 = vcombine.low %v2042_v19, %v2054_v25  ;;  %v2231_v35 = vcombine.high %v2042_v19, %v2054_v25 }
 0xcee   :  { %v2238_v46 = vrot.slane %v2230_v34, %v4840_v60  ;;  %v2245_v47 = vrot.slane %v2231_v35, %v4840_v60 }
 0xcef   :  { %v2051_v37 = vpop.permute.xlu1 %2050  ;;  %v2060_v38 = vpop.permute.xlu0 %2059 }
 0xcf0   :  { %v2246_v40 = vcombine.low %v2048_v20, %v2060_v38  ;;  %v2247_v41 = vcombine.high %v2048_v20, %v2060_v38  ;;  %v2094_v3 = vcombine.low %v5152_v13, %v2051_v37  ;;  %v2095_v5 = vcombine.high %v5152_v13, %v2051_v37 }
 0xcf1   :  { %v2150_v20 = vrot.slane %v2142_v59, %v4847_v14 }
 0xcf2   :  { %v2254_v48 = vrot.slane %v2246_v40, %v4840_v60  ;;  %v2261_v49 = vrot.slane %v2247_v41, %v4840_v60  ;;  %v2102_v22 = vrot.slane %v2094_v3, %v4840_v60  ;;  %v2109_v26 = vrot.slane %v2095_v5, %v4840_v60 }
 0xcf3   :  { %v2057_v54 = vpop.permute.xlu1 %2056 }
 0xcf4   :  { %v2294_v56 = vcombine.low %v2238_v46, %v2254_v48  ;;  %v2295_v57 = vcombine.high %v2238_v46, %v2254_v48  ;;  %v2310_v58 = vcombine.low %v2245_v47, %v2261_v49  ;;  %v2311_v63 = vcombine.high %v2245_v47, %v2261_v49 }
 0xcf5   :  { %v2110_v0 = vcombine.low %v2045_v24, %v2057_v54  ;;  %v2111_v1 = vcombine.high %v2045_v24, %v2057_v54 }
 0xcf6   :  { %v2302_v6 = vrot.slane %v2294_v56, %v4847_v14  ;;  %v2309_v9 = vrot.slane %v2295_v57, %v4847_v14  ;;  %v2318_v10 = vrot.slane %v2310_v58, %v4847_v14  ;;  %v2325_v19 = vrot.slane %v2311_v63, %v4847_v14 }
 0xcf7   :  { %v2118_v16 = vrot.slane %v2110_v0, %v4840_v60  ;;  %v2125_v17 = vrot.slane %v2111_v1, %v4840_v60 }
 0xcf8   :  { %v2326_v4 = vcombine.low %v2270_v50, %v2302_v6  ;;  %v2327_v13 = vcombine.high %v2270_v50, %v2302_v6  ;;  %v2328_v23 = vcombine.low %v2277_v7, %v2309_v9  ;;  %v2329_v24 = vcombine.high %v2277_v7, %v2309_v9 }
 0xcf9   :  { %v2330_v25 = vcombine.low %v2286_v8, %v2318_v10  ;;  %v2331_v27 = vcombine.high %v2286_v8, %v2318_v10  ;;  %v2158_v28 = vcombine.low %v2102_v22, %v2118_v16  ;;  %v2159_v29 = vcombine.high %v2102_v22, %v2118_v16 }
 0xcfa   :  { %v2174_v30 = vcombine.low %v2109_v26, %v2125_v17  ;;  %v2175_v33 = vcombine.high %v2109_v26, %v2125_v17  ;;  %v2332_v34 = vcombine.low %v2293_v11, %v2325_v19  ;;  %v2333_v35 = vcombine.high %v2293_v11, %v2325_v19 }
 0xcfb   :  { %v2339_v31 = vshrl.u32 %v2326_v4, 16  ;;  %v2347_v32 = vshrl.u32 %v2327_v13, 16  ;;  %v2166_v36 = vrot.slane %v2158_v28, %v4847_v14  ;;  %v2173_v37 = vrot.slane %v2159_v29, %v4847_v14 }
 0xcfc   :  { %v2182_v38 = vrot.slane %v2174_v30, %v4847_v14  ;;  %v2189_v39 = vrot.slane %v2175_v33, %v4847_v14  ;;  %v2355_v40 = vshrl.u32 %v2328_v23, 16  ;;  %v2363_v41 = vshrl.u32 %v2329_v24, 16 }
 0xcfd   :  { %v2371_v42 = vshrl.u32 %v2330_v25, 16  ;;  %v2379_v43 = vshrl.u32 %v2331_v27, 16  ;;  %v2190_v44 = vcombine.low %v2134_v12, %v2166_v36  ;;  %v2191_v45 = vcombine.high %v2134_v12, %v2166_v36 }
 0xcfe   :  { %v2192_v46 = vcombine.low %v2141_v18, %v2173_v37  ;;  %v2193_v47 = vcombine.high %v2141_v18, %v2173_v37  ;;  %v2387_v48 = vshrl.u32 %v2332_v34, 16  ;;  %v2395_v49 = vshrl.u32 %v2333_v35, 16 }
 0xcff   :  { %v2194_v50 = vcombine.low %v2150_v20, %v2182_v38  ;;  %v2195_v51 = vcombine.high %v2150_v20, %v2182_v38  ;;  %v2196_v52 = vcombine.low %v2157_v21, %v2189_v39  ;;  %v2197_v53 = vcombine.high %v2157_v21, %v2189_v39 }
 0xd00   :  { %v2338_v54 = vshrl.u32 %v2190_v44, 16  ;;  %v2346_v55 = vshrl.u32 %v2191_v45, 16  ;;  %v2336_v56 = vpack.i.b16 %v2326_v4, %v2190_v44  ;;  %v2352_v57 = vpack.i.b16 %v2328_v23, %v2192_v46 }
 0xd01   :  { %v2354_v58 = vshrl.u32 %v2192_v46, 16  ;;  %v2362_v59 = vshrl.u32 %v2193_v47, 16  ;;  %v2344_v63 = vpack.i.b16 %v2327_v13, %v2191_v45  ;;  %v2360_v0 = vpack.i.b16 %v2329_v24, %v2193_v47 }
 0xd02   :  { %v2368_v1 = vpack.i.b16 %v2330_v25, %v2194_v50  ;;  %v2370_v2 = vshrl.u32 %v2194_v50, 16  ;;  %v5188_v3 = vpack.i.b16 %v2339_v31, %v2338_v54  ;;  %v5190_v5 = vpack.i.b16 %v2347_v32, %v2346_v55 }
 0xd03   :  { %v2376_v6 = vpack.i.b16 %v2331_v27, %v2195_v51  ;;  %v2378_v7 = vshrl.u32 %v2195_v51, 16  ;;  %v5192_v8 = vpack.i.b16 %v2355_v40, %v2354_v58  ;;  %v2384_v9 = vpack.i.b16 %v2332_v34, %v2196_v52 }
 0xd04   :  { %v2386_v10 = vshrl.u32 %v2196_v52, 16  ;;  %v2392_v11 = vpack.i.b16 %v2333_v35, %v2197_v53  ;;  %v5194_v12 = vpack.i.b16 %v2363_v41, %v2362_v59  ;;  %v5196_v16 = vpack.i.b16 %v2371_v42, %v2370_v2 }
 0xd05   :  { %v2394_v17 = vshrl.u32 %v2197_v53, 16  ;;  %v2398_v18 = vcombine.low %v2336_v56, %v2352_v57  ;;  %v5198_v19 = vpack.i.b16 %v2379_v43, %v2378_v7  ;;  %v2414_v13 = vcombine.low %v2344_v63, %v2360_v0 }
 0xd06   :  { %v5200_v4 = vpack.i.b16 %v2387_v48, %v2386_v10  ;;  %v2430_v20 = vcombine.low %v2368_v1, %v2384_v9  ;;  %v2446_v22 = vcombine.low %v2376_v6, %v2392_v11  ;;  %v2516_v27 = vcombine.low %v5188_v3, %v5192_v8 }
 0xd07   :  { %v5202_v21 = vpack.i.b16 %v2395_v49, %v2394_v17  ;;  %v2406_v26 = vrot.slane %v2398_v18, %v4840_v60  ;;  %v2422_v23 = vrot.slane %v2414_v13, %v4840_v60  ;;  %v2532_v28 = vcombine.low %v5190_v5, %v5194_v12 }
 0xd08   :  { %v2438_v24 = vrot.slane %v2430_v20, %v4840_v60  ;;  %v2454_v25 = vrot.slane %v2446_v22, %v4840_v60  ;;  %v2548_v29 = vcombine.low %v5196_v16, %v5200_v4  ;;  %v2399_v33 = vcombine.high %v2336_v56, %v2352_v57 }
 0xd09   :  { %v2564_v30 = vcombine.low %v5198_v19, %v5202_v21  ;;  %v2463_v34 = vcombine.high %v2406_v26, %v2422_v23  ;;  %v2524_v31 = vrot.slane %v2516_v27, %v4840_v60  ;;  %v2540_v32 = vrot.slane %v2532_v28, %v4840_v60 }
 0xd0a   :  { %v2487_v35 = vcombine.high %v2438_v24, %v2454_v25  ;;  %v2556_v36 = vrot.slane %v2548_v29, %v4840_v60  ;;  %v2462_v38 = vcombine.low %v2406_v26, %v2422_v23  ;;  %v2486_v40 = vcombine.low %v2438_v24, %v2454_v25 }
 0xd0b   :  { %v2572_v37 = vrot.slane %v2564_v30, %v4840_v60  ;;  %v2477_v39 = vrot.slane %v2463_v34, %v4847_v14  ;;  %v2580_v42 = vcombine.low %v2524_v31, %v2540_v32  ;;  %v2581_v43 = vcombine.high %v2524_v31, %v2540_v32 }
 0xd0c   :  { %v2501_v41 = vrot.slane %v2487_v35, %v4847_v14  ;;  %v2415_v46 = vcombine.high %v2344_v63, %v2360_v0  ;;  %v2431_v47 = vcombine.high %v2368_v1, %v2384_v9  ;;  %v2447_v48 = vcombine.high %v2376_v6, %v2392_v11 }
 0xd0d   :  { %v2604_v44 = vcombine.low %v2556_v36, %v2572_v37  ;;  %v2605_v45 = vcombine.high %v2556_v36, %v2572_v37  ;;  %v2517_v49 = vcombine.high %v5188_v3, %v5192_v8  ;;  %v2595_v51 = vrot.slane %v2581_v43, %v4847_v14 }
 0xd0e   :  { %v2512_v50 = vcombine.low %v2477_v39, %v2501_v41  ;;  %v2533_v53 = vcombine.high %v5190_v5, %v5194_v12  ;;  %v2549_v54 = vcombine.high %v5196_v16, %v5200_v4  ;;  %v2470_v55 = vrot.slane %v2462_v38, %v4847_v14 }
 0xd0f   :  { %v2619_v52 = vrot.slane %v2605_v45, %v4847_v14  ;;  %v2413_v56 = vrot.slane %v2399_v33, %v4840_v60  ;;  %v2494_v58 = vrot.slane %v2486_v40, %v4847_v14  ;;  %v2588_v59 = vrot.slane %v2580_v42, %v4847_v14 }
 0xd10   :  { %v2612_v63 = vrot.slane %v2604_v44, %v4847_v14  ;;  %v2429_v1 = vrot.slane %v2415_v46, %v4840_v60  ;;  %v2445_v2 = vrot.slane %v2431_v47, %v4840_v60  ;;  %v2461_v3 = vrot.slane %v2447_v48, %v4840_v60 }
 0xd11   :  { %v2630_v57 = vcombine.low %v2595_v51, %v2619_v52  ;;  %v2631_v0 = vcombine.high %v2595_v51, %v2619_v52  ;;  %v2565_v5 = vcombine.high %v5198_v19, %v5202_v21  ;;  %v2649_v7 = vshrl.u32 %v2512_v50, 16 }
 0xd12   :  { %v2513_v9 = vcombine.high %v2477_v39, %v2501_v41  ;;  %v2478_v10 = vcombine.low %v2413_v56, %v2429_v1  ;;  %v2531_v11 = vrot.slane %v2517_v49, %v4840_v60  ;;  %v2628_v17 = vcombine.low %v2588_v59, %v2612_v63  ;;  %v4574_v1 = vld [vmem:[%s5548_s0 + $0x8] sm:$0xff] }
 0xd13   :  { %v2648_v6 = vpack.i.b16 %v2630_v57, %v2512_v50  ;;  %v2650_v8 = vshrl.u32 %v2630_v57, 16  ;;  %v2502_v18 = vcombine.low %v2445_v2, %v2461_v3  ;;  %v2510_v4 = vcombine.low %v2470_v55, %v2494_v58  ;;  %v4573_v57 = vld [vmem:[%s5548_s0] sm:$0xff] }
 0xd14   :  { %v2656_v13 = vshrl.u32 %v2631_v0, 16  ;;  %v2485_v20 = vrot.slane %v2478_v10, %v4847_v14  ;;  %v2547_v22 = vrot.slane %v2533_v53, %v4840_v60  ;;  %v2563_v26 = vrot.slane %v2549_v54, %v4840_v60 }
 0xd15   :  { %v2678_v12 = vsel %vm853_vm2, %v2648_v6, 0  ;;  %v2651_v16 = vpack.i.b16 %v2650_v8, %v2649_v7  ;;  %v2509_v21 = vrot.slane %v2502_v18, %v4847_v14  ;;  %v2579_v23 = vrot.slane %v2565_v5, %v4840_v60 }
 0xd16   :  { %4297 = vmatpush3.bf16.xpose.msra.mxu0 %v2678_v12  ;;  %v2655_v24 = vshrl.u32 %v2513_v9, 16  ;;  %v2596_v25 = vcombine.low %v2531_v11, %v2547_v22  ;;  %v2654_v27 = vpack.i.b16 %v2631_v0, %v2513_v9  ;;  %v2638_v28 = vshrl.u32 %v2628_v17, 16 }
 0xd17   :  { %v2725_v19 = vsel %vm853_vm2, %v2651_v16, 0  ;;  %4308 = vmatprep.subr.bf16.mxu0 %v4623_v15  ;;  %v2620_v29 = vcombine.low %v2563_v26, %v2579_v23  ;;  %v5250_v30 = vcombine.high %v2485_v20, %v2509_v21  ;;  %v2636_v34 = vpack.i.b16 %v2628_v17, %v2510_v4 }
 0xd18   :  { %4303 = vmatpush3.bf16.xpose.msra.mxu1 %v2725_v19  ;;  %v2603_v33 = vrot.slane %v2596_v25, %v4847_v14  ;;  %v2637_v35 = vshrl.u32 %v2510_v4, 16  ;;  %v2657_v31 = vpack.i.b16 %v2656_v13, %v2655_v24  ;;  %v2772_v36 = vsel %vm853_vm2, %v2654_v27, 0 }
 0xd19   :  { %4314 = vmatprep.subr.bf16.mxu1 %v4623_v15  ;;  %v2627_v32 = vrot.slane %v2620_v29, %v4847_v14  ;;  %v2629_v38 = vcombine.high %v2588_v59, %v2612_v63  ;;  %v2511_v40 = vcombine.high %v2470_v55, %v2494_v58  ;;  %v2670_v44 = vshrl.u32 %v5250_v30, 16 }
 0xd1a   :  { %v2639_v37 = vpack.i.b16 %v2638_v28, %v2637_v35  ;;  %v2819_v42 = vsel %vm853_vm2, %v2657_v31, 0  ;;  %v2514_v46 = vcombine.low %v2485_v20, %v2509_v21 }
 0xd1b   :  { %v5256_v39 = vcombine.high %v2603_v33, %v2627_v32  ;;  %v2632_v41 = vcombine.low %v2603_v33, %v2627_v32  ;;  %v2644_v47 = vshrl.u32 %v2629_v38, 16  ;;  %v2642_v50 = vpack.i.b16 %v2629_v38, %v2511_v40 }
 0xd1c   :  { %v2643_v51 = vshrl.u32 %v2511_v40, 16  ;;  %v2662_v53 = vshrl.u32 %v2514_v46, 16 }
 0xd1d   :  { %4299 = vmatmul.mubr.msk.bf16.vlgmr.msra.gmra.mrb[28].mxu0 %vm853_vm2, %v2636_v34  ;;  %v2668_v43 = vpack.i.b16 %v5256_v39, %v5250_v30  ;;  %v2671_v45 = vshrl.u32 %v5256_v39, 16  ;;  %v2663_v49 = vshrl.u32 %v2632_v41, 16  ;;  %v2660_v52 = vpack.i.b16 %v2632_v41, %v2514_v46 }
 0xd1e   :  { %4309 = vmatpush3.bf16.xpose.msra.mxu0 %v2772_v36  ;;  %4310 = vmatprep.mubr.msk.bf16.mxu0 %vm4624_vm1, %v4623_v15  ;;  %v2645_v54 = vpack.i.b16 %v2644_v47, %v2643_v51 }
 0xd1f   :  { %4305 = vmatmul.mubr.msk.bf16.vlgmr.msra.gmra.mrb[24].mxu1 %vm853_vm2, %v2639_v37  ;;  %4320 = vmatprep.subr.bf16.mxu0 %v4623_v15  ;;  %v5270_v48 = vpack.i.b16 %v2671_v45, %v2670_v44  ;;  %v2664_v55 = vpack.i.b16 %v2663_v49, %v2662_v53 }
 0xd20   :  { %4315 = vmatpush3.bf16.xpose.msra.mxu1 %v2819_v42  ;;  %4316 = vmatprep.mubr.msk.bf16.mxu1 %vm4624_vm1, %v4623_v15 }
 0xd21   :  { %4326 = vmatprep.subr.bf16.mxu1 %v4623_v15 }
 0xd25   :  { %4311 = vmatmul.mubr.msk.bf16.vlgmr.msra.gmra.mrb[32].mxu0 %vm853_vm2, %v2642_v50 }
 0xd26   :  { %4321 = vmatpush3.bf16.msra.mxu0 %v2660_v52  ;;  %4322 = vmatprep.mubr.msk.bf16.mxu0 %vm4624_vm1, %v4623_v15 }
 0xd27   :  { %4317 = vmatmul.mubr.msk.bf16.vlgmr.msra.gmra.mrb[28].mxu1 %vm853_vm2, %v2645_v54  ;;  %4332 = vmatprep.subr.bf16.mxu0 %v4623_v15 }
 0xd28   :  { %4327 = vmatpush3.bf16.msra.mxu1 %v2664_v55  ;;  %4328 = vmatprep.mubr.msk.bf16.mxu1 %vm4624_vm1, %v4623_v15 }
 0xd29   :  { %4338 = vmatprep.subr.bf16.mxu1 %v4623_v15 }
 0xdf0   :  { %v2714_v56 = vpop.f32.mrb[28].mxu0 }
 0xdf1   :  { %v2715_v58 = vadd.f32 %v4573_v57, %v2714_v56  ;;  %v4300_v59 = vpop.f32.mrb[29].mxu0 }
 0xdf2   :  { %v2717_v63 = vpop.f32.mrb[30].mxu0  ;;  %v2761_v0 = vpop.f32.mrb[24].mxu1 }
 0xdf3   :  { %v2718_v2 = vadd.f32 %v4574_v1, %v2717_v63  ;;  %v4301_v3 = vpop.f32.mrb[31].mxu0  ;;  %v4306_v5 = vpop.f32.mrb[25].mxu1  ;;  %v2862_v6 = vsel %vm1042_vm3, %v2715_v58, -inf  ;;  %v2762_v8 = vadd.f32 %v4573_v57, %v2761_v0 }
 0xdf4   :  { %v2764_v7 = vpop.f32.mrb[26].mxu1  ;;  %2863 = vmax.xlane.f32.xlu1 %v2862_v6 }
 0xdf5   :  { %v4307_v9 = vpop.f32.mrb[27].mxu1  ;;  %v2865_v10 = vsel %vm1042_vm3, %v2718_v2, -inf  ;;  %v2765_v12 = vadd.f32 %v4574_v1, %v2764_v7  ;;  %v2868_v18 = vsel %vm1042_vm3, %v2762_v8, -inf }
 0xdf6   :  { %2866 = vmax.xlane.f32.xlu0 %v2865_v10 }
 0xdf7   :  { %v2871_v25 = vsel %vm1042_vm3, %v2765_v12, -inf }
 0xdf8   :  { %v2808_v11 = vpop.f32.mrb[32].mxu0 }
 0xdf9   :  { %v2809_v16 = vadd.f32 %v4573_v57, %v2808_v11  ;;  %v4312_v17 = vpop.f32.mrb[33].mxu0 }
 0xdfa   :  { %v2855_v4 = vpop.f32.mrb[28].mxu1  ;;  %2869 = vmax.xlane.f32.xlu0 %v2868_v18  ;;  %v2811_v13 = vpop.f32.mrb[34].mxu0 }
 0xdfb   :  { %v2856_v20 = vadd.f32 %v4573_v57, %v2855_v4  ;;  %v4313_v22 = vpop.f32.mrb[35].mxu0  ;;  %v4318_v19 = vpop.f32.mrb[29].mxu1  ;;  %v2874_v21 = vsel %vm1042_vm3, %v2809_v16, -inf  ;;  %v2812_v23 = vadd.f32 %v4574_v1, %v2811_v13 }
 0xdfc   :  { %v2858_v26 = vpop.f32.mrb[30].mxu1  ;;  %2875 = vmax.xlane.f32.xlu1 %v2874_v21 }
 0xdfd   :  { %v4319_v24 = vpop.f32.mrb[31].mxu1  ;;  %v2880_v27 = vsel %vm1042_vm3, %v2856_v20, -inf  ;;  %v2859_v28 = vadd.f32 %v4574_v1, %v2858_v26  ;;  %v2877_v29 = vsel %vm1042_vm3, %v2812_v23, -inf }
 0xdfe   :  { %2872 = vmax.xlane.f32.xlu0 %v2871_v25 }
 0xdff   :  { %v2883_v33 = vsel %vm1042_vm3, %v2859_v28, -inf }
 0xe00   :  { %2881 = vmax.xlane.f32.xlu1 %v2880_v27 }
 0xe02   :  { %2878 = vmax.xlane.f32.xlu0 %v2877_v29 }
 0xe06   :  { %2884 = vmax.xlane.f32.xlu0 %v2883_v33 }
 0xe81   :  { %v2864_v34 = vpop.xlane.xlu1 %2863 }
 0xe82   :  { %v2886_v35 = vsub.f32 %v2715_v58, %v2864_v34 }
 0xe83   :  { %v2867_v31 = vpop.xlane.xlu0 %2866 }
 0xe84   :  { %v2894_v32 = vmul.f32 1.442695, %v2886_v35  ;;  %v2887_v36 = vsub.f32 %v2718_v2, %v2867_v31 }
 0xe86   :  { %4519 = vpow2.f32 %v2894_v32  ;;  %v2896_v37 = vmul.f32 1.442695, %v2887_v36 }
 0xe87   :  { %v2870_v38 = vpop.xlane.xlu0 %2869 }
 0xe88   :  { %4521 = vpow2.f32 %v2896_v37  ;;  %v2888_v40 = vsub.f32 %v2762_v8, %v2870_v38 }
 0xe89   :  { %v2876_v41 = vpop.xlane.xlu1 %2875 }
 0xe8a   :  { %v2898_v42 = vmul.f32 1.442695, %v2888_v40  ;;  %v2890_v44 = vsub.f32 %v2809_v16, %v2876_v41 }
 0xe8b   :  { %v2873_v45 = vpop.xlane.xlu0 %2872 }
 0xe8c   :  { %4523 = vpow2.f32 %v2898_v42  ;;  %v2902_v46 = vmul.f32 1.442695, %v2890_v44  ;;  %v2889_v47 = vsub.f32 %v2765_v12, %v2873_v45 }
 0xe8d   :  { %v2882_v49 = vpop.xlane.xlu1 %2881 }
 0xe8e   :  { %4525 = vpow2.f32 %v2902_v46  ;;  %v2900_v50 = vmul.f32 1.442695, %v2889_v47  ;;  %v2892_v51 = vsub.f32 %v2856_v20, %v2882_v49 }
 0xe8f   :  { %v2879_v52 = vpop.xlane.xlu0 %2878 }
 0xe90   :  { %v4520_v53 = vpop.eup %4519  ;;  %4527 = vpow2.f32 %v2900_v50  ;;  %v2906_v54 = vmul.f32 1.442695, %v2892_v51  ;;  %v2891_v55 = vsub.f32 %v2812_v23, %v2879_v52 }
 0xe91   :  { %v2910_v56 = vsel %vm1042_vm3, %v4520_v53, 0.0 }
 0xe92   :  { %v4522_v57 = vpop.eup %4521  ;;  %4529 = vpow2.f32 %v2906_v54  ;;  %v2904_v58 = vmul.f32 1.442695, %v2891_v55  ;;  %2911 = vadd.xlane.f32.xlu1 %v2910_v56 }
 0xe93   :  { %v2885_v59 = vpop.xlane.xlu0 %2884  ;;  %v2913_v63 = vsel %vm1042_vm3, %v4522_v57, 0.0 }
 0xe94   :  { %4531 = vpow2.f32 %v2904_v58  ;;  %v2893_v0 = vsub.f32 %v2859_v28, %v2885_v59  ;;  %2914 = vadd.xlane.f32.xlu0 %v2913_v63 }
 0xe96   :  { %v4524_v1 = vpop.eup %4523  ;;  %v2908_v2 = vmul.f32 1.442695, %v2893_v0 }
 0xe97   :  { %v2916_v3 = vsel %vm1042_vm3, %v4524_v1, 0.0 }
 0xe98   :  { %v4526_v5 = vpop.eup %4525  ;;  %4533 = vpow2.f32 %v2908_v2  ;;  %2917 = vadd.xlane.f32.xlu1 %v2916_v3 }
 0xe99   :  { %v2922_v7 = vsel %vm1042_vm3, %v4526_v5, 0.0 }
 0xe9a   :  { %v4528_v6 = vpop.eup %4527 }
 0xe9b   :  { %v2919_v8 = vsel %vm1042_vm3, %v4528_v6, 0.0 }
 0xe9c   :  { %v4530_v9 = vpop.eup %4529  ;;  %2923 = vadd.xlane.f32.xlu1 %v2922_v7  ;;  %2920 = vadd.xlane.f32.xlu0 %v2919_v8 }
 0xe9d   :  { %v2928_v11 = vsel %vm1042_vm3, %v4530_v9, 0.0 }
 0xe9e   :  { %v4532_v10 = vpop.eup %4531 }
 0xe9f   :  { %v2925_v12 = vsel %vm1042_vm3, %v4532_v10, 0.0 }
 0xea0   :  { %2929 = vadd.xlane.f32.xlu1 %v2928_v11  ;;  %2926 = vadd.xlane.f32.xlu0 %v2925_v12 }
 0xea2   :  { %v4534_v16 = vpop.eup %4533 }
 0xea3   :  { %v2931_v17 = vsel %vm1042_vm3, %v4534_v16, 0.0 }
 0xea4   :  { %2932 = vadd.xlane.f32.xlu0 %v2931_v17 }
 0xf1f   :  { %v2912_v18 = vpop.xlane.xlu1 %2911 }
 0xf20   :  { %4535 = vrcp.f32 %v2912_v18 }
 0xf21   :  { %v2915_v4 = vpop.xlane.xlu0 %2914 }
 0xf22   :  { %4537 = vrcp.f32 %v2915_v4 }
 0xf25   :  { %v2918_v13 = vpop.xlane.xlu1 %2917 }
 0xf26   :  { %4539 = vrcp.f32 %v2918_v13 }
 0xf29   :  { %v2924_v20 = vpop.xlane.xlu1 %2923  ;;  %v2921_v22 = vpop.xlane.xlu0 %2920 }
 0xf2a   :  { %v4536_v19 = vpop.eup %4535  ;;  %4541 = vrcp.f32 %v2921_v22 }
 0xf2b   :  { %v2942_v26 = vmul.f32 %v4536_v19, %v4520_v53  ;;  %4543 = vrcp.f32 %v2924_v20 }
 0xf2c   :  { %v4538_v21 = vpop.eup %4537 }
 0xf2d   :  { %v2943_v23 = vmul.f32 %v4538_v21, %v4522_v57  ;;  %v2930_v24 = vpop.xlane.xlu1 %2929  ;;  %v2927_v25 = vpop.xlane.xlu0 %2926 }
 0xf2e   :  { %4545 = vrcp.f32 %v2927_v25 }
 0xf2f   :  { %v2950_v27 = vpack.c.bf16 %v2943_v23, %v2942_v26  ;;  %4547 = vrcp.f32 %v2930_v24 }
 0xf30   :  { %v4540_v29 = vpop.eup %4539 }
 0xf31   :  { %4323 = vmatmul.mubr.msk.bf16.vlgmr.msra.gmra.mrb[36].mxu0 %vm1042_vm3, %v2950_v27  ;;  %v2933_v28 = vpop.xlane.xlu0 %2932  ;;  %v2944_v34 = vmul.f32 %v4540_v29, %v4524_v1 }
 0xf32   :  { %4333 = vmatpush3.bf16.msra.mxu0 %v2668_v43  ;;  %4549 = vrcp.f32 %v2933_v28  ;;  %4334 = vmatprep.mubr.msk.bf16.mxu0 %vm4624_vm1, %v4623_v15 }
 0xf33   :  { %4344 = vmatprep.subr.bf16.mxu0 %v4623_v15 }
 0xf34   :  { %v4542_v33 = vpop.eup %4541 }
 0xf35   :  { %v2945_v35 = vmul.f32 %v4542_v33, %v4528_v6  ;;  %v4544_v31 = vpop.eup %4543 }
 0xf36   :  { %v2946_v38 = vmul.f32 %v4544_v31, %v4526_v5 }
 0xf37   :  { %v2951_v32 = vpack.c.bf16 %v2945_v35, %v2944_v34 }
 0xf38   :  { %v4546_v36 = vpop.eup %4545 }
 0xf39   :  { %v4548_v37 = vpop.eup %4547  ;;  %v2947_v40 = vmul.f32 %v4546_v36, %v4532_v10  ;;  %4329 = vmatmul.mubr.msk.bf16.vlgmr.msra.gmra.mrb[32].mxu1 %vm1042_vm3, %v2951_v32 }
 0xf3a   :  { %4339 = vmatpush3.bf16.msra.mxu1 %v5270_v48  ;;  %4340 = vmatprep.mubr.msk.bf16.mxu1 %vm4624_vm1, %v4623_v15  ;;  %v2948_v43 = vmul.f32 %v4548_v37, %v4530_v9 }
 0xf3b   :  { %v2952_v39 = vpack.c.bf16 %v2947_v40, %v2946_v38  ;;  %4352 = vmatprep.subr.bf16.mxu1 %v4623_v15 }
 0xf3c   :  { %v4550_v30 = vpop.eup %4549 }
 0xf3d   :  { %v2949_v41 = vmul.f32 %v4550_v30, %v4534_v16  ;;  %4335 = vmatmul.mubr.msk.bf16.vlgmr.msra.gmra.mrb[40].mxu0 %vm1042_vm3, %v2952_v39 }
 0xf3e   :  { %4348 = vmatprep.mubr.msk.bf16.mxu0 %vm4624_vm1, %v4623_v15 }
 0xf3f   :  { %v2953_v42 = vpack.c.bf16 %v2949_v41, %v2948_v43 }
 0xf41   :  { %4341 = vmatmul.mubr.msk.bf16.vlgmr.msra.gmra.mrb[36].mxu1 %vm1042_vm3, %v2953_v42 }
 0xf42   :  { %4356 = vmatprep.mubr.msk.bf16.mxu1 %vm4624_vm1, %v4623_v15 }
0x1004   :  { %v2991_v48 = vpop.f32.mrb[36].mxu0 }
0x1005   :  { %v4324_v44 = vpop.f32.mrb[37].mxu0 }
0x1006   :  { %v2994_v45 = vpop.f32.mrb[38].mxu0 }
0x1007   :  { %v4325_v46 = vpop.f32.mrb[39].mxu0 }
0x100c   :  { %v3035_v47 = vpop.f32.mrb[32].mxu1 }
0x100d   :  { %v4330_v49 = vpop.f32.mrb[33].mxu1 }
0x100e   :  { %v3038_v50 = vpop.f32.mrb[34].mxu1  ;;  %v4459_v49 = vld [vmem:[%s5500_s8 + $0x10] sm:$0xff]  }
0x100f   :  { %v4331_v51 = vpop.f32.mrb[35].mxu1  ;;  %4345 = vmatpush3.bf16.msra.mxu0 %v4459_v49 }
0x1010   :  { %v3079_v52 = vpop.f32.mrb[40].mxu0  ;;  %4346 = vmatprep.subr.bf16.mxu0 %v4623_v15 }
0x1011   :  { %v3130_v53 = vcombine.low %v2991_v48, %v3079_v52  ;;  %v3131_v54 = vcombine.high %v2991_v48, %v3079_v52  ;;  %v4336_v55 = vpop.f32.mrb[41].mxu0 }
0x1012   :  { %v3082_v56 = vpop.f32.mrb[42].mxu0 }
0x1013   :  { %v3198_v57 = vcombine.low %v2994_v45, %v3082_v56  ;;  %v3199_v58 = vcombine.high %v2994_v45, %v3082_v56  ;;  %v4337_v59 = vpop.f32.mrb[43].mxu0  ;;  %v3138_v3 = vrot.slane %v3130_v53, %v4840_v60  ;;  %v3145_v5 = vrot.slane %v3131_v54, %v4840_v60 }
0x1014   :  { %v3123_v63 = vpop.f32.mrb[36].mxu1 }
0x1015   :  { %v3146_v0 = vcombine.low %v3035_v47, %v3123_v63  ;;  %v3147_v1 = vcombine.high %v3035_v47, %v3123_v63  ;;  %v4342_v2 = vpop.f32.mrb[37].mxu1  ;;  %v3206_v4 = vrot.slane %v3198_v57, %v4840_v60  ;;  %v3213_v13 = vrot.slane %v3199_v58, %v4840_v60 }
0x1016   :  { %v3126_v6 = vpop.f32.mrb[38].mxu1 }
0x1017   :  { %v3154_v7 = vrot.slane %v3146_v0, %v4840_v60  ;;  %v3161_v8 = vrot.slane %v3147_v1, %v4840_v60  ;;  %v3214_v9 = vcombine.low %v3038_v50, %v3126_v6  ;;  %v3215_v10 = vcombine.high %v3038_v50, %v3126_v6  ;;  %v4343_v11 = vpop.f32.mrb[39].mxu1 }
0x1019   :  { %v3162_v12 = vcombine.low %v3138_v3, %v3154_v7  ;;  %v3163_v16 = vcombine.high %v3138_v3, %v3154_v7  ;;  %v3178_v17 = vcombine.low %v3145_v5, %v3161_v8  ;;  %v3179_v18 = vcombine.high %v3145_v5, %v3161_v8 }
0x101a   :  { %v3222_v20 = vrot.slane %v3214_v9, %v4840_v60  ;;  %v3229_v22 = vrot.slane %v3215_v10, %v4840_v60  ;;  %v4460_v9 = vld [vmem:[%s5500_s8 + $0x18] sm:$0xff]  }
0x101b   :  { %v3170_v19 = vrot.slane %v3162_v12, %v4847_v14  ;;  %v3177_v21 = vrot.slane %v3163_v16, %v4847_v14  ;;  %v3186_v26 = vrot.slane %v3178_v17, %v4847_v14  ;;  %v3193_v23 = vrot.slane %v3179_v18, %v4847_v14  ;;  %4347 = vmatpush3.bf16.msra.mxu0 %v4460_v9 }
0x101c   :  { %v3230_v24 = vcombine.low %v3206_v4, %v3222_v20  ;;  %v3231_v25 = vcombine.high %v3206_v4, %v3222_v20  ;;  %v3246_v27 = vcombine.low %v3213_v13, %v3229_v22  ;;  %v3247_v28 = vcombine.high %v3213_v13, %v3229_v22  ;;  %4360 = vmatprep.subr.bf16.mxu0 %v4623_v15 }
0x101d   :  { %v3266_v29 = vcombine.low %v3170_v19, %v3177_v21  ;;  %v4082_v33 = vcombine.high %v3170_v19, %v3177_v21  ;;  %v3282_v34 = vcombine.low %v3186_v26, %v3193_v23  ;;  %v4083_v35 = vcombine.high %v3186_v26, %v3193_v23 }
0x101e   :  { %v3238_v31 = vrot.slane %v3230_v24, %v4847_v14  ;;  %v3245_v32 = vrot.slane %v3231_v25, %v4847_v14  ;;  %v3254_v36 = vrot.slane %v3246_v27, %v4847_v14  ;;  %v3261_v37 = vrot.slane %v3247_v28, %v4847_v14 }
0x101f   :  { %v3273_v38 = vrot.slane %v3266_v29, %v4840_v60  ;;  %v3281_v40 = vrot.slane %v4082_v33, %v4840_v60  ;;  %v3289_v30 = vrot.slane %v3282_v34, %v4840_v60  ;;  %v3297_v39 = vrot.slane %v4083_v35, %v4840_v60 }
0x1020   :  { %v3334_v43 = vcombine.low %v3238_v31, %v3245_v32  ;;  %v4084_v41 = vcombine.high %v3238_v31, %v3245_v32  ;;  %v3350_v42 = vcombine.low %v3254_v36, %v3261_v37  ;;  %v4085_v48 = vcombine.high %v3254_v36, %v3261_v37  ;;  %v4091_v31 = vld [vmem:[%s5501_s9 + $0x1] ss:$0 sm:$0xff] }
0x1021   :  { %v3299_v44 = vcombine.high %v3273_v38, %v3281_v40  ;;  %v3315_v45 = vcombine.high %v3289_v30, %v3297_v39  ;;  %v3298_v46 = vcombine.low %v3273_v38, %v3281_v40  ;;  %v3314_v47 = vcombine.low %v3289_v30, %v3297_v39 }
0x1022   :  { %v3341_v50 = vrot.slane %v3334_v43, %v4840_v60  ;;  %v3349_v51 = vrot.slane %v4084_v41, %v4840_v60  ;;  %v3357_v52 = vrot.slane %v3350_v42, %v4840_v60  ;;  %v3365_v53 = vrot.slane %v4085_v48, %v4840_v60 }
0x1023   :  { %v3313_v54 = vrot.slane %v3299_v44, %v4847_v14  ;;  %v3329_v55 = vrot.slane %v3315_v45, %v4847_v14  ;;  %v3306_v56 = vrot.slane %v3298_v46, %v4847_v14  ;;  %v3322_v57 = vrot.slane %v3314_v47, %v4847_v14 }
0x1024   :  { %v3367_v58 = vcombine.high %v3341_v50, %v3349_v51  ;;  %v3383_v59 = vcombine.high %v3357_v52, %v3365_v53  ;;  %v3366_v63 = vcombine.low %v3341_v50, %v3349_v51  ;;  %v3382_v0 = vcombine.low %v3357_v52, %v3365_v53  ;;  %v4462_v53 = vld [vmem:[%s5502_s10 + $0x18] sm:$0xff]  }
0x1025   :  { %v3332_v1 = vcombine.low %v3313_v54, %v3329_v55  ;;  %v3330_v2 = vcombine.low %v3306_v56, %v3322_v57  ;;  %v3331_v3 = vcombine.high %v3306_v56, %v3322_v57  ;;  %v3333_v5 = vcombine.high %v3313_v54, %v3329_v55 }
0x1026   :  { %v3381_v60 = vrot.slane %v3367_v58, %v4847_v14  ;;  %v3397_v6 = vrot.slane %v3383_v59, %v4847_v14  ;;  %v3374_v7 = vrot.slane %v3366_v63, %v4847_v14  ;;  %v3390_v8 = vrot.slane %v3382_v0, %v4847_v14  ;;  %v4097_v0 = vld [vmem:[%s5506_s14 + $0x1] ss:$0 sm:$0xff] }
0x1028   :  { %v3400_v10 = vcombine.low %v3381_v60, %v3397_v6  ;;  %v3399_v11 = vcombine.high %v3374_v7, %v3390_v8  ;;  %v3398_v12 = vcombine.low %v3374_v7, %v3390_v8  ;;  %v3401_v16 = vcombine.high %v3381_v60, %v3397_v6  ;;  %v4098_v60 = vld [vmem:[%s5507_s15 + $0x1] ss:$0 sm:$0xff] }
0x102a   :  { %v4437_v17 = vpack.i.bf16 %v3400_v10, %v3332_v1  ;;  %v4432_v18 = vpack.i.bf16 %v3399_v11, %v3331_v3  ;;  %v4442_v4 = vpack.i.bf16 %v3401_v16, %v3333_v5  ;;  %v4463_v10 = vld [vmem:[%s5504_s12 + $0x20] sm:$0xff]   ;;  %v4464_v11 = vld [vmem:[%s5504_s12 + $0x28] sm:$0xff]   ;;  %v4466_v16 = vld [vmem:[%s5504_s12 + $0x38] sm:$0xff]  }
0x102c   :  { %4438 = vrot.lane.b32.xlu0 %v4437_v17, %s5559_s6  ;;  %4433 = vrot.lane.b32.xlu1 %v4432_v18, %s5558_s26  ;;  %v4104_v17 = vld [vmem:[%s5503_s11 + $0x1] ss:$0 sm:$0xff]  ;;  %s4575_s11 = scalar_lea.vmem %s4018_s28, 32 }
0x102d   :  { %p4576_p0 = scmp.ne.s32.totalorder %s4018_s28, %s4575_s11  ;;  %p4581_p2 = scmp.lt.s32.totalorder %s4575_s11, %s4575_s11 }
0x102f   :  { %p4582_p3 = por %p4581_p2, %p4580_p1 }
0x1030   :  { %4443 = vrot.lane.b32.xlu1 %v4442_v4, %s5556_s5 }
0x1031   :  { %p4583_p4 = pnand %p4582_p3, %p4576_p0 }
0x109e   :  { %v4439_v14 = vpop.permute.xlu0 %4438  ;;  %v4434_v13 = vpop.permute.xlu1 %4433 }
0x109f   :  { %v4436_v20 = vunpack.i.h.bf16 %v4434_v13  ;;  %v4435_v22 = vunpack.i.l.bf16 %v4434_v13  ;;  %v4441_v19 = vunpack.i.h.bf16 %v4439_v14  ;;  %v4440_v21 = vunpack.i.l.bf16 %v4439_v14 }
0x10a1   :  { %v3426_v26 = vsel %vm853_vm2, %v3330_v2, %v4435_v22  ;;  %v3427_v23 = vsel %vm853_vm2, %v3398_v12, %v4436_v20  ;;  %v4465_v12 = vld [vmem:[%s5504_s12 + $0x30] sm:$0xff]  }
0x10a2   :  { %v4444_v24 = vpop.permute.xlu1 %4443  ;;  %v3428_v28 = vsel %vm1042_vm3, %v3426_v26, %v4440_v21  ;;  %v3429_v29 = vsel %vm1042_vm3, %v3427_v23, %v4441_v19 }
0x10a3   :  { %v4446_v25 = vunpack.i.h.bf16 %v4444_v24  ;;  %v4445_v27 = vunpack.i.l.bf16 %v4444_v24 }
0x10a5   :  { %v3430_v33 = vsel %vm1611_vm4, %v3428_v28, %v4445_v27  ;;  %v3431_v34 = vsel %vm1611_vm4, %v3429_v29, %v4446_v25 }
0x10a6   :  { %v3432_v35 = vpack.c.bf16 %v3431_v34, %v3430_v33 }
0x10a8   :  { %4349 = vmatmul.mubr.msk.bf16.vlgmr.msra.gmra.mrb[44].mxu0 %vm80_vm0, %v3432_v35 }
0x10a9   :  { %4368 = vmatprep.mubr.msk.bf16.mxu0 %vm4624_vm1, %v4623_v15  ;;  %4361 = vmatpush3.bf16.msra.mxu0 %v4463_v10 }
0x10aa   :  { %4362 = vmatprep.subr.bf16.mxu0 %v4623_v15 }
0x10ad   :  { %4363 = vmatpush3.bf16.msra.mxu0 %v4464_v11 }
0x10ae   :  { %4364 = vmatprep.subr.bf16.mxu0 %v4623_v15 }
0x10b1   :  { %4365 = vmatpush3.bf16.msra.mxu0 %v4465_v12  ;;  %v4126_v12 = vld [vmem:[%s5509_s17 + $0x1] ss:$0 sm:$0xff] }
0x10b2   :  { %4366 = vmatprep.subr.bf16.mxu0 %v4623_v15 }
0x10b5   :  { %4367 = vmatpush3.bf16.msra.mxu0 %v4466_v16 }
0x10b6   :  { %4386 = vmatprep.subr.bf16.mxu0 %v4623_v15 }
0x117b   :  { %v3495_v32 = vpop.f32.mrb[44].mxu0 }
0x117c   :  { %v3496_v36 = vadd.f32 %v4091_v31, %v3495_v32  ;;  %v4350_v37 = vpop.f32.mrb[45].mxu0 }
0x117d   :  { %v3498_v38 = vpop.f32.mrb[46].mxu0 }
0x117e   :  { %v3499_v40 = vadd.f32 %v4091_v31, %v3498_v38  ;;  %v4351_v30 = vpop.f32.mrb[47].mxu0  ;;  %v3502_v39 = vadd.f32 %v3496_v36, %v5125_v61 }
0x1180   :  { %v3508_v43 = vsel %vm80_vm0, %v3502_v39, 0.0  ;;  %v3503_v41 = vadd.f32 %v3499_v40, %v5127_v62  ;;  %v4461_v62 = vld [vmem:[%s5502_s10 + $0x10] sm:$0xff]  }
0x1181   :  { %3509 = vadd.xlane.f32.xlu1 %v3508_v43  ;;  %4353 = vmatpush3.bf16.msra.mxu1 %v4461_v62 }
0x1182   :  { %v3511_v42 = vsel %vm80_vm0, %v3503_v41, 0.0  ;;  %4354 = vmatprep.subr.bf16.mxu1 %v4623_v15 }
0x1183   :  { %3512 = vadd.xlane.f32.xlu0 %v3511_v42 }
0x1185   :  { %4355 = vmatpush3.bf16.msra.mxu1 %v4462_v53 }
0x1186   :  { %4372 = vmatprep.subr.bf16.mxu1 %v4623_v15 }
0x120e   :  { %v3510_v48 = vpop.xlane.xlu1 %3509 }
0x120f   :  { %v3514_v44 = vmul.f32 0.03125, %v3510_v48 }
0x1210   :  { %v3513_v45 = vpop.xlane.xlu0 %3512 }
0x1211   :  { %v3516_v46 = vsub.f32 %v3502_v39, %v3514_v44  ;;  %v3515_v47 = vmul.f32 0.03125, %v3513_v45  ;;  %v4117_v39 = vld [vmem:[%s5505_s13 + $0x1] ss:$0 sm:$0xff] }
0x1213   :  { %v3517_v49 = vsub.f32 %v3503_v41, %v3515_v47  ;;  %v3518_v50 = vmul.f32 %v3516_v46, %v3516_v46 }
0x1215   :  { %v3520_v51 = vsel %vm80_vm0, %v3518_v50, 0.0  ;;  %v3519_v52 = vmul.f32 %v3517_v49, %v3517_v49 }
0x1216   :  { %3521 = vadd.xlane.f32.xlu0 %v3520_v51 }
0x1217   :  { %v3523_v61 = vsel %vm80_vm0, %v3519_v52, 0.0 }
0x1218   :  { %3524 = vadd.xlane.f32.xlu1 %v3523_v61 }
0x12a3   :  { %v3522_v54 = vpop.xlane.xlu0 %3521 }
0x12a4   :  { %v3526_v55 = vmul.f32 0.03125, %v3522_v54 }
0x12a5   :  { %v3525_v56 = vpop.xlane.xlu1 %3524 }
0x12a6   :  { %v3528_v57 = vadd.f32 1e-12, %v3526_v55  ;;  %v3527_v58 = vmul.f32 0.03125, %v3525_v56 }
0x12a8   :  { %4551 = vrsqrt.f32 %v3528_v57  ;;  %v3529_v59 = vadd.f32 1e-12, %v3527_v58 }
0x12aa   :  { %4553 = vrsqrt.f32 %v3529_v59  ;;  %v4467_v59 = vld [vmem:[%s5512_s20] sm:$0xff]  }
0x12b2   :  { %v4552_v63 = vpop.eup %4551 }
0x12b3   :  { %v3532_v1 = vmul.f32 %v4552_v63, %v3516_v46  ;;  %v4468_v63 = vld [vmem:[%s5512_s20 + $0x8] sm:$0xff]  }
0x12b4   :  { %v4554_v2 = vpop.eup %4553 }
0x12b5   :  { %v3540_v3 = vmul.f32 %v4097_v0, %v3532_v1  ;;  %v3533_v5 = vmul.f32 %v4554_v2, %v3517_v49 }
0x12b7   :  { %v3541_v6 = vmul.f32 %v4097_v0, %v3533_v5  ;;  %v3548_v7 = vadd.f32 %v4098_v60, %v3540_v3 }
0x12b9   :  { %v3549_v8 = vadd.f32 %v4098_v60, %v3541_v6 }
0x12bb   :  { %v3550_v9 = vpack.c.bf16 %v3549_v8, %v3548_v7 }
0x12bd   :  { %4357 = vmatmul.mubr.msk.bf16.vlgmr.msra.gmra.mrb[40].mxu1 %vm80_vm0, %v3550_v9 }
0x12be   :  { %4374 = vmatprep.mubr.msk.bf16.mxu1 %vm4624_vm1, %v4623_v15 }
0x1390   :  { %v3613_v18 = vpop.f32.mrb[40].mxu1 }
0x1391   :  { %v3614_v4 = vadd.f32 %v4104_v17, %v3613_v18  ;;  %v4358_v14 = vpop.f32.mrb[41].mxu1 }
0x1392   :  { %v3616_v13 = vpop.f32.mrb[42].mxu1 }
0x1393   :  { %v3620_v20 = vmul.f32 %v3614_v4, %v3614_v4  ;;  %v3617_v22 = vadd.f32 %v4104_v17, %v3616_v13  ;;  %v4359_v19 = vpop.f32.mrb[43].mxu1  ;;  %v4132_v13 = vld [vmem:[%s5513_s21] ss:$0 sm:$0xff] }
0x1395   :  { %v3622_v21 = vmul.f32 %v3620_v20, %v3614_v4  ;;  %v3621_v26 = vmul.f32 %v3617_v22, %v3617_v22 }
0x1397   :  { %v3624_v23 = vmul.f32 0.044715, %v3622_v21  ;;  %v3623_v24 = vmul.f32 %v3621_v26, %v3617_v22 }
0x1399   :  { %v3626_v25 = vadd.f32 %v3624_v23, %v3614_v4  ;;  %v3625_v27 = vmul.f32 0.044715, %v3623_v24  ;;  %v4469_v24 = vld [vmem:[%s5510_s18] sm:$0xff]  }
0x139b   :  { %v3628_v28 = vmul.f32 0.7978846, %v3626_v25  ;;  %v3627_v29 = vadd.f32 %v3625_v27, %v3617_v22  ;;  %v4470_v25 = vld [vmem:[%s5510_s18 + $0x8] sm:$0xff]  }
0x139d   :  { %4555 = vtanh.f32 %v3628_v28  ;;  %v3629_v33 = vmul.f32 0.7978846, %v3627_v29 }
0x139f   :  { %4557 = vtanh.f32 %v3629_v33 }
0x13a7   :  { %v4556_v34 = vpop.eup %4555 }
0x13a8   :  { %v3632_v35 = vadd.f32 1.0, %v4556_v34 }
0x13a9   :  { %v4558_v31 = vpop.eup %4557 }
0x13aa   :  { %v3634_v32 = vmul.f32 0.5, %v3632_v35  ;;  %v3633_v36 = vadd.f32 1.0, %v4558_v31 }
0x13ac   :  { %v3635_v37 = vmul.f32 0.5, %v3633_v36  ;;  %v3636_v38 = vmul.f32 %v3634_v32, %v3614_v4 }
0x13ae   :  { %v3637_v40 = vmul.f32 %v3635_v37, %v3617_v22 }
0x13b0   :  { %v3638_v30 = vpack.c.bf16 %v3637_v40, %v3636_v38 }
0x13b2   :  { %4369 = vmatmul.mubr.msk.bf16.vlgmr.msra.gmra.mrb[48].mxu0 %vm1854_vm5, %v3638_v30 }
0x13b3   :  { %4390 = vmatprep.mubr.msk.bf16.mxu0 %vm4624_vm1, %v4623_v15  ;;  %4387 = vmatpush3.bf16.msra.mxu0 %v4467_v59 }
0x13b4   :  { %4388 = vmatprep.subr.bf16.mxu0 %v4623_v15 }
0x13b7   :  { %4389 = vmatpush3.bf16.msra.mxu0 %v4468_v63 }
0x1485   :  { %v3717_v43 = vpop.f32.mrb[48].mxu0 }
0x1486   :  { %v3718_v41 = vadd.f32 %v4117_v39, %v3717_v43  ;;  %v4370_v42 = vpop.f32.mrb[49].mxu0 }
0x1487   :  { %v3720_v48 = vpop.f32.mrb[50].mxu0 }
0x1488   :  { %v3721_v44 = vadd.f32 %v4117_v39, %v3720_v48  ;;  %v4371_v45 = vpop.f32.mrb[51].mxu0  ;;  %v3724_v46 = vadd.f32 %v3718_v41, %v3548_v7  ;;  %v4125_v7 = vld [vmem:[%s5508_s16 + $0x1] ss:$0 sm:$0xff]  ;;  %s5560_s16 = sld [smem:[#allocation11_spill]]  ;;  %v3974_v39 = vld [vmem:[%s5561_s4 + $0x8] sm:$0xff] }
0x148a   :  { %v3730_v47 = vsel %vm80_vm0, %v3724_v46, 0.0  ;;  %v3725_v49 = vadd.f32 %v3721_v44, %v3549_v8 }
0x148b   :  { %3731 = vadd.xlane.f32.xlu0 %v3730_v47 }
0x148c   :  { %v3733_v50 = vsel %vm80_vm0, %v3725_v49, 0.0 }
0x148d   :  { %3734 = vadd.xlane.f32.xlu1 %v3733_v50 }
0x148e   :  { %v3773_v14 = vld [vmem:[%s5560_s16] sm:$0x1] }
0x1518   :  { %v3732_v51 = vpop.xlane.xlu0 %3731 }
0x1519   :  { %v3736_v52 = vmul.f32 0.03125, %v3732_v51 }
0x151a   :  { %v3735_v61 = vpop.xlane.xlu1 %3734 }
0x151b   :  { %v3738_v62 = vsub.f32 %v3724_v46, %v3736_v52  ;;  %v3737_v53 = vmul.f32 0.03125, %v3735_v61 }
0x151d   :  { %v3739_v54 = vsub.f32 %v3725_v49, %v3737_v53  ;;  %v3740_v55 = vmul.f32 %v3738_v62, %v3738_v62 }
0x151f   :  { %v3742_v56 = vsel %vm80_vm0, %v3740_v55, 0.0  ;;  %v3741_v57 = vmul.f32 %v3739_v54, %v3739_v54 }
0x1520   :  { %3743 = vadd.xlane.f32.xlu0 %v3742_v56  ;;  %v4128_v56 = vld [vmem:[%s5511_s19] ss:$0 sm:$0xff] }
0x1521   :  { %v3745_v58 = vsel %vm80_vm0, %v3741_v57, 0.0 }
0x1522   :  { %3746 = vadd.xlane.f32.xlu1 %v3745_v58 }
0x15ad   :  { %v3744_v0 = vpop.xlane.xlu0 %3743 }
0x15ae   :  { %v3748_v1 = vmul.f32 0.03125, %v3744_v0 }
0x15af   :  { %v3747_v2 = vpop.xlane.xlu1 %3746 }
0x15b0   :  { %v3750_v3 = vadd.f32 1e-12, %v3748_v1  ;;  %v3749_v5 = vmul.f32 0.03125, %v3747_v2 }
0x15b2   :  { %4559 = vrsqrt.f32 %v3750_v3  ;;  %v3751_v60 = vadd.f32 1e-12, %v3749_v5 }
0x15b4   :  { %4561 = vrsqrt.f32 %v3751_v60 }
0x15bc   :  { %v4560_v6 = vpop.eup %4559 }
0x15bd   :  { %v3754_v8 = vmul.f32 %v4560_v6, %v3738_v62 }
0x15be   :  { %v4562_v9 = vpop.eup %4561 }
0x15bf   :  { %v3755_v10 = vmul.f32 %v4562_v9, %v3739_v54  ;;  %v3762_v11 = vmul.f32 %v4125_v7, %v3754_v8 }
0x15c1   :  { %v3763_v16 = vmul.f32 %v4125_v7, %v3755_v10  ;;  %v3770_v17 = vadd.f32 %v4126_v12, %v3762_v11 }
0x15c3   :  { %v3771_v18 = vadd.f32 %v4126_v12, %v3763_v16 }
0x15c5   :  { %v3772_v4 = vpack.c.bf16 %v3771_v18, %v3770_v17 }
0x15c7   :  { %4373 = vmatpush3.bf16.msra.mxu1 %v3772_v4  ;;  %4391 = vmatmul.mubr.msk.bf16.vlgmr.msra.gmra.mrb[52].mxu0 %vm80_vm0, %v3772_v4 }
0x15c8   :  { %4378 = vmatprep.subr.bf16.mxu1 %v4623_v15 }
0x15ca   :  { %4375 = vmatmul.mubr.msk.bf16.vlgmr.msra.gmra.mrb[44].mxu1 %vm1042_vm3, %v3773_v14 }
0x15cb   :  { %4382 = vmatprep.mubr.msk.bf16.mxu1 %vm4624_vm1, %v4623_v15  ;;  %4379 = vmatpush3.bf16.msra.mxu1 %v4469_v24 }
0x15cc   :  { %4380 = vmatprep.subr.bf16.mxu1 %v4623_v15  ;;  %v3973_v15 = vld [vmem:[%s5561_s4] sm:$0xff] }
0x15cf   :  { %4381 = vmatpush3.bf16.msra.mxu1 %v4470_v25 }
0x169a   :  { %v3946_v20 = vpop.f32.mrb[52].mxu0 }
0x169b   :  { %v3947_v22 = vadd.f32 %v4132_v13, %v3946_v20  ;;  %v4392_v19 = vpop.f32.mrb[53].mxu0 }
0x169c   :  { %v3949_v21 = vpop.f32.mrb[54].mxu0 }
0x169d   :  { %v3950_v26 = vadd.f32 %v4132_v13, %v3949_v21  ;;  %3953 = vmax.xlane.f32.xlu0 %v3947_v22  ;;  %v4393_v23 = vpop.f32.mrb[55].mxu0  ;;  %v3811_v27 = vpop.f32.mrb[44].mxu1  ;;  %v3975_v43 = vmul.f32 %v3973_v15, %v3947_v22 }
0x169e   :  { %v3817_v28 = vpack.c.bf16 %v3811_v27, %v3811_v27  ;;  %v4376_v29 = vpop.f32.mrb[45].mxu1 }
0x169f   :  { %3955 = vmax.xlane.f32.xlu1 %v3950_v26  ;;  %v3814_v33 = vpop.f32.mrb[46].mxu1  ;;  %v3976_v41 = vmul.f32 %v3974_v39, %v3950_v26 }
0x16a0   :  { %v4377_v34 = vpop.f32.mrb[47].mxu1  ;;  %4383 = vmatmul.mubr.msk.bf16.vlgmr.msra.gmra.mrb[48].mxu1 %vm80_vm0, %v3817_v28 }
0x172a   :  { %v3954_v35 = vpop.xlane.xlu0 %3953 }
0x172b   :  { %v3957_v31 = vsub.f32 %v3947_v22, %v3954_v35 }
0x172c   :  { %v3956_v32 = vpop.xlane.xlu1 %3955 }
0x172d   :  { %v3959_v36 = vmul.f32 1.442695, %v3957_v31  ;;  %v3958_v37 = vsub.f32 %v3950_v26, %v3956_v32 }
0x172f   :  { %4563 = vpow2.f32 %v3959_v36  ;;  %v3961_v38 = vmul.f32 1.442695, %v3958_v37 }
0x1731   :  { %4565 = vpow2.f32 %v3961_v38 }
0x1739   :  { %v4564_v40 = vpop.eup %4563 }
0x173a   :  { %3963 = vadd.xlane.f32.xlu0 %v4564_v40 }
0x173b   :  { %v4566_v30 = vpop.eup %4565 }
0x173c   :  { %3965 = vadd.xlane.f32.xlu1 %v4566_v30 }
0x173e   :  { %3977 = vadd.xlane.f32.xlu0 %v3975_v43 }
0x1740   :  { %3979 = vadd.xlane.f32.xlu1 %v3976_v41 }
0x1773   :  { %v3878_v57 = vpop.f32.mrb[48].mxu1 }
0x1774   :  { %v3879_v58 = vadd.f32 %v4128_v56, %v3878_v57  ;;  %v4384_v59 = vpop.f32.mrb[49].mxu1 }
0x1775   :  { %v3881_v63 = vpop.f32.mrb[50].mxu1 }
0x1776   :  { %v4385_v0 = vpop.f32.mrb[51].mxu1 }
0x17c7   :  { %v3964_v42 = vpop.xlane.xlu0 %3963 }
0x17c8   :  { %4567 = vlog2.f32 %v3964_v42 }
0x17c9   :  { %v3966_v48 = vpop.xlane.xlu1 %3965 }
0x17ca   :  { %4569 = vlog2.f32 %v3966_v48 }
0x17cb   :  { %v3978_v50 = vpop.xlane.xlu0 %3977  ;;  %4571 = vtanh.f32 %v3879_v58 }
0x17cd   :  { %v3980_v61 = vpop.xlane.xlu1 %3979 }
0x17d2   :  { %v4568_v44 = vpop.eup %4567 }
0x17d3   :  { %v3968_v45 = vmul.f32 0.6931472, %v4568_v44 }
0x17d4   :  { %v4570_v46 = vpop.eup %4569 }
0x17d5   :  { %v3970_v47 = vmul.f32 0.6931472, %v4570_v46  ;;  %v3971_v49 = vadd.f32 %v3968_v45, %v3954_v35  ;;  %v4572_v1 = vpop.eup %4571 }
0x17d6   :  { %3885 = vst [vmem:[#allocation4] sm:$0x3] %v4572_v1 }
0x17d7   :  { %v3981_v51 = vsub.f32 %v3971_v49, %v3978_v50  ;;  %v3972_v52 = vadd.f32 %v3970_v47, %v3956_v32 }
0x17d9   :  { %v3982_v62 = vsub.f32 %v3972_v52, %v3980_v61  ;;  %v3984_v53 = vsel %vm3983_vm6, %v3981_v51, 0.0 }
0x17db   :  { %v3985_v54 = vsel %vm3983_vm6, %v3982_v62, 0.0 }
0x17dc   :  { %v3986_v55 = vadd.f32 %v3985_v54, %v3984_v53 }
0x17de   :  { %3987 = vadd.xlane.f32.xlu0 %v3986_v55 }
0x17df   :  { %4586 = shalt.err (!%p4583_p4)
}
0x17e0   :  { %s4587_s13 = scalar_lea.hbm %s5515_s23, 32 }
0x17e1   :  { %p4588_p5 = scmp.ne.s32.totalorder %s5515_s23, %s4587_s13  ;;  %p4591_p6 = scmp.lt.u32.totalorder %s4587_s13, %s5515_s23 }
0x17e3   :  { %p4593_p7 = pnand %p4591_p6, %p4588_p5 }
0x17e5   :  { %4596 = shalt.err (!%p4593_p7)
}
0x17e6   :  { %4020 = dma.vmem_to_hbm [thread:$0]  %s4018_s28, 32, %s5515_s23, [#allocation5]   ;;  %vm3999_vm7 = vcmask 0  }
0x17e7   :  { %s4643_s5 = smov [#allocation2]  }
0x17e8   :  { %s4007_s1 = sshll.u32 %s4643_s5, 4  ;;  %s4008_s1 = int_to_ptr.vmem [resolvable:$true] %s4007_s1 }
0x17e9   :  { %s4597_s16 = scalar_lea.vmem %s4008_s1, 16  ;;  %s4601_s10 = scalar_lea.vmem %s4008_s1, 32 }
0x17ea   :  { %p4598_p8 = scmp.ne.s32.totalorder %s4008_s1, %s4597_s16  ;;  %p4602_p9 = scmp.lt.s32.totalorder %s4008_s1, %s4008_s1 }
0x17eb   :  { %p4603_p10 = scmp.lt.s32.totalorder %s4601_s10, %s4597_s16 }
0x17ed   :  { %p4604_p11 = por %p4603_p10, %p4602_p9 }
0x17ef   :  { %p4605_p12 = pnand %p4604_p11, %p4598_p8 }
0x186b   :  { %v3988_v2 = vpop.xlane.xlu0 %3987 }
0x186c   :  { %v3989_v3 = vrot.slane %v3988_v2, 4 }
0x186e   :  { %v3990_v5 = vadd.f32 %v3989_v3, %v3988_v2 }
0x1870   :  { %v3991_v60 = vrot.slane %v3990_v5, 2 }
0x1872   :  { %v3992_v6 = vadd.f32 %v3991_v60, %v3990_v5 }
0x1874   :  { %v3993_v7 = vrot.slane %v3992_v6, 1 }
0x1876   :  { %v3994_v8 = vadd.f32 %v3993_v7, %v3992_v6 }
0x1878   :  { %4394 = vpush %v3994_v8 }
0x18a9   :  { %s4395_s26 = spop %4394 }
0x18aa   :  { %v3996_v9 = vstv %s4395_s26 }
0x18ab   :  { %v3998_v10 = vmul.f32 0.0625, %v3996_v9 }
0x18ad   :  { %4000 = vst.msk [vmem:[#allocation2] sm:$0x1] %vm3999_vm7, %v3998_v10 }
0x18ae   :  { %4608 = shalt.err (!%p4605_p12)
}
0x18af   :  { %s4609_s6 = scalar_lea.hbm %s5514_s22, 16 }
0x18b0   :  { %p4610_p13 = scmp.ne.s32.totalorder %s5514_s22, %s4609_s6  ;;  %p4613_p0 = scmp.lt.u32.totalorder %s4609_s6, %s5514_s22 }
0x18b2   :  { %p4615_p1 = pnand %p4613_p0, %p4610_p13 }
0x18b4   :  { %4618 = shalt.err (!%p4615_p1)
}
0x18b5   :  { %4010 = dma.vmem_to_hbm [thread:$0]  %s4008_s1, 16, %s5514_s22, [#allocation3]  }
0x18b6   :  { %4619 = dma.done.wait [#allocation3], 16  }
0x18b7   :  { %4620 = vsyncadd [#allocation3], 4294967280 }
0x18b8   :  { %4621 = dma.done.wait [#allocation5], 32  }
0x18b9   :  { %4622 = vsyncadd [#allocation5], 4294967264 }
0x18ba   :  { %4027 = vsyncpa [#allocation3], 1 }
0x18bb   :  { %4028 = vsyncpa [#allocation5], 1 }

</bundles_post_ra>
